<compile_context>
chip_gen: v7x
topology: tpu7x:2x2x1
jax: 0.10.0
libtpu: 0.0.40
codegen_flags: <defaults>
</compile_context>

<pallas_src>
import functools

import jax
import jax.numpy as jnp
from jax import lax
from jax.experimental import pallas as pl
from jax.experimental.pallas import tpu as pltpu


# ---------------------------------------------------------------------------
# Kernel 1: sequential recurrence, time-chunked, hidden state carried in VMEM.
# ---------------------------------------------------------------------------
def _recurrent_kernel(
    gx0_ref,        # (chunk, B, 3H) precomputed emb @ w_ih0 + b_ih0 for this chunk
    ctx_ref,        # (B, S, C)      source annotations (batch-major), mask=None
    ctxp_ref,       # (B, S, MID)    precomputed ctx @ w_c2c (ctx2ctx)
    w_hh0_ref, b_hh0_ref,            # dec0 hidden-to-gates (H, 3H), (1, 3H)
    w_h1f_ref,                       # (H, MID+3H) fused [hid2ctx | dec1.W_hh]
    b_hh1_ref,                       # (1, 3H)
    w_zc1_ref,                       # (C, 3H)  folded ctx2hid @ dec1.W_ih
    b_ih1_ref,                       # (1, 3H)
    w_mlp_ref,                       # (1, MID)
    h2_seq_ref,     # out: (chunk, B, H)
    h_sc,           # scratch: (B, H) carried hidden state
    *, chunk, H, MID,
):
    @pl.when(pl.program_id(0) == 0)
    def _():
        h_sc[...] = jnp.zeros_like(h_sc)          # dec_init='zero'

    # Hoist all weight / invariant loads out of the recurrence.
    w_hh0 = w_hh0_ref[...]
    b_hh0 = b_hh0_ref[...]
    w_h1f = w_h1f_ref[...]
    b_hh1 = b_hh1_ref[...]
    w_zc1 = w_zc1_ref[...]
    b_ih1 = b_ih1_ref[...]
    w_mlp = w_mlp_ref[...][None]                  # (1, 1, MID)
    ctx = ctx_ref[...]                            # (B, S, C)
    ctx_p = ctxp_ref[...]                         # (B, S, MID)

    def step(t, h):
        # --- dec0 GRUCell(E, H): input gates precomputed, h-path only ---
        gx0 = gx0_ref[t]                                                   # (B, 3H)
        gh0 = jnp.dot(h, w_hh0, preferred_element_type=jnp.float32) + b_hh0
        r0 = jax.nn.sigmoid(gx0[:, 0:H] + gh0[:, 0:H])
        z0 = jax.nn.sigmoid(gx0[:, H:2 * H] + gh0[:, H:2 * H])
        n0 = jnp.tanh(gx0[:, 2 * H:3 * H] + r0 * gh0[:, 2 * H:3 * H])
        h1 = (1.0 - z0) * n0 + z0 * h

        # --- fused h1-side matmul: [hid2ctx | dec1.W_hh], lane-dense MID+3H ---
        hf = jnp.dot(h1, w_h1f, preferred_element_type=jnp.float32)        # (B, MID+3H)
        hid_p = hf[:, :MID]                                                # hid2ctx(h1)
        gh1 = hf[:, MID:] + b_hh1                                          # dec1 h-gates

        # --- MLP attention over S (dl4mt style) ---
        inner = jnp.tanh(ctx_p + hid_p[:, None, :])                        # (B, S, MID)
        scores = jnp.sum(inner * w_mlp, axis=-1)                           # (B, S)
        m = jnp.max(scores, axis=-1, keepdims=True)
        e = jnp.exp(scores - m)
        alpha = e * pl.reciprocal(jnp.sum(e, axis=-1, keepdims=True), approx=True)
        z_c = jnp.sum(alpha[:, :, None] * ctx, axis=1)                     # (B, C)

        # --- dec1 GRUCell(H, H): input gates straight from z_c (ctx2hid folded) ---
        gz1 = jnp.dot(z_c, w_zc1, preferred_element_type=jnp.float32) + b_ih1
        r1 = jax.nn.sigmoid(gz1[:, 0:H] + gh1[:, 0:H])
        z1 = jax.nn.sigmoid(gz1[:, H:2 * H] + gh1[:, H:2 * H])
        n1 = jnp.tanh(gz1[:, 2 * H:3 * H] + r1 * gh1[:, 2 * H:3 * H])
        h2 = (1.0 - z1) * n1 + z1 * h1

        h2_seq_ref[t] = h2
        return h2

    # Bounded unroll per chunk (full-sequence unroll avoided for production T).
    h_sc[...] = lax.fori_loop(0, chunk, step, h_sc[...], unroll=True)


# ---------------------------------------------------------------------------
# Kernel 2: output head.  Row tiles 'parallel' x vocab tiles 'arbitrary'.
# Online logsumexp over vocab tiles + target-logit accumulator; per-tile
# partial NLL sum output (ignore_index=0).
# ---------------------------------------------------------------------------
def _head_kernel(h2_ref, tgt_ref, w_h2o_ref, b_h2o_ref, w_o2p_ref, b_o2p_ref,
                 nll_ref, logit_sc, m_sc, l_sc, tl_sc, *, v_tile):
    j = pl.program_id(1)

    @pl.when(j == 0)
    def _():
        # out_logic='simple': hid2out (tanh, zero bias); computed once per row tile.
        logit_sc[...] = jnp.tanh(
            jnp.dot(h2_ref[...], w_h2o_ref[...],
                    preferred_element_type=jnp.float32) + b_h2o_ref[...])
        m_sc[...] = jnp.full(m_sc.shape, -1e30, jnp.float32)
        l_sc[...] = jnp.zeros_like(l_sc)
        tl_sc[...] = jnp.zeros_like(tl_sc)

    # out2prob for this vocab tile
    sc = jnp.dot(logit_sc[...], w_o2p_ref[...],
                 preferred_element_type=jnp.float32) + b_o2p_ref[...]      # (R, v_tile)

    # Online logsumexp accumulation.
    m_new = jnp.maximum(m_sc[...], jnp.max(sc, axis=-1, keepdims=True))
    l_sc[...] = (jnp.exp(m_sc[...] - m_new) * l_sc[...]
                 + jnp.sum(jnp.exp(sc - m_new), axis=-1, keepdims=True))
    m_sc[...] = m_new

    # Target-logit accumulation (target falls in exactly one vocab tile).
    tgt = tgt_ref[...]                                                     # (R, 1)
    cols = lax.broadcasted_iota(jnp.int32, sc.shape, 1) + j * v_tile
    tl_sc[...] += jnp.sum(jnp.where(cols == tgt, sc, 0.0), axis=-1, keepdims=True)

    @pl.when(j == pl.num_programs(1) - 1)
    def _():
        # NLLLoss(reduction='sum', ignore_index=0): per-row -(log_p[tgt]),
        # reduced to one partial sum per row tile.
        lse = m_sc[...] + jnp.log(l_sc[...])
        nll_row = jnp.where(tgt != 0, lse - tl_sc[...], 0.0)               # (R, 1)
        nll_ref[...] = jnp.sum(nll_row, axis=0, keepdims=True)             # (1, 1)


# ---------------------------------------------------------------------------
# Wrapper: precomputes + two pallas_calls.
# ---------------------------------------------------------------------------
def conditional_decoder_loss(params, ctx, y, *, time_chunk=4, row_tile=256,
                             v_tile=128):
    T, B = y.shape
    S, _, C = ctx.shape
    V, E = params['emb'].shape
    H = params['w_hh0'].shape[0]
    MID = params['w_c2c'].shape[1]
    n_steps = T - 1

    # ---- glue (XLA): gather + time-invariant / non-recurrent precomputes ----
    emb_seq = jnp.take(params['emb'], y[:-1], axis=0)                      # (T-1, B, E)
    gx0_seq = (jnp.einsum('tbe,eg->tbg', emb_seq, params['w_ih0'])
               + params['b_ih0'][None])                                    # (T-1, B, 3H)
    ctx_b = jnp.transpose(ctx, (1, 0, 2))                                  # (B, S, C)
    ctx_p = jnp.einsum('bsc,cm->bsm', ctx_b, params['w_c2c'])              # (B, S, MID)

    # Fused h1-side weights and folded dec1 input-gate weights (exact folds).
    w_h1f = jnp.concatenate([params['w_h2c'], params['w_hh1']], axis=1)    # (H, MID+3H)
    w_zc1 = params['w_c2h'] @ params['w_ih1']                              # (C, 3H)

    # Pad time to a multiple of the chunk (padded steps are well-defined and
    # discarded; only the last chunk can be partial).
    num_chunks = pl.cdiv(n_steps, time_chunk)
    n_pad = num_chunks * time_chunk
    if n_pad != n_steps:
        gx0_seq = jnp.pad(gx0_seq, ((0, n_pad - n_steps), (0, 0), (0, 0)))

    rec_inputs = [gx0_seq, ctx_b, ctx_p,
                  params['w_hh0'], params['b_hh0'],
                  w_h1f, params['b_hh1'],
                  w_zc1, params['b_ih1'],
                  params['w_mlp']]

    def const_spec(arr):
        nd = arr.ndim
        return pl.BlockSpec(arr.shape, lambda c, _nd=nd: (0,) * _nd)

    # --- call 1: sequential recurrence over time chunks, carried state ---
    h2_seq = pl.pallas_call(
        functools.partial(_recurrent_kernel, chunk=time_chunk, H=H, MID=MID),
        out_shape=jax.ShapeDtypeStruct((n_pad, B, H), jnp.float32),
        grid_spec=pltpu.PrefetchScalarGridSpec(
            num_scalar_prefetch=0,
            grid=(num_chunks,),
            in_specs=[pl.BlockSpec((time_chunk, B, 3 * H), lambda c: (c, 0, 0))]
                     + [const_spec(a) for a in rec_inputs[1:]],
            out_specs=pl.BlockSpec((time_chunk, B, H), lambda c: (c, 0, 0)),
            scratch_shapes=[pltpu.VMEM((B, H), jnp.float32)]),
        compiler_params=pltpu.CompilerParams(
            dimension_semantics=("arbitrary",)),     # recurrence is sequential
    )(*rec_inputs)

    # --- call 2: output head, parallel row tiles x arbitrary vocab tiles ---
    N = n_steps * B
    row_tile = min(row_tile, -(-N // 8) * 8)         # sublane-aligned, <= N rounded up
    num_row_tiles = pl.cdiv(N, row_tile)
    N_pad = num_row_tiles * row_tile
    h2_flat = h2_seq[:n_steps].reshape(N, H)
    tgt_flat = y[1:].reshape(N).astype(jnp.int32)
    if N_pad != N:
        h2_flat = jnp.pad(h2_flat, ((0, N_pad - N), (0, 0)))
        tgt_flat = jnp.pad(tgt_flat, (0, N_pad - N))  # pad with ignore_index=0
    tgt_flat = tgt_flat[:, None]

    num_v_tiles = pl.cdiv(V, v_tile)
    V_pad = num_v_tiles * v_tile
    w_o2p = jnp.pad(params['w_o2p'], ((0, 0), (0, V_pad - V)))
    b_o2p = jnp.pad(params['b_o2p'], ((0, 0), (0, V_pad - V)),
                    constant_values=-1e9)             # padded vocab cols -> exp()==0

    def const_spec2(arr):
        nd = arr.ndim
        return pl.BlockSpec(arr.shape, lambda i, j, _nd=nd: (0,) * _nd)

    nll_part = pl.pallas_call(
        functools.partial(_head_kernel, v_tile=v_tile),
        out_shape=jax.ShapeDtypeStruct((num_row_tiles, 1), jnp.float32),
        grid_spec=pltpu.PrefetchScalarGridSpec(
            num_scalar_prefetch=0,
            grid=(num_row_tiles, num_v_tiles),
            in_specs=[pl.BlockSpec((row_tile, H), lambda i, j: (i, 0)),
                      pl.BlockSpec((row_tile, 1), lambda i, j: (i, 0)),
                      const_spec2(params['w_h2o']),
                      const_spec2(params['b_h2o']),
                      pl.BlockSpec((E, v_tile), lambda i, j: (0, j)),
                      pl.BlockSpec((1, v_tile), lambda i, j: (0, j))],
            out_specs=pl.BlockSpec((1, 1), lambda i, j: (i, 0)),
            scratch_shapes=[pltpu.VMEM((row_tile, E), jnp.float32),
                            pltpu.VMEM((row_tile, 1), jnp.float32),
                            pltpu.VMEM((row_tile, 1), jnp.float32),
                            pltpu.VMEM((row_tile, 1), jnp.float32)]),
        compiler_params=pltpu.CompilerParams(
            dimension_semantics=("parallel", "arbitrary")),
    )(h2_flat, tgt_flat, params['w_h2o'], params['b_h2o'], w_o2p, b_o2p)

    return jnp.sum(nll_part)


# ---------------------------------------------------------------------------
# Parameters + pure-JAX reference (mirrors the PyTorch module exactly).
# ---------------------------------------------------------------------------
def init_params(key, V, E, H, C, MID):
    ks = jax.random.split(key, 16)

    def rnd(k, shape, scale=0.1):
        return jax.random.normal(k, shape, jnp.float32) * scale

    emb = rnd(ks[0], (V, E)).at[0].set(0.0)               # padding_idx=0
    return dict(
        emb=emb,
        # dec0 = GRUCell(E, H), dec1 = GRUCell(H, H); gates [r, z, n], (in, 3H)
        w_ih0=rnd(ks[1], (E, 3 * H)), b_ih0=rnd(ks[2], (1, 3 * H)),
        w_hh0=rnd(ks[3], (H, 3 * H)), b_hh0=rnd(ks[4], (1, 3 * H)),
        w_ih1=rnd(ks[5], (H, 3 * H)), b_ih1=rnd(ks[6], (1, 3 * H)),
        w_hh1=rnd(ks[7], (H, 3 * H)), b_hh1=rnd(ks[8], (1, 3 * H)),
        # MLPAttention (no biases: mlp_bias=False)
        w_c2c=rnd(ks[9], (C, MID)),    # ctx2ctx
        w_h2c=rnd(ks[10], (H, MID)),   # hid2ctx
        w_mlp=rnd(ks[11], (1, MID)),   # mlp -> scalar score
        w_c2h=rnd(ks[12], (C, H)),     # ctx2hid
        # hid2out (bias_zero=True, tanh) and out2prob (linear)
        w_h2o=rnd(ks[13], (H, E)), b_h2o=jnp.zeros((1, E), jnp.float32),
        w_o2p=rnd(ks[14], (E, V)), b_o2p=rnd(ks[15], (1, V)),
    )


def reference_loss(params, ctx, y):
    """Pure-JAX reference reproducing the PyTorch forward semantics."""
    T, B = y.shape
    H = params['w_hh0'].shape[0]
    emb_w = params['emb']

    def gru(x, h, wi, bi, wh, bh):
        gx = x @ wi + bi
        gh = h @ wh + bh
        r = jax.nn.sigmoid(gx[:, :H] + gh[:, :H])
        z = jax.nn.sigmoid(gx[:, H:2 * H] + gh[:, H:2 * H])
        n = jnp.tanh(gx[:, 2 * H:] + r * gh[:, 2 * H:])
        return (1 - z) * n + z * h

    h = jnp.zeros((B, H), jnp.float32)
    loss = 0.0
    for t in range(T - 1):
        y_in = emb_w[y[t]]
        h1 = gru(y_in, h, params['w_ih0'], params['b_ih0'],
                 params['w_hh0'], params['b_hh0'])
        ctx_p = jnp.einsum('sbc,cm->sbm', ctx, params['w_c2c'])
        hid_p = h1 @ params['w_h2c']
        inner = jnp.tanh(ctx_p + hid_p[None])
        scores = jnp.sum(inner * params['w_mlp'][0][None, None, :], axis=-1)  # (S,B)
        alpha = jax.nn.softmax(scores, axis=0)
        z_c = jnp.sum(alpha[..., None] * ctx, axis=0)
        z_t = z_c @ params['w_c2h']
        h2 = gru(z_t, h1, params['w_ih1'], params['b_ih1'],
                 params['w_hh1'], params['b_hh1'])
        logit = jnp.tanh(h2 @ params['w_h2o'] + params['b_h2o'])
        log_p = jax.nn.log_softmax(logit @ params['w_o2p'] + params['b_o2p'], axis=-1)
        tgt = y[t + 1]
        ll = jnp.take_along_axis(log_p, tgt[:, None], axis=1)[:, 0]
        loss = loss - jnp.sum(jnp.where(tgt != 0, ll, 0.0))
        h = h2
    return loss


if __name__ == "__main__":
    key = jax.random.PRNGKey(0)
    # Small synthetic shapes (B=8 fills sublanes): vocab=50, emb=32, hidden=32,
    # ctx_dim=32, S=8, B=8, T=8.
    V, E, H, C, S, B, T = 50, 32, 32, 32, 8, 8, 8
    MID = C  # att_bottleneck='ctx'

    kp, kc, ky = jax.random.split(key, 3)
    params = init_params(kp, V, E, H, C, MID)
    ctx = jax.random.normal(kc, (S, B, C), jnp.float32)    # ctx_mask = None
    y = jax.random.randint(ky, (T, B), 1, V, dtype=jnp.int32)
    y = y.at[3, 1].set(0)                                  # exercise ignore_index=0
    y = y.at[6, 5].set(0)

    loss = conditional_decoder_loss(params, ctx, y)
    loss = jax.block_until_ready(loss)

    ref = reference_loss(params, ctx, y)
    assert jnp.allclose(loss, ref, rtol=2e-3, atol=1e-3), (float(loss), float(ref))
    print("KERNEL_OK")
</pallas_src>

<mosaic_0001>
module attributes {stable_mosaic.version = 11 : i64} {
  func.func @_recurrent_kernel(%arg0: i32, %arg1: memref<4x8x96xf32, #tpu.memory_space<vmem>>, %arg2: memref<8x8x32xf32, #tpu.memory_space<vmem>>, %arg3: memref<8x8x32xf32, #tpu.memory_space<vmem>>, %arg4: memref<32x96xf32, #tpu.memory_space<vmem>>, %arg5: memref<1x96xf32, #tpu.memory_space<vmem>>, %arg6: memref<32x128xf32, #tpu.memory_space<vmem>>, %arg7: memref<1x96xf32, #tpu.memory_space<vmem>>, %arg8: memref<32x96xf32, #tpu.memory_space<vmem>>, %arg9: memref<1x96xf32, #tpu.memory_space<vmem>>, %arg10: memref<1x32xf32, #tpu.memory_space<vmem>>, %arg11: memref<4x8x32xf32, #tpu.memory_space<vmem>>, %arg12: memref<8x32xf32, #tpu.memory_space<vmem>>) attributes {dimension_semantics = [#tpu.dimension_semantics<arbitrary>], iteration_bounds = array<i64: 2>, scalar_prefetch = 0 : i64, scratch_operands = 1 : i64, tpu.core_type = #tpu.core_type<tc>, window_params = [{transform_indices = @transform_0, window_bounds = array<i64: 4, 8, 96>}, {pipeline_mode = #tpu.pipeline_mode<synchronous>, transform_indices = @transform_1, window_bounds = array<i64: 8, 8, 32>}, {pipeline_mode = #tpu.pipeline_mode<synchronous>, transform_indices = @transform_2, window_bounds = array<i64: 8, 8, 32>}, {pipeline_mode = #tpu.pipeline_mode<synchronous>, transform_indices = @transform_3, window_bounds = array<i64: 32, 96>}, {pipeline_mode = #tpu.pipeline_mode<synchronous>, transform_indices = @transform_4, window_bounds = array<i64: 1, 96>}, {pipeline_mode = #tpu.pipeline_mode<synchronous>, transform_indices = @transform_5, window_bounds = array<i64: 32, 128>}, {pipeline_mode = #tpu.pipeline_mode<synchronous>, transform_indices = @transform_6, window_bounds = array<i64: 1, 96>}, {pipeline_mode = #tpu.pipeline_mode<synchronous>, transform_indices = @transform_7, window_bounds = array<i64: 32, 96>}, {pipeline_mode = #tpu.pipeline_mode<synchronous>, transform_indices = @transform_8, window_bounds = array<i64: 1, 96>}, {pipeline_mode = #tpu.pipeline_mode<synchronous>, transform_indices = @transform_9, window_bounds = array<i64: 1, 32>}, {transform_indices = @transform_10, window_bounds = array<i64: 4, 8, 32>}]} {
    %c0_i32 = arith.constant 0 : i32
    %0 = arith.cmpi eq, %arg0, %c0_i32 : i32
    %1 = arith.extui %0 : i1 to i32
    %c0_i32_0 = arith.constant 0 : i32
    %2 = arith.cmpi ne, %1, %c0_i32_0 : i32
    scf.if %2 {
      %cst_92 = arith.constant 0.000000e+00 : f32
      %379 = vector.broadcast %cst_92 : f32 to vector<8x32xf32>
      %c0_93 = arith.constant 0 : index
      %c0_94 = arith.constant 0 : index
      %380 = vector.load %arg12[%c0_93, %c0_94] : memref<8x32xf32, #tpu.memory_space<vmem>>, vector<8x32xf32>
      tpu.vector_store %arg12[%c0_93, %c0_94], %379 {strides = array<i32>} : memref<8x32xf32, #tpu.memory_space<vmem>>, vector<8x32xf32>,
    } else {
    }
    %c0 = arith.constant 0 : index
    %c0_1 = arith.constant 0 : index
    %3 = vector.load %arg4[%c0, %c0_1] : memref<32x96xf32, #tpu.memory_space<vmem>>, vector<32x96xf32>
    %c0_2 = arith.constant 0 : index
    %c0_3 = arith.constant 0 : index
    %4 = vector.load %arg5[%c0_2, %c0_3] : memref<1x96xf32, #tpu.memory_space<vmem>>, vector<1x96xf32>
    %c0_4 = arith.constant 0 : index
    %c0_5 = arith.constant 0 : index
    %5 = vector.load %arg6[%c0_4, %c0_5] : memref<32x128xf32, #tpu.memory_space<vmem>>, vector<32x128xf32>
    %c0_6 = arith.constant 0 : index
    %c0_7 = arith.constant 0 : index
    %6 = vector.load %arg7[%c0_6, %c0_7] : memref<1x96xf32, #tpu.memory_space<vmem>>, vector<1x96xf32>
    %c0_8 = arith.constant 0 : index
    %c0_9 = arith.constant 0 : index
    %7 = vector.load %arg8[%c0_8, %c0_9] : memref<32x96xf32, #tpu.memory_space<vmem>>, vector<32x96xf32>
    %c0_10 = arith.constant 0 : index
    %c0_11 = arith.constant 0 : index
    %8 = vector.load %arg9[%c0_10, %c0_11] : memref<1x96xf32, #tpu.memory_space<vmem>>, vector<1x96xf32>
    %c0_12 = arith.constant 0 : index
    %c0_13 = arith.constant 0 : index
    %9 = vector.load %arg10[%c0_12, %c0_13] : memref<1x32xf32, #tpu.memory_space<vmem>>, vector<1x32xf32>
    %10 = vector.shape_cast %9 : vector<1x32xf32> to vector<1x1x32xf32>
    %c0_14 = arith.constant 0 : index
    %c0_15 = arith.constant 0 : index
    %c0_16 = arith.constant 0 : index
    %11 = vector.load %arg2[%c0_14, %c0_15, %c0_16] : memref<8x8x32xf32, #tpu.memory_space<vmem>>, vector<8x8x32xf32>
    %c0_17 = arith.constant 0 : index
    %c0_18 = arith.constant 0 : index
    %c0_19 = arith.constant 0 : index
    %12 = vector.load %arg3[%c0_17, %c0_18, %c0_19] : memref<8x8x32xf32, #tpu.memory_space<vmem>>, vector<8x8x32xf32>
    %c0_20 = arith.constant 0 : index
    %c0_21 = arith.constant 0 : index
    %13 = vector.load %arg12[%c0_20, %c0_21] : memref<8x32xf32, #tpu.memory_space<vmem>>, vector<8x32xf32>
    %c0_i32_22 = arith.constant 0 : i32
    %14 = arith.index_cast %c0_i32_22 : i32 to index
    %c0_23 = arith.constant 0 : index
    %c0_24 = arith.constant 0 : index
    %15 = vector.load %arg1[%14, %c0_23, %c0_24] : memref<4x8x96xf32, #tpu.memory_space<vmem>>, vector<1x8x96xf32>
    %16 = vector.shape_cast %15 : vector<1x8x96xf32> to vector<8x96xf32>
    %cst = arith.constant dense<0.000000e+00> : vector<8x96xf32>
    %17 = tpu.matmul %13, %3, %cst {dimension_numbers = #tpu.dot_dimension_numbers<[1], [0], [0], [1], [0, 0, 1, 1], [], []>} : vector<8x32xf32>, vector<32x96xf32>, vector<8x96xf32> -> vector<8x96xf32>
    %18 = vector.broadcast %4 : vector<1x96xf32> to vector<8x96xf32>
    %19 = arith.addf %17, %18 : vector<8x96xf32>
    %20 = vector.extract_strided_slice %16 {offsets = [0, 0], sizes = [8, 32], strides = [1, 1]} : vector<8x96xf32> to vector<8x32xf32>
    %21 = vector.extract_strided_slice %19 {offsets = [0, 0], sizes = [8, 32], strides = [1, 1]} : vector<8x96xf32> to vector<8x32xf32>
    %22 = arith.addf %20, %21 : vector<8x32xf32>
    %23 = arith.negf %22 : vector<8x32xf32>
    %24 = math.exp %23 : vector<8x32xf32>
    %cst_25 = arith.constant 1.000000e+00 : f32
    %25 = vector.broadcast %cst_25 : f32 to vector<8x32xf32>
    %26 = arith.addf %25, %24 : vector<8x32xf32>
    %27 = arith.divf %25, %26 : vector<8x32xf32>
    %28 = vector.extract_strided_slice %16 {offsets = [0, 32], sizes = [8, 32], strides = [1, 1]} : vector<8x96xf32> to vector<8x32xf32>
    %29 = vector.extract_strided_slice %19 {offsets = [0, 32], sizes = [8, 32], strides = [1, 1]} : vector<8x96xf32> to vector<8x32xf32>
    %30 = arith.addf %28, %29 : vector<8x32xf32>
    %31 = arith.negf %30 : vector<8x32xf32>
    %32 = math.exp %31 : vector<8x32xf32>
    %cst_26 = arith.constant 1.000000e+00 : f32
    %33 = vector.broadcast %cst_26 : f32 to vector<8x32xf32>
    %34 = arith.addf %33, %32 : vector<8x32xf32>
    %35 = arith.divf %33, %34 : vector<8x32xf32>
    %36 = vector.extract_strided_slice %16 {offsets = [0, 64], sizes = [8, 32], strides = [1, 1]} : vector<8x96xf32> to vector<8x32xf32>
    %37 = vector.extract_strided_slice %19 {offsets = [0, 64], sizes = [8, 32], strides = [1, 1]} : vector<8x96xf32> to vector<8x32xf32>
    %38 = arith.mulf %27, %37 : vector<8x32xf32>
    %39 = arith.addf %36, %38 : vector<8x32xf32>
    %40 = math.tanh %39 : vector<8x32xf32>
    %cst_27 = arith.constant 1.000000e+00 : f32
    %41 = vector.broadcast %cst_27 : f32 to vector<8x32xf32>
    %42 = arith.subf %41, %35 : vector<8x32xf32>
    %43 = arith.mulf %42, %40 : vector<8x32xf32>
    %44 = arith.mulf %35, %13 : vector<8x32xf32>
    %45 = arith.addf %43, %44 : vector<8x32xf32>
    %cst_28 = arith.constant dense<0.000000e+00> : vector<8x128xf32>
    %46 = tpu.matmul %45, %5, %cst_28 {dimension_numbers = #tpu.dot_dimension_numbers<[1], [0], [0], [1], [0, 0, 1, 1], [], []>} : vector<8x32xf32>, vector<32x128xf32>, vector<8x128xf32> -> vector<8x128xf32>
    %47 = vector.extract_strided_slice %46 {offsets = [0, 0], sizes = [8, 32], strides = [1, 1]} : vector<8x128xf32> to vector<8x32xf32>
    %48 = vector.extract_strided_slice %46 {offsets = [0, 32], sizes = [8, 96], strides = [1, 1]} : vector<8x128xf32> to vector<8x96xf32>
    %49 = vector.broadcast %6 : vector<1x96xf32> to vector<8x96xf32>
    %50 = arith.addf %48, %49 : vector<8x96xf32>
    %51 = vector.shape_cast %47 : vector<8x32xf32> to vector<8x1x32xf32>
    %52 = vector.broadcast %51 : vector<8x1x32xf32> to vector<8x8x32xf32>
    %53 = arith.addf %12, %52 : vector<8x8x32xf32>
    %54 = math.tanh %53 : vector<8x8x32xf32>
    %55 = vector.broadcast %10 : vector<1x1x32xf32> to vector<8x8x32xf32>
    %56 = arith.mulf %54, %55 : vector<8x8x32xf32>
    %cst_29 = arith.constant dense<0.000000e+00> : vector<8x8xf32>
    %57 = vector.multi_reduction <add>, %56, %cst_29 [2] : vector<8x8x32xf32> to vector<8x8xf32>
    %cst_30 = arith.constant dense<0xFF800000> : vector<8xf32>
    %58 = vector.multi_reduction <maximumf>, %57, %cst_30 [1] : vector<8x8xf32> to vector<8xf32>
    %59 = vector.shape_cast %58 : vector<8xf32> to vector<8x1xf32>
    %60 = vector.broadcast %59 : vector<8x1xf32> to vector<8x8xf32>
    %61 = arith.subf %57, %60 : vector<8x8xf32>
    %62 = math.exp %61 : vector<8x8xf32>
    %cst_31 = arith.constant dense<0.000000e+00> : vector<8xf32>
    %63 = vector.multi_reduction <add>, %62, %cst_31 [1] : vector<8x8xf32> to vector<8xf32>
    %64 = vector.shape_cast %63 : vector<8xf32> to vector<8x1xf32>
    %65 = tpu.reciprocal %64 {approx = true} : vector<8x1xf32> -> vector<8x1xf32>
    %66 = vector.broadcast %65 : vector<8x1xf32> to vector<8x8xf32>
    %67 = arith.mulf %62, %66 : vector<8x8xf32>
    %68 = vector.shape_cast %67 : vector<8x8xf32> to vector<8x8x1xf32>
    %69 = vector.broadcast %68 : vector<8x8x1xf32> to vector<8x8x32xf32>
    %70 = arith.mulf %69, %11 : vector<8x8x32xf32>
    %cst_32 = arith.constant dense<0.000000e+00> : vector<8x32xf32>
    %71 = vector.multi_reduction <add>, %70, %cst_32 [1] : vector<8x8x32xf32> to vector<8x32xf32>
    %cst_33 = arith.constant dense<0.000000e+00> : vector<8x96xf32>
    %72 = tpu.matmul %71, %7, %cst_33 {dimension_numbers = #tpu.dot_dimension_numbers<[1], [0], [0], [1], [0, 0, 1, 1], [], []>} : vector<8x32xf32>, vector<32x96xf32>, vector<8x96xf32> -> vector<8x96xf32>
    %73 = vector.broadcast %8 : vector<1x96xf32> to vector<8x96xf32>
    %74 = arith.addf %72, %73 : vector<8x96xf32>
    %75 = vector.extract_strided_slice %74 {offsets = [0, 0], sizes = [8, 32], strides = [1, 1]} : vector<8x96xf32> to vector<8x32xf32>
    %76 = vector.extract_strided_slice %50 {offsets = [0, 0], sizes = [8, 32], strides = [1, 1]} : vector<8x96xf32> to vector<8x32xf32>
    %77 = arith.addf %75, %76 : vector<8x32xf32>
    %78 = arith.negf %77 : vector<8x32xf32>
    %79 = math.exp %78 : vector<8x32xf32>
    %cst_34 = arith.constant 1.000000e+00 : f32
    %80 = vector.broadcast %cst_34 : f32 to vector<8x32xf32>
    %81 = arith.addf %80, %79 : vector<8x32xf32>
    %82 = arith.divf %80, %81 : vector<8x32xf32>
    %83 = vector.extract_strided_slice %74 {offsets = [0, 32], sizes = [8, 32], strides = [1, 1]} : vector<8x96xf32> to vector<8x32xf32>
    %84 = vector.extract_strided_slice %50 {offsets = [0, 32], sizes = [8, 32], strides = [1, 1]} : vector<8x96xf32> to vector<8x32xf32>
    %85 = arith.addf %83, %84 : vector<8x32xf32>
    %86 = arith.negf %85 : vector<8x32xf32>
    %87 = math.exp %86 : vector<8x32xf32>
    %cst_35 = arith.constant 1.000000e+00 : f32
    %88 = vector.broadcast %cst_35 : f32 to vector<8x32xf32>
    %89 = arith.addf %88, %87 : vector<8x32xf32>
    %90 = arith.divf %88, %89 : vector<8x32xf32>
    %91 = vector.extract_strided_slice %74 {offsets = [0, 64], sizes = [8, 32], strides = [1, 1]} : vector<8x96xf32> to vector<8x32xf32>
    %92 = vector.extract_strided_slice %50 {offsets = [0, 64], sizes = [8, 32], strides = [1, 1]} : vector<8x96xf32> to vector<8x32xf32>
    %93 = arith.mulf %82, %92 : vector<8x32xf32>
    %94 = arith.addf %91, %93 : vector<8x32xf32>
    %95 = math.tanh %94 : vector<8x32xf32>
    %cst_36 = arith.constant 1.000000e+00 : f32
    %96 = vector.broadcast %cst_36 : f32 to vector<8x32xf32>
    %97 = arith.subf %96, %90 : vector<8x32xf32>
    %98 = arith.mulf %97, %95 : vector<8x32xf32>
    %99 = arith.mulf %90, %45 : vector<8x32xf32>
    %100 = arith.addf %98, %99 : vector<8x32xf32>
    %101 = arith.index_cast %c0_i32_22 : i32 to index
    %c0_37 = arith.constant 0 : index
    %c0_38 = arith.constant 0 : index
    %102 = vector.load %arg11[%101, %c0_37, %c0_38] : memref<4x8x32xf32, #tpu.memory_space<vmem>>, vector<1x8x32xf32>
    %103 = vector.shape_cast %102 : vector<1x8x32xf32> to vector<8x32xf32>
    %104 = vector.shape_cast %100 : vector<8x32xf32> to vector<1x8x32xf32>
    tpu.vector_store %arg11[%101, %c0_37, %c0_38], %104 {strides = array<i32>} : memref<4x8x32xf32, #tpu.memory_space<vmem>>, vector<1x8x32xf32>,
    %c1_i32 = arith.constant 1 : i32
    %105 = arith.index_cast %c1_i32 : i32 to index
    %c0_39 = arith.constant 0 : index
    %c0_40 = arith.constant 0 : index
    %106 = vector.load %arg1[%105, %c0_39, %c0_40] : memref<4x8x96xf32, #tpu.memory_space<vmem>>, vector<1x8x96xf32>
    %107 = vector.shape_cast %106 : vector<1x8x96xf32> to vector<8x96xf32>
    %cst_41 = arith.constant dense<0.000000e+00> : vector<8x96xf32>
    %108 = tpu.matmul %100, %3, %cst_41 {dimension_numbers = #tpu.dot_dimension_numbers<[1], [0], [0], [1], [0, 0, 1, 1], [], []>} : vector<8x32xf32>, vector<32x96xf32>, vector<8x96xf32> -> vector<8x96xf32>
    %109 = vector.broadcast %4 : vector<1x96xf32> to vector<8x96xf32>
    %110 = arith.addf %108, %109 : vector<8x96xf32>
    %111 = vector.extract_strided_slice %107 {offsets = [0, 0], sizes = [8, 32], strides = [1, 1]} : vector<8x96xf32> to vector<8x32xf32>
    %112 = vector.extract_strided_slice %110 {offsets = [0, 0], sizes = [8, 32], strides = [1, 1]} : vector<8x96xf32> to vector<8x32xf32>
    %113 = arith.addf %111, %112 : vector<8x32xf32>
    %114 = arith.negf %113 : vector<8x32xf32>
    %115 = math.exp %114 : vector<8x32xf32>
    %cst_42 = arith.constant 1.000000e+00 : f32
    %116 = vector.broadcast %cst_42 : f32 to vector<8x32xf32>
    %117 = arith.addf %116, %115 : vector<8x32xf32>
    %118 = arith.divf %116, %117 : vector<8x32xf32>
    %119 = vector.extract_strided_slice %107 {offsets = [0, 32], sizes = [8, 32], strides = [1, 1]} : vector<8x96xf32> to vector<8x32xf32>
    %120 = vector.extract_strided_slice %110 {offsets = [0, 32], sizes = [8, 32], strides = [1, 1]} : vector<8x96xf32> to vector<8x32xf32>
    %121 = arith.addf %119, %120 : vector<8x32xf32>
    %122 = arith.negf %121 : vector<8x32xf32>
    %123 = math.exp %122 : vector<8x32xf32>
    %cst_43 = arith.constant 1.000000e+00 : f32
    %124 = vector.broadcast %cst_43 : f32 to vector<8x32xf32>
    %125 = arith.addf %124, %123 : vector<8x32xf32>
    %126 = arith.divf %124, %125 : vector<8x32xf32>
    %127 = vector.extract_strided_slice %107 {offsets = [0, 64], sizes = [8, 32], strides = [1, 1]} : vector<8x96xf32> to vector<8x32xf32>
    %128 = vector.extract_strided_slice %110 {offsets = [0, 64], sizes = [8, 32], strides = [1, 1]} : vector<8x96xf32> to vector<8x32xf32>
    %129 = arith.mulf %118, %128 : vector<8x32xf32>
    %130 = arith.addf %127, %129 : vector<8x32xf32>
    %131 = math.tanh %130 : vector<8x32xf32>
    %cst_44 = arith.constant 1.000000e+00 : f32
    %132 = vector.broadcast %cst_44 : f32 to vector<8x32xf32>
    %133 = arith.subf %132, %126 : vector<8x32xf32>
    %134 = arith.mulf %133, %131 : vector<8x32xf32>
    %135 = arith.mulf %126, %100 : vector<8x32xf32>
    %136 = arith.addf %134, %135 : vector<8x32xf32>
    %cst_45 = arith.constant dense<0.000000e+00> : vector<8x128xf32>
    %137 = tpu.matmul %136, %5, %cst_45 {dimension_numbers = #tpu.dot_dimension_numbers<[1], [0], [0], [1], [0, 0, 1, 1], [], []>} : vector<8x32xf32>, vector<32x128xf32>, vector<8x128xf32> -> vector<8x128xf32>
    %138 = vector.extract_strided_slice %137 {offsets = [0, 0], sizes = [8, 32], strides = [1, 1]} : vector<8x128xf32> to vector<8x32xf32>
    %139 = vector.extract_strided_slice %137 {offsets = [0, 32], sizes = [8, 96], strides = [1, 1]} : vector<8x128xf32> to vector<8x96xf32>
    %140 = vector.broadcast %6 : vector<1x96xf32> to vector<8x96xf32>
    %141 = arith.addf %139, %140 : vector<8x96xf32>
    %142 = vector.shape_cast %138 : vector<8x32xf32> to vector<8x1x32xf32>
    %143 = vector.broadcast %142 : vector<8x1x32xf32> to vector<8x8x32xf32>
    %144 = arith.addf %12, %143 : vector<8x8x32xf32>
    %145 = math.tanh %144 : vector<8x8x32xf32>
    %146 = vector.broadcast %10 : vector<1x1x32xf32> to vector<8x8x32xf32>
    %147 = arith.mulf %145, %146 : vector<8x8x32xf32>
    %cst_46 = arith.constant dense<0.000000e+00> : vector<8x8xf32>
    %148 = vector.multi_reduction <add>, %147, %cst_46 [2] : vector<8x8x32xf32> to vector<8x8xf32>
    %cst_47 = arith.constant dense<0xFF800000> : vector<8xf32>
    %149 = vector.multi_reduction <maximumf>, %148, %cst_47 [1] : vector<8x8xf32> to vector<8xf32>
    %150 = vector.shape_cast %149 : vector<8xf32> to vector<8x1xf32>
    %151 = vector.broadcast %150 : vector<8x1xf32> to vector<8x8xf32>
    %152 = arith.subf %148, %151 : vector<8x8xf32>
    %153 = math.exp %152 : vector<8x8xf32>
    %cst_48 = arith.constant dense<0.000000e+00> : vector<8xf32>
    %154 = vector.multi_reduction <add>, %153, %cst_48 [1] : vector<8x8xf32> to vector<8xf32>
    %155 = vector.shape_cast %154 : vector<8xf32> to vector<8x1xf32>
    %156 = tpu.reciprocal %155 {approx = true} : vector<8x1xf32> -> vector<8x1xf32>
    %157 = vector.broadcast %156 : vector<8x1xf32> to vector<8x8xf32>
    %158 = arith.mulf %153, %157 : vector<8x8xf32>
    %159 = vector.shape_cast %158 : vector<8x8xf32> to vector<8x8x1xf32>
    %160 = vector.broadcast %159 : vector<8x8x1xf32> to vector<8x8x32xf32>
    %161 = arith.mulf %160, %11 : vector<8x8x32xf32>
    %cst_49 = arith.constant dense<0.000000e+00> : vector<8x32xf32>
    %162 = vector.multi_reduction <add>, %161, %cst_49 [1] : vector<8x8x32xf32> to vector<8x32xf32>
    %cst_50 = arith.constant dense<0.000000e+00> : vector<8x96xf32>
    %163 = tpu.matmul %162, %7, %cst_50 {dimension_numbers = #tpu.dot_dimension_numbers<[1], [0], [0], [1], [0, 0, 1, 1], [], []>} : vector<8x32xf32>, vector<32x96xf32>, vector<8x96xf32> -> vector<8x96xf32>
    %164 = vector.broadcast %8 : vector<1x96xf32> to vector<8x96xf32>
    %165 = arith.addf %163, %164 : vector<8x96xf32>
    %166 = vector.extract_strided_slice %165 {offsets = [0, 0], sizes = [8, 32], strides = [1, 1]} : vector<8x96xf32> to vector<8x32xf32>
    %167 = vector.extract_strided_slice %141 {offsets = [0, 0], sizes = [8, 32], strides = [1, 1]} : vector<8x96xf32> to vector<8x32xf32>
    %168 = arith.addf %166, %167 : vector<8x32xf32>
    %169 = arith.negf %168 : vector<8x32xf32>
    %170 = math.exp %169 : vector<8x32xf32>
    %cst_51 = arith.constant 1.000000e+00 : f32
    %171 = vector.broadcast %cst_51 : f32 to vector<8x32xf32>
    %172 = arith.addf %171, %170 : vector<8x32xf32>
    %173 = arith.divf %171, %172 : vector<8x32xf32>
    %174 = vector.extract_strided_slice %165 {offsets = [0, 32], sizes = [8, 32], strides = [1, 1]} : vector<8x96xf32> to vector<8x32xf32>
    %175 = vector.extract_strided_slice %141 {offsets = [0, 32], sizes = [8, 32], strides = [1, 1]} : vector<8x96xf32> to vector<8x32xf32>
    %176 = arith.addf %174, %175 : vector<8x32xf32>
    %177 = arith.negf %176 : vector<8x32xf32>
    %178 = math.exp %177 : vector<8x32xf32>
    %cst_52 = arith.constant 1.000000e+00 : f32
    %179 = vector.broadcast %cst_52 : f32 to vector<8x32xf32>
    %180 = arith.addf %179, %178 : vector<8x32xf32>
    %181 = arith.divf %179, %180 : vector<8x32xf32>
    %182 = vector.extract_strided_slice %165 {offsets = [0, 64], sizes = [8, 32], strides = [1, 1]} : vector<8x96xf32> to vector<8x32xf32>
    %183 = vector.extract_strided_slice %141 {offsets = [0, 64], sizes = [8, 32], strides = [1, 1]} : vector<8x96xf32> to vector<8x32xf32>
    %184 = arith.mulf %173, %183 : vector<8x32xf32>
    %185 = arith.addf %182, %184 : vector<8x32xf32>
    %186 = math.tanh %185 : vector<8x32xf32>
    %cst_53 = arith.constant 1.000000e+00 : f32
    %187 = vector.broadcast %cst_53 : f32 to vector<8x32xf32>
    %188 = arith.subf %187, %181 : vector<8x32xf32>
    %189 = arith.mulf %188, %186 : vector<8x32xf32>
    %190 = arith.mulf %181, %136 : vector<8x32xf32>
    %191 = arith.addf %189, %190 : vector<8x32xf32>
    %192 = arith.index_cast %c1_i32 : i32 to index
    %c0_54 = arith.constant 0 : index
    %c0_55 = arith.constant 0 : index
    %193 = vector.load %arg11[%192, %c0_54, %c0_55] : memref<4x8x32xf32, #tpu.memory_space<vmem>>, vector<1x8x32xf32>
    %194 = vector.shape_cast %193 : vector<1x8x32xf32> to vector<8x32xf32>
    %195 = vector.shape_cast %191 : vector<8x32xf32> to vector<1x8x32xf32>
    tpu.vector_store %arg11[%192, %c0_54, %c0_55], %195 {strides = array<i32>} : memref<4x8x32xf32, #tpu.memory_space<vmem>>, vector<1x8x32xf32>,
    %c2_i32 = arith.constant 2 : i32
    %196 = arith.index_cast %c2_i32 : i32 to index
    %c0_56 = arith.constant 0 : index
    %c0_57 = arith.constant 0 : index
    %197 = vector.load %arg1[%196, %c0_56, %c0_57] : memref<4x8x96xf32, #tpu.memory_space<vmem>>, vector<1x8x96xf32>
    %198 = vector.shape_cast %197 : vector<1x8x96xf32> to vector<8x96xf32>
    %cst_58 = arith.constant dense<0.000000e+00> : vector<8x96xf32>
    %199 = tpu.matmul %191, %3, %cst_58 {dimension_numbers = #tpu.dot_dimension_numbers<[1], [0], [0], [1], [0, 0, 1, 1], [], []>} : vector<8x32xf32>, vector<32x96xf32>, vector<8x96xf32> -> vector<8x96xf32>
    %200 = vector.broadcast %4 : vector<1x96xf32> to vector<8x96xf32>
    %201 = arith.addf %199, %200 : vector<8x96xf32>
    %202 = vector.extract_strided_slice %198 {offsets = [0, 0], sizes = [8, 32], strides = [1, 1]} : vector<8x96xf32> to vector<8x32xf32>
    %203 = vector.extract_strided_slice %201 {offsets = [0, 0], sizes = [8, 32], strides = [1, 1]} : vector<8x96xf32> to vector<8x32xf32>
    %204 = arith.addf %202, %203 : vector<8x32xf32>
    %205 = arith.negf %204 : vector<8x32xf32>
    %206 = math.exp %205 : vector<8x32xf32>
    %cst_59 = arith.constant 1.000000e+00 : f32
    %207 = vector.broadcast %cst_59 : f32 to vector<8x32xf32>
    %208 = arith.addf %207, %206 : vector<8x32xf32>
    %209 = arith.divf %207, %208 : vector<8x32xf32>
    %210 = vector.extract_strided_slice %198 {offsets = [0, 32], sizes = [8, 32], strides = [1, 1]} : vector<8x96xf32> to vector<8x32xf32>
    %211 = vector.extract_strided_slice %201 {offsets = [0, 32], sizes = [8, 32], strides = [1, 1]} : vector<8x96xf32> to vector<8x32xf32>
    %212 = arith.addf %210, %211 : vector<8x32xf32>
    %213 = arith.negf %212 : vector<8x32xf32>
    %214 = math.exp %213 : vector<8x32xf32>
    %cst_60 = arith.constant 1.000000e+00 : f32
    %215 = vector.broadcast %cst_60 : f32 to vector<8x32xf32>
    %216 = arith.addf %215, %214 : vector<8x32xf32>
    %217 = arith.divf %215, %216 : vector<8x32xf32>
    %218 = vector.extract_strided_slice %198 {offsets = [0, 64], sizes = [8, 32], strides = [1, 1]} : vector<8x96xf32> to vector<8x32xf32>
    %219 = vector.extract_strided_slice %201 {offsets = [0, 64], sizes = [8, 32], strides = [1, 1]} : vector<8x96xf32> to vector<8x32xf32>
    %220 = arith.mulf %209, %219 : vector<8x32xf32>
    %221 = arith.addf %218, %220 : vector<8x32xf32>
    %222 = math.tanh %221 : vector<8x32xf32>
    %cst_61 = arith.constant 1.000000e+00 : f32
    %223 = vector.broadcast %cst_61 : f32 to vector<8x32xf32>
    %224 = arith.subf %223, %217 : vector<8x32xf32>
    %225 = arith.mulf %224, %222 : vector<8x32xf32>
    %226 = arith.mulf %217, %191 : vector<8x32xf32>
    %227 = arith.addf %225, %226 : vector<8x32xf32>
    %cst_62 = arith.constant dense<0.000000e+00> : vector<8x128xf32>
    %228 = tpu.matmul %227, %5, %cst_62 {dimension_numbers = #tpu.dot_dimension_numbers<[1], [0], [0], [1], [0, 0, 1, 1], [], []>} : vector<8x32xf32>, vector<32x128xf32>, vector<8x128xf32> -> vector<8x128xf32>
    %229 = vector.extract_strided_slice %228 {offsets = [0, 0], sizes = [8, 32], strides = [1, 1]} : vector<8x128xf32> to vector<8x32xf32>
    %230 = vector.extract_strided_slice %228 {offsets = [0, 32], sizes = [8, 96], strides = [1, 1]} : vector<8x128xf32> to vector<8x96xf32>
    %231 = vector.broadcast %6 : vector<1x96xf32> to vector<8x96xf32>
    %232 = arith.addf %230, %231 : vector<8x96xf32>
    %233 = vector.shape_cast %229 : vector<8x32xf32> to vector<8x1x32xf32>
    %234 = vector.broadcast %233 : vector<8x1x32xf32> to vector<8x8x32xf32>
    %235 = arith.addf %12, %234 : vector<8x8x32xf32>
    %236 = math.tanh %235 : vector<8x8x32xf32>
    %237 = vector.broadcast %10 : vector<1x1x32xf32> to vector<8x8x32xf32>
    %238 = arith.mulf %236, %237 : vector<8x8x32xf32>
    %cst_63 = arith.constant dense<0.000000e+00> : vector<8x8xf32>
    %239 = vector.multi_reduction <add>, %238, %cst_63 [2] : vector<8x8x32xf32> to vector<8x8xf32>
    %cst_64 = arith.constant dense<0xFF800000> : vector<8xf32>
    %240 = vector.multi_reduction <maximumf>, %239, %cst_64 [1] : vector<8x8xf32> to vector<8xf32>
    %241 = vector.shape_cast %240 : vector<8xf32> to vector<8x1xf32>
    %242 = vector.broadcast %241 : vector<8x1xf32> to vector<8x8xf32>
    %243 = arith.subf %239, %242 : vector<8x8xf32>
    %244 = math.exp %243 : vector<8x8xf32>
    %cst_65 = arith.constant dense<0.000000e+00> : vector<8xf32>
    %245 = vector.multi_reduction <add>, %244, %cst_65 [1] : vector<8x8xf32> to vector<8xf32>
    %246 = vector.shape_cast %245 : vector<8xf32> to vector<8x1xf32>
    %247 = tpu.reciprocal %246 {approx = true} : vector<8x1xf32> -> vector<8x1xf32>
    %248 = vector.broadcast %247 : vector<8x1xf32> to vector<8x8xf32>
    %249 = arith.mulf %244, %248 : vector<8x8xf32>
    %250 = vector.shape_cast %249 : vector<8x8xf32> to vector<8x8x1xf32>
    %251 = vector.broadcast %250 : vector<8x8x1xf32> to vector<8x8x32xf32>
    %252 = arith.mulf %251, %11 : vector<8x8x32xf32>
    %cst_66 = arith.constant dense<0.000000e+00> : vector<8x32xf32>
    %253 = vector.multi_reduction <add>, %252, %cst_66 [1] : vector<8x8x32xf32> to vector<8x32xf32>
    %cst_67 = arith.constant dense<0.000000e+00> : vector<8x96xf32>
    %254 = tpu.matmul %253, %7, %cst_67 {dimension_numbers = #tpu.dot_dimension_numbers<[1], [0], [0], [1], [0, 0, 1, 1], [], []>} : vector<8x32xf32>, vector<32x96xf32>, vector<8x96xf32> -> vector<8x96xf32>
    %255 = vector.broadcast %8 : vector<1x96xf32> to vector<8x96xf32>
    %256 = arith.addf %254, %255 : vector<8x96xf32>
    %257 = vector.extract_strided_slice %256 {offsets = [0, 0], sizes = [8, 32], strides = [1, 1]} : vector<8x96xf32> to vector<8x32xf32>
    %258 = vector.extract_strided_slice %232 {offsets = [0, 0], sizes = [8, 32], strides = [1, 1]} : vector<8x96xf32> to vector<8x32xf32>
    %259 = arith.addf %257, %258 : vector<8x32xf32>
    %260 = arith.negf %259 : vector<8x32xf32>
    %261 = math.exp %260 : vector<8x32xf32>
    %cst_68 = arith.constant 1.000000e+00 : f32
    %262 = vector.broadcast %cst_68 : f32 to vector<8x32xf32>
    %263 = arith.addf %262, %261 : vector<8x32xf32>
    %264 = arith.divf %262, %263 : vector<8x32xf32>
    %265 = vector.extract_strided_slice %256 {offsets = [0, 32], sizes = [8, 32], strides = [1, 1]} : vector<8x96xf32> to vector<8x32xf32>
    %266 = vector.extract_strided_slice %232 {offsets = [0, 32], sizes = [8, 32], strides = [1, 1]} : vector<8x96xf32> to vector<8x32xf32>
    %267 = arith.addf %265, %266 : vector<8x32xf32>
    %268 = arith.negf %267 : vector<8x32xf32>
    %269 = math.exp %268 : vector<8x32xf32>
    %cst_69 = arith.constant 1.000000e+00 : f32
    %270 = vector.broadcast %cst_69 : f32 to vector<8x32xf32>
    %271 = arith.addf %270, %269 : vector<8x32xf32>
    %272 = arith.divf %270, %271 : vector<8x32xf32>
    %273 = vector.extract_strided_slice %256 {offsets = [0, 64], sizes = [8, 32], strides = [1, 1]} : vector<8x96xf32> to vector<8x32xf32>
    %274 = vector.extract_strided_slice %232 {offsets = [0, 64], sizes = [8, 32], strides = [1, 1]} : vector<8x96xf32> to vector<8x32xf32>
    %275 = arith.mulf %264, %274 : vector<8x32xf32>
    %276 = arith.addf %273, %275 : vector<8x32xf32>
    %277 = math.tanh %276 : vector<8x32xf32>
    %cst_70 = arith.constant 1.000000e+00 : f32
    %278 = vector.broadcast %cst_70 : f32 to vector<8x32xf32>
    %279 = arith.subf %278, %272 : vector<8x32xf32>
    %280 = arith.mulf %279, %277 : vector<8x32xf32>
    %281 = arith.mulf %272, %227 : vector<8x32xf32>
    %282 = arith.addf %280, %281 : vector<8x32xf32>
    %283 = arith.index_cast %c2_i32 : i32 to index
    %c0_71 = arith.constant 0 : index
    %c0_72 = arith.constant 0 : index
    %284 = vector.load %arg11[%283, %c0_71, %c0_72] : memref<4x8x32xf32, #tpu.memory_space<vmem>>, vector<1x8x32xf32>
    %285 = vector.shape_cast %284 : vector<1x8x32xf32> to vector<8x32xf32>
    %286 = vector.shape_cast %282 : vector<8x32xf32> to vector<1x8x32xf32>
    tpu.vector_store %arg11[%283, %c0_71, %c0_72], %286 {strides = array<i32>} : memref<4x8x32xf32, #tpu.memory_space<vmem>>, vector<1x8x32xf32>,
    %c3_i32 = arith.constant 3 : i32
    %287 = arith.index_cast %c3_i32 : i32 to index
    %c0_73 = arith.constant 0 : index
    %c0_74 = arith.constant 0 : index
    %288 = vector.load %arg1[%287, %c0_73, %c0_74] : memref<4x8x96xf32, #tpu.memory_space<vmem>>, vector<1x8x96xf32>
    %289 = vector.shape_cast %288 : vector<1x8x96xf32> to vector<8x96xf32>
    %cst_75 = arith.constant dense<0.000000e+00> : vector<8x96xf32>
    %290 = tpu.matmul %282, %3, %cst_75 {dimension_numbers = #tpu.dot_dimension_numbers<[1], [0], [0], [1], [0, 0, 1, 1], [], []>} : vector<8x32xf32>, vector<32x96xf32>, vector<8x96xf32> -> vector<8x96xf32>
    %291 = vector.broadcast %4 : vector<1x96xf32> to vector<8x96xf32>
    %292 = arith.addf %290, %291 : vector<8x96xf32>
    %293 = vector.extract_strided_slice %289 {offsets = [0, 0], sizes = [8, 32], strides = [1, 1]} : vector<8x96xf32> to vector<8x32xf32>
    %294 = vector.extract_strided_slice %292 {offsets = [0, 0], sizes = [8, 32], strides = [1, 1]} : vector<8x96xf32> to vector<8x32xf32>
    %295 = arith.addf %293, %294 : vector<8x32xf32>
    %296 = arith.negf %295 : vector<8x32xf32>
    %297 = math.exp %296 : vector<8x32xf32>
    %cst_76 = arith.constant 1.000000e+00 : f32
    %298 = vector.broadcast %cst_76 : f32 to vector<8x32xf32>
    %299 = arith.addf %298, %297 : vector<8x32xf32>
    %300 = arith.divf %298, %299 : vector<8x32xf32>
    %301 = vector.extract_strided_slice %289 {offsets = [0, 32], sizes = [8, 32], strides = [1, 1]} : vector<8x96xf32> to vector<8x32xf32>
    %302 = vector.extract_strided_slice %292 {offsets = [0, 32], sizes = [8, 32], strides = [1, 1]} : vector<8x96xf32> to vector<8x32xf32>
    %303 = arith.addf %301, %302 : vector<8x32xf32>
    %304 = arith.negf %303 : vector<8x32xf32>
    %305 = math.exp %304 : vector<8x32xf32>
    %cst_77 = arith.constant 1.000000e+00 : f32
    %306 = vector.broadcast %cst_77 : f32 to vector<8x32xf32>
    %307 = arith.addf %306, %305 : vector<8x32xf32>
    %308 = arith.divf %306, %307 : vector<8x32xf32>
    %309 = vector.extract_strided_slice %289 {offsets = [0, 64], sizes = [8, 32], strides = [1, 1]} : vector<8x96xf32> to vector<8x32xf32>
    %310 = vector.extract_strided_slice %292 {offsets = [0, 64], sizes = [8, 32], strides = [1, 1]} : vector<8x96xf32> to vector<8x32xf32>
    %311 = arith.mulf %300, %310 : vector<8x32xf32>
    %312 = arith.addf %309, %311 : vector<8x32xf32>
    %313 = math.tanh %312 : vector<8x32xf32>
    %cst_78 = arith.constant 1.000000e+00 : f32
    %314 = vector.broadcast %cst_78 : f32 to vector<8x32xf32>
    %315 = arith.subf %314, %308 : vector<8x32xf32>
    %316 = arith.mulf %315, %313 : vector<8x32xf32>
    %317 = arith.mulf %308, %282 : vector<8x32xf32>
    %318 = arith.addf %316, %317 : vector<8x32xf32>
    %cst_79 = arith.constant dense<0.000000e+00> : vector<8x128xf32>
    %319 = tpu.matmul %318, %5, %cst_79 {dimension_numbers = #tpu.dot_dimension_numbers<[1], [0], [0], [1], [0, 0, 1, 1], [], []>} : vector<8x32xf32>, vector<32x128xf32>, vector<8x128xf32> -> vector<8x128xf32>
    %320 = vector.extract_strided_slice %319 {offsets = [0, 0], sizes = [8, 32], strides = [1, 1]} : vector<8x128xf32> to vector<8x32xf32>
    %321 = vector.extract_strided_slice %319 {offsets = [0, 32], sizes = [8, 96], strides = [1, 1]} : vector<8x128xf32> to vector<8x96xf32>
    %322 = vector.broadcast %6 : vector<1x96xf32> to vector<8x96xf32>
    %323 = arith.addf %321, %322 : vector<8x96xf32>
    %324 = vector.shape_cast %320 : vector<8x32xf32> to vector<8x1x32xf32>
    %325 = vector.broadcast %324 : vector<8x1x32xf32> to vector<8x8x32xf32>
    %326 = arith.addf %12, %325 : vector<8x8x32xf32>
    %327 = math.tanh %326 : vector<8x8x32xf32>
    %328 = vector.broadcast %10 : vector<1x1x32xf32> to vector<8x8x32xf32>
    %329 = arith.mulf %327, %328 : vector<8x8x32xf32>
    %cst_80 = arith.constant dense<0.000000e+00> : vector<8x8xf32>
    %330 = vector.multi_reduction <add>, %329, %cst_80 [2] : vector<8x8x32xf32> to vector<8x8xf32>
    %cst_81 = arith.constant dense<0xFF800000> : vector<8xf32>
    %331 = vector.multi_reduction <maximumf>, %330, %cst_81 [1] : vector<8x8xf32> to vector<8xf32>
    %332 = vector.shape_cast %331 : vector<8xf32> to vector<8x1xf32>
    %333 = vector.broadcast %332 : vector<8x1xf32> to vector<8x8xf32>
    %334 = arith.subf %330, %333 : vector<8x8xf32>
    %335 = math.exp %334 : vector<8x8xf32>
    %cst_82 = arith.constant dense<0.000000e+00> : vector<8xf32>
    %336 = vector.multi_reduction <add>, %335, %cst_82 [1] : vector<8x8xf32> to vector<8xf32>
    %337 = vector.shape_cast %336 : vector<8xf32> to vector<8x1xf32>
    %338 = tpu.reciprocal %337 {approx = true} : vector<8x1xf32> -> vector<8x1xf32>
    %339 = vector.broadcast %338 : vector<8x1xf32> to vector<8x8xf32>
    %340 = arith.mulf %335, %339 : vector<8x8xf32>
    %341 = vector.shape_cast %340 : vector<8x8xf32> to vector<8x8x1xf32>
    %342 = vector.broadcast %341 : vector<8x8x1xf32> to vector<8x8x32xf32>
    %343 = arith.mulf %342, %11 : vector<8x8x32xf32>
    %cst_83 = arith.constant dense<0.000000e+00> : vector<8x32xf32>
    %344 = vector.multi_reduction <add>, %343, %cst_83 [1] : vector<8x8x32xf32> to vector<8x32xf32>
    %cst_84 = arith.constant dense<0.000000e+00> : vector<8x96xf32>
    %345 = tpu.matmul %344, %7, %cst_84 {dimension_numbers = #tpu.dot_dimension_numbers<[1], [0], [0], [1], [0, 0, 1, 1], [], []>} : vector<8x32xf32>, vector<32x96xf32>, vector<8x96xf32> -> vector<8x96xf32>
    %346 = vector.broadcast %8 : vector<1x96xf32> to vector<8x96xf32>
    %347 = arith.addf %345, %346 : vector<8x96xf32>
    %348 = vector.extract_strided_slice %347 {offsets = [0, 0], sizes = [8, 32], strides = [1, 1]} : vector<8x96xf32> to vector<8x32xf32>
    %349 = vector.extract_strided_slice %323 {offsets = [0, 0], sizes = [8, 32], strides = [1, 1]} : vector<8x96xf32> to vector<8x32xf32>
    %350 = arith.addf %348, %349 : vector<8x32xf32>
    %351 = arith.negf %350 : vector<8x32xf32>
    %352 = math.exp %351 : vector<8x32xf32>
    %cst_85 = arith.constant 1.000000e+00 : f32
    %353 = vector.broadcast %cst_85 : f32 to vector<8x32xf32>
    %354 = arith.addf %353, %352 : vector<8x32xf32>
    %355 = arith.divf %353, %354 : vector<8x32xf32>
    %356 = vector.extract_strided_slice %347 {offsets = [0, 32], sizes = [8, 32], strides = [1, 1]} : vector<8x96xf32> to vector<8x32xf32>
    %357 = vector.extract_strided_slice %323 {offsets = [0, 32], sizes = [8, 32], strides = [1, 1]} : vector<8x96xf32> to vector<8x32xf32>
    %358 = arith.addf %356, %357 : vector<8x32xf32>
    %359 = arith.negf %358 : vector<8x32xf32>
    %360 = math.exp %359 : vector<8x32xf32>
    %cst_86 = arith.constant 1.000000e+00 : f32
    %361 = vector.broadcast %cst_86 : f32 to vector<8x32xf32>
    %362 = arith.addf %361, %360 : vector<8x32xf32>
    %363 = arith.divf %361, %362 : vector<8x32xf32>
    %364 = vector.extract_strided_slice %347 {offsets = [0, 64], sizes = [8, 32], strides = [1, 1]} : vector<8x96xf32> to vector<8x32xf32>
    %365 = vector.extract_strided_slice %323 {offsets = [0, 64], sizes = [8, 32], strides = [1, 1]} : vector<8x96xf32> to vector<8x32xf32>
    %366 = arith.mulf %355, %365 : vector<8x32xf32>
    %367 = arith.addf %364, %366 : vector<8x32xf32>
    %368 = math.tanh %367 : vector<8x32xf32>
    %cst_87 = arith.constant 1.000000e+00 : f32
    %369 = vector.broadcast %cst_87 : f32 to vector<8x32xf32>
    %370 = arith.subf %369, %363 : vector<8x32xf32>
    %371 = arith.mulf %370, %368 : vector<8x32xf32>
    %372 = arith.mulf %363, %318 : vector<8x32xf32>
    %373 = arith.addf %371, %372 : vector<8x32xf32>
    %374 = arith.index_cast %c3_i32 : i32 to index
    %c0_88 = arith.constant 0 : index
    %c0_89 = arith.constant 0 : index
    %375 = vector.load %arg11[%374, %c0_88, %c0_89] : memref<4x8x32xf32, #tpu.memory_space<vmem>>, vector<1x8x32xf32>
    %376 = vector.shape_cast %375 : vector<1x8x32xf32> to vector<8x32xf32>
    %377 = vector.shape_cast %373 : vector<8x32xf32> to vector<1x8x32xf32>
    tpu.vector_store %arg11[%374, %c0_88, %c0_89], %377 {strides = array<i32>} : memref<4x8x32xf32, #tpu.memory_space<vmem>>, vector<1x8x32xf32>,
    %c4_i32 = arith.constant 4 : i32
    %c0_90 = arith.constant 0 : index
    %c0_91 = arith.constant 0 : index
    %378 = vector.load %arg12[%c0_90, %c0_91] : memref<8x32xf32, #tpu.memory_space<vmem>>, vector<8x32xf32>
    tpu.vector_store %arg12[%c0_90, %c0_91], %373 {strides = array<i32>} : memref<8x32xf32, #tpu.memory_space<vmem>>, vector<8x32xf32>,
    return
  }
  func.func @transform_0(%arg0: i32) -> (i32, i32, i32) {
    %c0_i32 = arith.constant 0 : i32
    %c0_i32_0 = arith.constant 0 : i32
    %c0_i32_1 = arith.constant 0 : i32
    return %arg0, %c0_i32, %c0_i32_0 : i32, i32, i32
  }
  func.func @transform_1(%arg0: i32) -> (i32, i32, i32) {
    %c0_i32 = arith.constant 0 : i32
    %c0_i32_0 = arith.constant 0 : i32
    %c0_i32_1 = arith.constant 0 : i32
    %c0_i32_2 = arith.constant 0 : i32
    return %c0_i32, %c0_i32_0, %c0_i32_1 : i32, i32, i32
  }
  func.func @transform_2(%arg0: i32) -> (i32, i32, i32) {
    %c0_i32 = arith.constant 0 : i32
    %c0_i32_0 = arith.constant 0 : i32
    %c0_i32_1 = arith.constant 0 : i32
    %c0_i32_2 = arith.constant 0 : i32
    return %c0_i32, %c0_i32_0, %c0_i32_1 : i32, i32, i32
  }
  func.func @transform_3(%arg0: i32) -> (i32, i32) {
    %c0_i32 = arith.constant 0 : i32
    %c0_i32_0 = arith.constant 0 : i32
    %c0_i32_1 = arith.constant 0 : i32
    return %c0_i32, %c0_i32_0 : i32, i32
  }
  func.func @transform_4(%arg0: i32) -> (i32, i32) {
    %c0_i32 = arith.constant 0 : i32
    %c0_i32_0 = arith.constant 0 : i32
    %c0_i32_1 = arith.constant 0 : i32
    return %c0_i32, %c0_i32_0 : i32, i32
  }
  func.func @transform_5(%arg0: i32) -> (i32, i32) {
    %c0_i32 = arith.constant 0 : i32
    %c0_i32_0 = arith.constant 0 : i32
    %c0_i32_1 = arith.constant 0 : i32
    return %c0_i32, %c0_i32_0 : i32, i32
  }
  func.func @transform_6(%arg0: i32) -> (i32, i32) {
    %c0_i32 = arith.constant 0 : i32
    %c0_i32_0 = arith.constant 0 : i32
    %c0_i32_1 = arith.constant 0 : i32
    return %c0_i32, %c0_i32_0 : i32, i32
  }
  func.func @transform_7(%arg0: i32) -> (i32, i32) {
    %c0_i32 = arith.constant 0 : i32
    %c0_i32_0 = arith.constant 0 : i32
    %c0_i32_1 = arith.constant 0 : i32
    return %c0_i32, %c0_i32_0 : i32, i32
  }
  func.func @transform_8(%arg0: i32) -> (i32, i32) {
    %c0_i32 = arith.constant 0 : i32
    %c0_i32_0 = arith.constant 0 : i32
    %c0_i32_1 = arith.constant 0 : i32
    return %c0_i32, %c0_i32_0 : i32, i32
  }
  func.func @transform_9(%arg0: i32) -> (i32, i32) {
    %c0_i32 = arith.constant 0 : i32
    %c0_i32_0 = arith.constant 0 : i32
    %c0_i32_1 = arith.constant 0 : i32
    return %c0_i32, %c0_i32_0 : i32, i32
  }
  func.func @transform_10(%arg0: i32) -> (i32, i32, i32) {
    %c0_i32 = arith.constant 0 : i32
    %c0_i32_0 = arith.constant 0 : i32
    %c0_i32_1 = arith.constant 0 : i32
    return %arg0, %c0_i32, %c0_i32_0 : i32, i32, i32
  }
}

</mosaic_0001>

<bundles_post_ra>
// kernel: tpu_custom_call.1
= control target key start
LH: loop header
LB: loop body
LE: loop exit
PB: predicated region body
PF: predicated region fallthrough
CT: control target
= control target key end

     0   :  { %s5847_s0 = inlined_call_operand.hbm [shape: f32[8,8,96], index: 0, kind: input, shape index: {}]   ;;  %s5848_s1 = inlined_call_operand.hbm [shape: f32[8,8,32], index: 1, kind: input, shape index: {}]   ;;  %s5849_s2 = inlined_call_operand.hbm [shape: f32[8,8,32], index: 2, kind: input, shape index: {}]   ;;  %s5850_s3 = inlined_call_operand.hbm [shape: f32[32,96], index: 3, kind: input, shape index: {}]   ;;  %s5851_s4 = inlined_call_operand.vmem [shape: f32[1,96], index: 4, kind: input, shape index: {}]   ;;  %s5852_s5 = inlined_call_operand.hbm [shape: f32[32,128], index: 5, kind: input, shape index: {}]   ;;  %s5853_s6 = inlined_call_operand.vmem [shape: f32[1,96], index: 6, kind: input, shape index: {}]   ;;  %s5854_s7 = inlined_call_operand.hbm [shape: f32[32,96], index: 7, kind: input, shape index: {}]   ;;  %s5855_s8 = inlined_call_operand.vmem [shape: f32[1,96], index: 8, kind: input, shape index: {}]   ;;  %s5856_s9 = inlined_call_operand.vmem [shape: f32[1,32], index: 9, kind: input, shape index: {}]   ;;  %s5857_s10 = inlined_call_operand.hbm [shape: f32[8,8,32], index: 10, kind: output, shape index: {}]  }
   0x1   :  { %5876 = sst [smem:[#allocation24_spill]] %s5848_s1 }
   0x2   :  { %5877 = sst [smem:[#allocation25_spill]] %s5855_s8 }
   0x3   :  { %5878 = sst [smem:[#allocation26_spill]] %s5857_s10 }
   0x4   :  { %15 = vsyncpa [#allocation4], 0 }
   0x5   :  { %17 = vsyncpa [#allocation4 + $0x1], 0 }
   0x6   :  { %18 = vsyncpa [#allocation7], 0 }
   0x7   :  { %19 = vsyncpa [#allocation10], 0 }
   0x8   :  { %20 = vsyncpa [#allocation13], 0 }
   0x9   :  { %21 = vsyncpa [#allocation5], 0 }
   0xa   :  { %23 = vsyncpa [#allocation5 + $0x1], 0  ;;  %s4752_s13 = smov 0   ;;  %s4754_s14 = smov 0  }
   0xb   :  { %s4756_s15 = smov 0   ;;  %s4758_s16 = smov 0  }
   0xc LB: > { %s4677_s17 = smov [#allocation6]   ;;  %s4773_s19 = sadd.s32 4294967295, %s4675_s16   ;;  %s4675_s16 = sphi %s4758_s16, %s5923_s16   ;;  %s4671_s15 = sphi %s4756_s15, %s5922_s15   ;;  %s4667_s14 = sphi %s4754_s14, %s5921_s14   ;;  %s4663_s13 = sphi %s4752_s13, %s5920_s13  }
   0xd   : > { %s287_s18 = sshll.u32 %s4677_s17, 4  ;;  %p3792_p0 = scmp.ge.s32.totalorder %s4675_s16, 1  ;;  %s4779_s18 = int_to_ptr.vmem [resolvable:$true] %s287_s18 }
   0xe   : > { %p5860_p1 = scmp.eq.s32.totalorder %s4773_s19, 0  ;;  %p275_p2 = scmp.lt.s32.totalorder %s4675_s16, 3 }
   0xf   : > { %s4678_s21 = smov [#allocation9]   ;;  %s4679_s24 = smov [#allocation8]  }
  0x10   : > { %p4781_p4 = pnand %p3792_p0, %p275_p2  ;;  %s313_s22 = sshll.u32 %s4678_s21, 4  ;;  %s4794_s22 = int_to_ptr.vmem [resolvable:$true] %s313_s22 }
  0x11   : > { %s300_s25 = sshll.u32 %s4679_s24, 4  ;;  %s5881_s1 = sld [smem:[#allocation24_spill]]  ;;  %s4796_s25 = int_to_ptr.vmem [resolvable:$true] %s300_s25 }
  0x12   : > { %s5879_s20 = scalar_select %p4781_p4, 1, 0 }
  0x13   : > { %p4136_p6 = pneg %p4781_p4 }
  0x15   : > { %p4790_p7 = pnand %p4136_p6, %p5860_p1 }
  0x17   : > { %s4427_s28 = scalar_lea.hbm %s5881_s1, 1024  ;;  %p4806_p9 = pneg %p4790_p7 }
  0x18   : > { %p4428_p8 = scmp.ne.s32.totalorder %s5881_s1, %s4427_s28  ;;  %p4434_p12 = scmp.lt.u32.totalorder %s4427_s28, %s5881_s1 }
  0x1a   : > { %p4430_p10 = pnand %p4806_p9, %p4428_p8 }
  0x1c   : > { %p4431_p11 = pneg %p4430_p10 }
  0x1e   : > { %p4436_p13 = pnand %p4434_p12, %p4431_p11 }
  0x20   : > { %4439 = shalt.err (!%p4436_p13)
}
  0x21   : > { %s4440_s21 = scalar_lea.vmem %s4779_s18, 1024  ;;  %p4448_p5 = scmp.lt.s32.totalorder %s4779_s18, %s4779_s18 }
  0x22   : > { %p4441_p0 = scmp.ne.s32.totalorder %s4779_s18, %s4440_s21  ;;  %p4449_p3 = scmp.lt.s32.totalorder %s4440_s21, %s4440_s21 }
  0x24   : > { %p4443_p2 = pnand %p4441_p0, %p4806_p9  ;;  %p4450_p8 = por %p4449_p3, %p4448_p5 }
  0x26   : > { %p4444_p6 = pneg %p4443_p2 }
  0x28   : > { %p4451_p10 = pnand %p4450_p8, %p4444_p6 }
  0x2a   : > { %4454 = shalt.err (!%p4451_p10)
}
  0x2b   : > { %s5862_s24 = smov 128   ;;  %s4681_s26 = smov 8  }
  0x2c   : > { %4139 = dma.hbm_to_vmem [thread:$0]  (!%p4790_p7), %s5881_s1, 1024, %s4779_s18, [#allocation7], %s5862_s24, %s5862_s24, %s4681_s26  }
  0x2d   : > { %s4455_s12 = scalar_lea.hbm %s5850_s3, 512 }
  0x2e   : > { %p4456_p3 = scmp.ne.s32.totalorder %s5850_s3, %s4455_s12  ;;  %p4462_p12 = scmp.lt.u32.totalorder %s4455_s12, %s5850_s3 }
  0x30   : > { %p4458_p5 = pnand %p4456_p3, %p4806_p9 }
  0x32   : > { %p4459_p11 = pneg %p4458_p5 }
  0x34   : > { %p4464_p13 = pnand %p4462_p12, %p4459_p11 }
  0x36   : > { %4467 = shalt.err (!%p4464_p13)
}
  0x37   : > { %s4468_s18 = scalar_lea.vmem %s4794_s22, 512  ;;  %p4476_p8 = scmp.lt.s32.totalorder %s4794_s22, %s4794_s22 }
  0x38   : > { %p4469_p0 = scmp.ne.s32.totalorder %s4794_s22, %s4468_s18  ;;  %p4477_p10 = scmp.lt.s32.totalorder %s4468_s18, %s4468_s18 }
  0x3a   : > { %p4471_p2 = pnand %p4469_p0, %p4806_p9  ;;  %p4478_p3 = por %p4477_p10, %p4476_p8 }
  0x3c   : > { %p4472_p6 = pneg %p4471_p2 }
  0x3e   : > { %p4479_p5 = pnand %p4478_p3, %p4472_p6 }
  0x40   : > { %4482 = shalt.err (!%p4479_p5)
}
  0x41   : > { %4145 = dma.hbm_to_vmem [thread:$0]  (!%p4790_p7), %s5850_s3, 512, %s4794_s22, [#allocation10], %s5862_s24, %s5862_s24, %s4681_s26  }
  0x42   : > { %s4483_s29 = scalar_lea.hbm %s5849_s2, 1024 }
  0x43   : > { %p4484_p11 = scmp.ne.s32.totalorder %s5849_s2, %s4483_s29  ;;  %p4490_p0 = scmp.lt.u32.totalorder %s4483_s29, %s5849_s2 }
  0x45   : > { %p4486_p12 = pnand %p4484_p11, %p4806_p9 }
  0x47   : > { %p4487_p13 = pneg %p4486_p12 }
  0x49   : > { %p4492_p2 = pnand %p4490_p0, %p4487_p13 }
  0x4b   : > { %4495 = shalt.err (!%p4492_p2)
}
  0x4c   : > { %s4496_s22 = scalar_lea.vmem %s4796_s25, 1024  ;;  %p4504_p3 = scmp.lt.s32.totalorder %s4796_s25, %s4796_s25 }
  0x4d   : > { %p4497_p6 = scmp.ne.s32.totalorder %s4796_s25, %s4496_s22  ;;  %p4505_p5 = scmp.lt.s32.totalorder %s4496_s22, %s4496_s22 }
  0x4f   : > { %p4499_p8 = pnand %p4497_p6, %p4806_p9  ;;  %p4506_p11 = por %p4505_p5, %p4504_p3 }
  0x51   : > { %p4500_p10 = pneg %p4499_p8 }
  0x53   : > { %p4507_p12 = pnand %p4506_p11, %p4500_p10 }
  0x55   : > { %4510 = shalt.err (!%p4507_p12)
}
  0x56   : > { %4142 = dma.hbm_to_vmem [thread:$0]  (!%p4790_p7), %s5849_s2, 1024, %s4796_s25, [#allocation7], %s5862_s24, %s5862_s24, %s4681_s26  }
  0x57   : > { %s4682_s10 = smov [#allocation11]   ;;  %s4683_s28 = smov [#allocation12]  }
  0x58   : > { %s329_s27 = sshll.u32 %s4682_s10, 4  ;;  %s345_s29 = sshll.u32 %s4683_s28, 4  ;;  %s330_s27 = int_to_ptr.vmem [resolvable:$true] %s329_s27  ;;  %s346_s29 = int_to_ptr.vmem [resolvable:$true] %s345_s29 }
  0x59   : > { %s4511_s17 = scalar_lea.hbm %s5852_s5, 512 }
  0x5a   : > { %p4512_p13 = scmp.ne.s32.totalorder %s5852_s5, %s4511_s17  ;;  %p4518_p6 = scmp.lt.u32.totalorder %s4511_s17, %s5852_s5 }
  0x5c   : > { %p4514_p0 = pnand %p4512_p13, %p4806_p9 }
  0x5e   : > { %p4515_p2 = pneg %p4514_p0 }
  0x60   : > { %p4520_p8 = pnand %p4518_p6, %p4515_p2 }
  0x62   : > { %4523 = shalt.err (!%p4520_p8)
}
  0x63   : > { %s4524_s25 = scalar_lea.vmem %s330_s27, 512  ;;  %p4532_p11 = scmp.lt.s32.totalorder %s330_s27, %s330_s27 }
  0x64   : > { %p4525_p10 = scmp.ne.s32.totalorder %s330_s27, %s4524_s25  ;;  %p4533_p12 = scmp.lt.s32.totalorder %s4524_s25, %s4524_s25 }
  0x66   : > { %p4527_p3 = pnand %p4525_p10, %p4806_p9  ;;  %p4534_p1 = por %p4533_p12, %p4532_p11 }
  0x68   : > { %p4528_p5 = pneg %p4527_p3 }
  0x6a   : > { %p4535_p4 = pnand %p4534_p1, %p4528_p5 }
  0x6c   : > { %4538 = shalt.err (!%p4535_p4)
}
  0x6d   : > { %4148 = dma.hbm_to_vmem [thread:$0]  (!%p4790_p7), %s5852_s5, 512, %s330_s27, [#allocation10], %s5862_s24, %s5862_s24, %s4681_s26  }
  0x6e   : > { %s4539_s30 = scalar_lea.hbm %s5854_s7, 512 }
  0x6f   : > { %p4540_p1 = scmp.ne.s32.totalorder %s5854_s7, %s4539_s30  ;;  %p4546_p0 = scmp.lt.u32.totalorder %s4539_s30, %s5854_s7 }
  0x71   : > { %p4542_p4 = pnand %p4540_p1, %p4806_p9 }
  0x73   : > { %p4543_p13 = pneg %p4542_p4 }
  0x75   : > { %p4548_p2 = pnand %p4546_p0, %p4543_p13 }
  0x77   : > { %4551 = shalt.err (!%p4548_p2)
}
  0x78   : > { %s4552_s18 = scalar_lea.vmem %s346_s29, 512  ;;  %p4560_p3 = scmp.lt.s32.totalorder %s346_s29, %s346_s29 }
  0x79   : > { %p4553_p6 = scmp.ne.s32.totalorder %s346_s29, %s4552_s18  ;;  %p4561_p5 = scmp.lt.s32.totalorder %s4552_s18, %s4552_s18 }
  0x7b   : > { %p4555_p8 = pnand %p4553_p6, %p4806_p9  ;;  %p4562_p11 = por %p4561_p5, %p4560_p3 }
  0x7d   : > { %p4556_p10 = pneg %p4555_p8 }
  0x7f   : > { %p4563_p12 = pnand %p4562_p11, %p4556_p10 }
  0x81   : > { %4566 = shalt.err (!%p4563_p12)
}
  0x82   : > { %4151 = dma.hbm_to_vmem [thread:$0]  (!%p4790_p7), %s5854_s7, 512, %s346_s29, [#allocation13], %s5862_s24, %s5862_s24, %s4681_s26  }
  0x83   : > { %s3791_s23 = sadd.s32 4294967294, %s4675_s16   ;;  %s4926_s11 = sadd.s32 1, %s4675_s16  }
  0x84   : > { %s36_s1 = sadd.s32 1, %s4671_s15  ;;  %s33_s8 = ssub.s32 %s4675_s16, %s4926_s11 }
  0x85   : > { %p43_p9 = scmp.ne.s32.totalorder %s4671_s15, %s4667_s14  ;;  %p34_p1 = scmp.eq.s32.totalorder %s33_s8, 0 }
  0x86   : > { %p44_p4 = scmp.eq.s32.totalorder %s4675_s16, 0  ;;  %p49_p13 = scmp.ne.s32.totalorder %s4667_s14, %s4663_s13 }
  0x87   : > { %p262_p0 = scmp.eq.s32.totalorder %s4773_s19, 1  ;;  %p5883_p6 = scmp.eq.s32.totalorder %s4773_s19, 0 }
  0x88   : > { %s4938_s10 = scalar_select %p34_p1, %s4671_s15, %s36_s1  }
  0x89   : > { %p45_p2 = por %p44_p4, %p43_p9  ;;  %p4942_p8 = por %p5883_p6, %p49_p13 }
  0x8a   : > { %p4946_p7 = por %p262_p0, %p43_p9  ;;  %p268_p10 = scmp.eq.s32.totalorder %s3791_s23, 1 }
  0x8b   : > { %p4165_p3 = scmp.lt.s32.totalorder %s4675_s16, 2  ;;  %s365_s30 = sand.u32 1, %s4671_s15  }
  0x8c   : > { %s5885_s29 = scalar_select %p4946_p7, 1, 0 }
  0x8d   : > { %p4952_p5 = por %p268_p10, %p49_p13  ;;  %s3799_s17 = sshll.u32 %s365_s30, 5 }
  0x8e   : > { %s3846_s21 = sshll.u32 %s4675_s16, 9  ;;  %s369_s25 = scalar_lea.vmem [#allocation3], %s3799_s17 }
  0x8f   : > { %s5886_s12 = scalar_select %p4952_p5, 1, 0 }
  0x90   : > { %s4960_s27 = scalar_lea.hbm %s5847_s0, %s3846_s21  ;;  %s376_s1 = sshll.u32 %s369_s25, 4  ;;  %s4966_s1 = int_to_ptr.vmem [resolvable:$true] %s376_s1 }
  0x91   : > { %p4962_p11 = pnand %p4165_p3, %p45_p2  ;;  %s4968_s8 = scalar_lea.sflag [#allocation4], %s365_s30 }
  0x92   : > { %s4567_s24 = scalar_lea.hbm %s4960_s27, 512  ;;  %s4572_s22 = scalar_lea.hbm %s5847_s0, 1024 }
  0x93   : > { %p4568_p12 = scmp.ne.s32.totalorder %s4960_s27, %s4567_s24  ;;  %p4569_p9 = pneg %p4962_p11 }
  0x94   : > { %p4573_p13 = scmp.lt.u32.totalorder %s4960_s27, %s5847_s0  ;;  %p4574_p0 = scmp.lt.u32.totalorder %s4572_s22, %s4567_s24 }
  0x95   : > { %p4570_p1 = pnand %p4569_p9, %p4568_p12  ;;  %p4576_p6 = scmp.lt.u32.totalorder %s4567_s24, %s4960_s27 }
  0x96   : > { %p4575_p2 = por %p4574_p0, %p4573_p13 }
  0x97   : > { %p4571_p4 = pneg %p4570_p1 }
  0x98   : > { %p4577_p10 = por %p4576_p6, %p4575_p2 }
  0x9a   : > { %p4578_p3 = pnand %p4577_p10, %p4571_p4 }
  0x9c   : > { %4581 = shalt.err (!%p4578_p3)
}
  0x9d   : > { %s4582_s30 = scalar_lea.vmem %s4966_s1, 512  ;;  %s4684_s17 = smov [#allocation3]  }
  0x9e   : > { %p4583_p12 = scmp.ne.s32.totalorder %s4966_s1, %s4582_s30  ;;  %s4587_s21 = sshll.u32 %s4684_s17, 4  ;;  %s4588_s21 = int_to_ptr.vmem [resolvable:$false] %s4587_s21 }
  0x9f   : > { %s4589_s18 = scalar_lea.vmem %s4588_s21, 1024  ;;  %p4590_p7 = scmp.lt.s32.totalorder %s4966_s1, %s4588_s21 }
  0xa0   : > { %p4585_p1 = pnand %p4583_p12, %p4569_p9  ;;  %p4591_p13 = scmp.lt.s32.totalorder %s4589_s18, %s4582_s30 }
  0xa2   : > { %p4586_p5 = pneg %p4585_p1  ;;  %p4592_p0 = por %p4591_p13, %p4590_p7 }
  0xa4   : > { %p4593_p2 = pnand %p4592_p0, %p4586_p5 }
  0xa6   : > { %4596 = shalt.err (!%p4593_p2)
}
  0xa7   : > { %s5888_s24 = smov 128   ;;  %p5889_p9 = scmp.ne.s32.totalorder %s5879_s20, 0 }
  0xa8   : > { %4155 = dma.hbm_to_vmem [thread:$0]  (!%p4962_p11), %s4960_s27, 512, %s4966_s1, %s4968_s8, %s5888_s24, %s5888_s24, %s4681_s26  }
  0xa9   : > { %388 = sbr.rel (%p5889_p9) target bundleno = 9566 (0x255e), region = 60 }
  0xb0   : > { %s5002_s22 = sand.u32 1, %s4667_s14  }
  0xb1   : > { %s3803_s25 = sshll.u32 %s5002_s22, 5  ;;  %s391_s30 = scalar_lea.sflag [#allocation4], %s5002_s22 }
  0xb2   : > { %s5006_s17 = scalar_lea.vmem [#allocation3], %s3803_s25 }
  0xb3   : > { %4642 = dma.done.wait (%p4942_p8), %s391_s30, 512  }
  0xb4   : > { %4644 = vsyncadd (%p4942_p8), %s391_s30, 4294966784  ;;  %p5890_p7 = scmp.eq.s32.totalorder %s4773_s19, 0 }
  0xb6   : > { %4646 = dma.done.wait (%p5890_p7), [#allocation7], 2048   ;;  %p5891_p5 = pmov %p5890_p7 }
  0xb8   : > { %4648 = vsyncadd (%p5891_p5), [#allocation7], 4294965248  ;;  %p5892_p11 = pmov %p5891_p5 }
  0xb9   : > { %p5893_p4 = pmov %p5891_p5 }
  0xba   : > { %4650 = dma.done.wait (%p5892_p11), [#allocation10], 1024  }
  0xbb   : > { %4652 = vsyncadd (%p5893_p4), [#allocation10], 4294966272  ;;  %p5894_p6 = pmov %p5893_p4 }
  0xbc   : > { %p5895_p10 = pmov %p5893_p4 }
  0xbd   : > { %4654 = dma.done.wait (%p5894_p6), [#allocation13], 512  }
  0xbe   : > { %4656 = vsyncadd (%p5895_p10), [#allocation13], 4294966784  ;;  %s5024_s20 = scalar_lea.vmem [#allocation14], %s3803_s25  ;;  %p5896_p8 = scmp.ne.s32.totalorder %s4773_s19, 0 }
  0xbf   : > { %vm457_vm0 = vcmask (!%p5896_p8), 261120   ;;  %v4685_v0 = vmov (!%p5896_p8), 0.0  }
  0xc0   : > { %456 = sbr.rel (%p5896_p8) target bundleno = 199 (0xc7), region = 88  ;;  %458 = vst.msk [vmem:[#allocation2] sm:$0xff] (!%p5896_p8), %vm457_vm0, %v4685_v0 }
  0xc7 PF: > { %v459_v1 = vld [vmem:[#allocation9] sm:$0xff]  ;;  %v460_v2 = vld [vmem:[#allocation9 + $0x8] sm:$0xff]  ;;  %v461_v3 = vld [vmem:[#allocation9 + $0x10] sm:$0xff]  ;;  %v5864_v4 = vmov 0.0|0.0   ;;  %vm4687_vm1 = vmmov 0   ;;  %v5866_v7 = vmov 0.0   ;;  %v691_v40 = vlaneseq }
  0xc8   : > { %4040 = vmatprep.subr.bf16.mxu0 %v5864_v4  ;;  %v5029_v5 = vpack.c.bf16 %v460_v2, %v459_v1  ;;  %v462_v6 = vld [vmem:[#allocation9 + $0x18] sm:$0xff]  ;;  %3916 = vmatprep.mubr.msk.f32.mxu0 %vm4687_vm1, %v5866_v7  ;;  %vm499_vm2 = vcmask 261120   ;;  %s4689_s27 = smov 64   ;;  %v492_v14 = vld [vmem:[%s5006_s17] sm:$0xff]  ;;  %v465_v25 = vld [vmem:[#allocation11 + $0x8] sm:$0xff]  ;;  %s4690_s1 = smov 96  }
  0xc9   : > { %4046 = vmatprep.subr.bf16.mxu1 %v5864_v4  ;;  %3927 = vmatprep.mubr.msk.f32.mxu1 %vm4687_vm1, %v5866_v7  ;;  %v5037_v8 = vpack.c.bf16 %v462_v6, %v461_v3  ;;  %v491_v9 = vld [vmem:[#allocation2] sm:$0xff]  ;;  %v464_v24 = vld [vmem:[#allocation11] sm:$0xff]  ;;  %v466_v26 = vld [vmem:[#allocation11 + $0x10] sm:$0xff]  ;;  %s4691_s23 = smov 32   ;;  %v4692_v38 = vmov 1966171168  }
  0xca   : > { %4042 = vmatpush3.bf16.msra.mxu0 %v5029_v5  ;;  %v5048_v10 = vld [vmem:[%s5851_s4] ss:$0 sm:$0xff]  ;;  %v5054_v27 = vpack.c.bf16 %v465_v25, %v464_v24  ;;  %v689_v39 = vunpack.c.l.s4 %v4692_v38  ;;  %v5076_v42 = vshrl.u32 %v691_v40, 7  ;;  %v5092_v52 = vld [vmem:[#allocation8] sm:$0xff]  ;;  %v5097_v58 = vld [vmem:[#allocation8 + $0x8] sm:$0xff]  ;;  %vm872_vm3 = vcmask 1041409  }
  0xcb   : > { %4043 = vmatprep.subr.bf16.mxu0 %v5864_v4  ;;  %v467_v28 = vld [vmem:[#allocation11 + $0x18] sm:$0xff]  ;;  %v5099_v59 = vld [vmem:[#allocation8 + $0x10] sm:$0xff]  ;;  %v5101_v60 = vld [vmem:[#allocation8 + $0x20] sm:$0xff]  ;;  %vm874_vm4 = vcmask 1042434   ;;  %vm876_vm5 = vcmask 1043459   ;;  %vm878_vm6 = vcmask 1044484  }
  0xcc   : > { %4048 = vmatpush3.bf16.msra.mxu1 %v5054_v27  ;;  %v5057_v29 = vpack.c.bf16 %v467_v28, %v466_v26  ;;  %v690_v41 = vunpack.c.0.s8 %v689_v39  ;;  %v5088_v48 = vsub.s32 0, %v5076_v42  ;;  %v5105_v0 = vld [vmem:[#allocation8 + $0x18] sm:$0xff]  ;;  %vm880_vm7 = vcmask 1045509   ;;  %s5903_s26 = sld [smem:[#allocation25_spill]]  ;;  %s5916_s28 = sld [smem:[#allocation26_spill]] }
  0xcd   : > { %4049 = vmatprep.subr.bf16.mxu1 %v5864_v4  ;;  %v5130_v25 = vld [vmem:[%s5856_s9] ss:$0 sm:$0xff]  ;;  %vm882_vm8 = vcmask 1046534   ;;  %vm884_vm9 = vcmask 1047559   ;;  %vm887_vm10 = vcmask 64512   ;;  %s3657_s21 = scalar_lea.sflag [#allocation5], %s5002_s22 }
  0xce   : > { %4045 = vmatpush3.bf16.msra.mxu0 %v5037_v8  ;;  %v5079_v43 = vsub.s32 %v690_v41, %v5076_v42  ;;  %p5917_p12 = scmp.ne.s32.totalorder %s5885_s29, 0 }
  0xcf   : > { %4052 = vmatprep.subr.bf16.mxu0 %v5864_v4 }
  0xd0   : > { %4051 = vmatpush3.bf16.msra.mxu1 %v5057_v29 }
  0xd1   : > { %3917 = vmatmul.mubr.msk.f32.vlgmr.msra.gmra.mrb[0].mxu0 %vm499_vm2, %v491_v9  ;;  %4058 = vmatprep.subr.bf16.mxu1 %v5864_v4 }
  0xd2   : > { %3938 = vmatprep.mubr.msk.f32.mxu0 %vm4687_vm1, %v5866_v7 }
 0x1a4   : > { %v569_v11 = vpop.f32.mrb[0].mxu0 }
 0x1a5   : > { %v570_v12 = vadd.f32 %v5048_v10, %v569_v11  ;;  %v3918_v13 = vpop.f32.mrb[1].mxu0 }
 0x1a7   : > { %581 = vrot.lane.b32.xlu0 %v570_v12, %s4689_s27  ;;  %v573_v15 = vadd.f32 %v570_v12, %v492_v14 }
 0x1a9   : > { %v3813_v16 = vmul.f32 -1.442695, %v573_v15 }
 0x1ab   : > { %4224 = vpow2.f32 %v3813_v16 }
 0x1b5   : > { %v4225_v17 = vpop.eup %4224 }
 0x1b6   : > { %v577_v18 = vadd.f32 1.0, %v4225_v17 }
 0x1b8   : > { %4226 = vrcp.f32 %v577_v18 }
 0x1c2   : > { %v4227_v19 = vpop.eup %4226 }
 0x1c3   : > { %v591_v32 = vsub.f32 1.0, %v4227_v19 }
 0x219   : > { %v582_v20 = vpop.permute.xlu0 %581 }
 0x21a   : > { %v584_v21 = vmul.f32 %v4227_v19, %v582_v20 }
 0x21c   : > { %586 = vrot.lane.b32.xlu0 %v584_v21, %s4689_s27  ;;  %v5121_v21 = vld [vmem:[#allocation8 + $0x38] sm:$0xff] }
 0x28e   : > { %v587_v22 = vpop.permute.xlu0 %586 }
 0x28f   : > { %v589_v23 = vadd.f32 %v587_v22, %v492_v14  ;;  %v5123_v22 = vld [vmem:[#allocation8 + $0x30] sm:$0xff] }
 0x291   : > { %4228 = vtanh.f32 %v589_v23 }
 0x29b   : > { %v4229_v30 = vpop.eup %4228 }
 0x29c   : > { %593 = vrot.lane.b32.xlu1 %v4229_v30, %s4690_s1 }
 0x2a0   : > { %597 = vrot.lane.b32.xlu1 %v491_v9, %s4691_s23  ;;  %v5110_v9 = vld [vmem:[#allocation8 + $0x28] sm:$0xff] }
 0x30e   : > { %v594_v31 = vpop.permute.xlu1 %593 }
 0x30f   : > { %v596_v34 = vmul.f32 %v594_v31, %v591_v32 }
 0x312   : > { %v598_v33 = vpop.permute.xlu1 %597 }
 0x313   : > { %v600_v35 = vmul.f32 %v4227_v19, %v598_v33 }
 0x315   : > { %v5064_v36 = vadd.f32 %v600_v35, %v596_v34 }
 0x317   : > { %603 = vrot.lane.b32.xlu0 %v5064_v36, %s4690_s1 }
 0x389   : > { %v604_v37 = vpop.permute.xlu0 %603 }
 0x38a   : > { %3928 = vmatmul.mubr.msk.f32.vlgmr.msra.gmra.mrb[0].mxu1 %vm499_vm2, %v604_v37 }
 0x38b   : > { %4060 = vmatpush3.bf16.msra.mxu1 %v5029_v5  ;;  %3949 = vmatprep.mubr.msk.f32.mxu1 %vm4687_vm1, %v5866_v7 }
 0x38c   : > { %4061 = vmatprep.subr.bf16.mxu1 %v5864_v4 }
 0x38f   : > { %4063 = vmatpush3.bf16.msra.mxu1 %v5037_v8 }
 0x390   : > { %4070 = vmatprep.subr.bf16.mxu1 %v5864_v4 }
 0x45d   : > { %v5081_v44 = vpop.f32.mrb[0].mxu1 }
 0x45e   : > { %v687_v45 = vcombine.high %v5081_v44, %v5081_v44  ;;  %v694_v46 = vrot.slane %v5081_v44, %v5079_v43  ;;  %v3929_v47 = vpop.f32.mrb[1].mxu1 }
 0x460   : > { %v701_v49 = vrot.slane %v687_v45, %v5079_v43  ;;  %v702_v50 = vcombine.high %v694_v46, %v694_v46  ;;  %v710_v51 = vrot.slane %v694_v46, %v5079_v43 }
 0x462   : > { %v703_v53 = vcombine.high %v701_v49, %v701_v49  ;;  %v717_v54 = vrot.slane %v701_v49, %v5079_v43  ;;  %v724_v55 = vrot.slane %v702_v50, %v5079_v43  ;;  %v732_v56 = vcombine.high %v710_v51, %v710_v51 }
 0x463   : > { %v739_v57 = vrot.slane %v710_v51, %v5088_v48 }
 0x464   : > { %v731_v61 = vrot.slane %v703_v53, %v5079_v43  ;;  %v734_v62 = vcombine.high %v724_v55, %v724_v55  ;;  %v743_v63 = vrot.slane %v724_v55, %v5088_v48  ;;  %v733_v1 = vcombine.high %v717_v54, %v717_v54 }
 0x465   : > { %v747_v2 = vrot.slane %v732_v56, %v5088_v48  ;;  %v755_v3 = vrot.slane %v717_v54, %v5088_v48  ;;  %v776_v6 = vadd.f32 %v739_v57, %v5092_v52 }
 0x466   : > { %v735_v11 = vcombine.high %v731_v61, %v731_v61  ;;  %v751_v12 = vrot.slane %v734_v62, %v5088_v48  ;;  %v759_v13 = vrot.slane %v731_v61, %v5088_v48  ;;  %v777_v14 = vadd.f32 %v743_v63, %v5097_v58 }
 0x467   : > { %v778_v15 = vadd.f32 %v747_v2, %v5099_v59  ;;  %v780_v16 = vadd.f32 %v755_v3, %v5101_v60  ;;  %4230 = vtanh.f32 %v776_v6  ;;  %v763_v19 = vrot.slane %v733_v1, %v5088_v48 }
 0x468   : > { %v767_v17 = vrot.slane %v735_v11, %v5088_v48  ;;  %v779_v18 = vadd.f32 %v751_v12, %v5105_v0  ;;  %v781_v20 = vadd.f32 %v759_v13, %v5110_v9  ;;  %4232 = vtanh.f32 %v777_v14 }
 0x469   : > { %4234 = vtanh.f32 %v778_v15  ;;  %v782_v24 = vadd.f32 %v763_v19, %v5123_v22  ;;  %v839_v62 = vand.u32 127, %v691_v40 }
 0x46a   : > { %4236 = vtanh.f32 %v780_v16  ;;  %v783_v23 = vadd.f32 %v767_v17, %v5121_v21 }
 0x46b   : > { %4238 = vtanh.f32 %v779_v18  ;;  %v5150_v1 = vsub.s32 %v839_v62, %v5076_v42 }
 0x46c   : > { %4240 = vtanh.f32 %v781_v20 }
 0x46d   : > { %4242 = vtanh.f32 %v783_v23 }
 0x46e   : > { %4244 = vtanh.f32 %v782_v24 }
 0x471   : > { %v4231_v26 = vpop.eup %4230 }
 0x472   : > { %v798_v28 = vmul.f32 %v4231_v26, %v5130_v25  ;;  %v4233_v30 = vpop.eup %4232 }
 0x473   : > { %v4235_v31 = vpop.eup %4234  ;;  %v799_v33 = vmul.f32 %v4233_v30, %v5130_v25 }
 0x474   : > { %v806_v32 = vsel %vm499_vm2, %v798_v28, 0.0  ;;  %v4237_v34 = vpop.eup %4236  ;;  %v800_v38 = vmul.f32 %v4235_v31, %v5130_v25 }
 0x475   : > { %807 = vadd.xlane.f32.xlu1 %v806_v32  ;;  %v4239_v35 = vpop.eup %4238  ;;  %v809_v37 = vsel %vm499_vm2, %v799_v33, 0.0  ;;  %v802_v50 = vmul.f32 %v4237_v34, %v5130_v25 }
 0x476   : > { %v4241_v39 = vpop.eup %4240  ;;  %810 = vadd.xlane.f32.xlu0 %v809_v37  ;;  %v801_v41 = vmul.f32 %v4239_v35, %v5130_v25  ;;  %v812_v49 = vsel %vm499_vm2, %v800_v38, 0.0  ;;  %v4693_v35 = vmov 0   ;;  %v5169_v37 = vsub.s32 1, %v5076_v42 }
 0x477   : > { %v803_v46 = vmul.f32 %v4241_v39, %v5130_v25  ;;  %v4243_v47 = vpop.eup %4242  ;;  %v818_v55 = vsel %vm499_vm2, %v802_v50, 0.0  ;;  %4223 = vset.pattern.permute.xlu0 %v4693_v35  ;;  %4222 = vset.pattern.permute.xlu1 %v4693_v35  ;;  %v5172_v38 = vsub.s32 2, %v5076_v42  ;;  %v5175_v39 = vsub.s32 3, %v5076_v42 }
 0x478   : > { %v815_v45 = vsel %vm499_vm2, %v801_v41, 0.0  ;;  %v4245_v51 = vpop.eup %4244  ;;  %v805_v54 = vmul.f32 %v4243_v47, %v5130_v25 }
 0x479   : > { %816 = vadd.xlane.f32.xlu1 %v815_v45  ;;  %v821_v53 = vsel %vm499_vm2, %v803_v46, 0.0  ;;  %v804_v56 = vmul.f32 %v4245_v51, %v5130_v25  ;;  %v5181_v51 = vsub.s32 4, %v5076_v42 }
 0x47a   : > { %813 = vadd.xlane.f32.xlu0 %v812_v49  ;;  %v827_v57 = vsel %vm499_vm2, %v805_v54, 0.0 }
 0x47b   : > { %v824_v61 = vsel %vm499_vm2, %v804_v56, 0.0 }
 0x47d   : > { %822 = vadd.xlane.f32.xlu1 %v821_v53 }
 0x47e   : > { %819 = vadd.xlane.f32.xlu0 %v818_v55 }
 0x481   : > { %828 = vadd.xlane.f32.xlu1 %v827_v57  ;;  %v5185_v57 = vsub.s32 5, %v5076_v42 }
 0x482   : > { %825 = vadd.xlane.f32.xlu0 %v824_v61 }
 0x502   : > { %v808_v63 = vpop.xlane.xlu1 %807 }
 0x503   : > { %v811_v2 = vpop.xlane.xlu0 %810  ;;  %v843_v11 = vrot.slane %v808_v63, %v5150_v1 }
 0x504   : > { %v847_v3 = vrot.slane %v811_v2, %v5150_v1 }
 0x506   : > { %v817_v6 = vpop.xlane.xlu1 %816  ;;  %v873_v14 = vsel %vm872_vm3, %v847_v3, %v843_v11 }
 0x507   : > { %v814_v12 = vpop.xlane.xlu0 %813  ;;  %v855_v16 = vrot.slane %v817_v6, %v5150_v1 }
 0x508   : > { %v851_v13 = vrot.slane %v814_v12, %v5150_v1 }
 0x50a   : > { %v875_v15 = vsel %vm874_vm4, %v851_v13, %v873_v14  ;;  %v823_v40 = vpop.xlane.xlu1 %822 }
 0x50b   : > { %v820_v17 = vpop.xlane.xlu0 %819  ;;  %v877_v19 = vsel %vm876_vm5, %v855_v16, %v875_v15  ;;  %v863_v24 = vrot.slane %v823_v40, %v5150_v1 }
 0x50c   : > { %v859_v18 = vrot.slane %v820_v17, %v5150_v1 }
 0x50e   : > { %v879_v20 = vsel %vm878_vm6, %v859_v18, %v877_v19  ;;  %v829_v23 = vpop.xlane.xlu1 %828 }
 0x50f   : > { %v826_v26 = vpop.xlane.xlu0 %825  ;;  %v871_v30 = vrot.slane %v829_v23, %v5150_v1  ;;  %v881_v31 = vsel %vm880_vm7, %v863_v24, %v879_v20 }
 0x510   : > { %v867_v28 = vrot.slane %v826_v26, %v5150_v1 }
 0x512   : > { %v883_v32 = vsel %vm882_vm8, %v867_v28, %v881_v31 }
 0x513   : > { %v885_v33 = vsel %vm884_vm9, %v871_v30, %v883_v32 }
 0x514   : > { %v888_v34 = vsel %vm887_vm10, %v885_v33, -inf }
 0x515   : > { %889 = vmax.xlane.f32.xlu0 %v888_v34 }
 0x5a2   : > { %v890_v41 = vpop.xlane.xlu0 %889 }
 0x5a3   : > { %v895_v45 = vrot.slane %v890_v41, %v5088_v48  ;;  %v899_v46 = vrot.slane %v890_v41, %v5169_v37  ;;  %v903_v47 = vrot.slane %v890_v41, %v5172_v38  ;;  %v907_v53 = vrot.slane %v890_v41, %v5175_v39 }
 0x5a4   : > { %v911_v61 = vrot.slane %v890_v41, %v5181_v51 }
 0x5a5   : > { %v933_v49 = vsub.f32 %v811_v2, %v899_v46  ;;  %v932_v50 = vsub.f32 %v808_v63, %v895_v45  ;;  %v934_v54 = vsub.f32 %v814_v12, %v903_v47  ;;  %v935_v3 = vsub.f32 %v817_v6, %v907_v53 }
 0x5a6   : > { %v5189_v2 = vsub.s32 6, %v5076_v42  ;;  %v915_v63 = vrot.slane %v890_v41, %v5185_v57  ;;  %v936_v13 = vsub.f32 %v820_v17, %v911_v61  ;;  %v5193_v12 = vsub.s32 7, %v5076_v42 }
 0x5a7   : > { %v942_v55 = vmul.f32 1.442695, %v933_v49  ;;  %v940_v56 = vmul.f32 1.442695, %v932_v50  ;;  %v944_v62 = vmul.f32 1.442695, %v934_v54 }
 0x5a8   : > { %v946_v11 = vmul.f32 1.442695, %v935_v3  ;;  %v919_v14 = vrot.slane %v890_v41, %v5189_v2  ;;  %v948_v15 = vmul.f32 1.442695, %v936_v13  ;;  %v937_v16 = vsub.f32 %v823_v40, %v915_v63 }
 0x5a9   : > { %4246 = vpow2.f32 %v942_v55  ;;  %v923_v6 = vrot.slane %v890_v41, %v5193_v12 }
 0x5aa   : > { %4248 = vpow2.f32 %v940_v56  ;;  %v950_v20 = vmul.f32 1.442695, %v937_v16  ;;  %v938_v24 = vsub.f32 %v826_v26, %v919_v14 }
 0x5ab   : > { %4250 = vpow2.f32 %v944_v62  ;;  %v939_v42 = vsub.f32 %v829_v23, %v923_v6 }
 0x5ac   : > { %4252 = vpow2.f32 %v946_v11  ;;  %v952_v17 = vmul.f32 1.442695, %v938_v24  ;;  %v3815_v24 = vld [vmem:[%s5853_s6] ss:$0 sm:$0xff] }
 0x5ad   : > { %4254 = vpow2.f32 %v948_v15  ;;  %v954_v31 = vmul.f32 1.442695, %v939_v42 }
 0x5ae   : > { %4256 = vpow2.f32 %v950_v20 }
 0x5af   : > { %4258 = vpow2.f32 %v952_v17 }
 0x5b0   : > { %4260 = vpow2.f32 %v954_v31 }
 0x5b3   : > { %v4247_v18 = vpop.eup %4246 }
 0x5b4   : > { %v4249_v19 = vpop.eup %4248  ;;  %968 = vperm.xlu0 %4223, %v4247_v18  }
 0x5b5   : > { %965 = vperm.xlu1 %4222, %v4249_v19   ;;  %v4251_v28 = vpop.eup %4250 }
 0x5b6   : > { %v4253_v30 = vpop.eup %4252 }
 0x5b7   : > { %v4255_v32 = vpop.eup %4254 }
 0x5b8   : > { %v4257_v40 = vpop.eup %4256 }
 0x5b9   : > { %971 = vperm.xlu1 %4222, %v4251_v28   ;;  %v4259_v33 = vpop.eup %4258 }
 0x5ba   : > { %v4261_v34 = vpop.eup %4260 }
 0x5bd   : > { %974 = vperm.xlu1 %4222, %v4253_v30  }
 0x5c1   : > { %977 = vperm.xlu1 %4222, %v4255_v32  }
 0x5c5   : > { %980 = vperm.xlu1 %4222, %v4257_v40  }
 0x5c9   : > { %983 = vperm.xlu1 %4222, %v4259_v33  }
 0x5cd   : > { %986 = vperm.xlu1 %4222, %v4261_v34  }
 0x633   : > { %v969_v46 = vpop.permute.xlu0 %968 }
 0x634   : > { %v966_v35 = vpop.permute.xlu1 %965  ;;  %v995_v23 = vrot.slane %v969_v46, %v5150_v1 }
 0x635   : > { %v991_v49 = vrot.slane %v966_v35, %v5150_v1 }
 0x637   : > { %v1020_v56 = vsel %vm872_vm3, %v995_v23, %v991_v49 }
 0x638   : > { %v972_v26 = vpop.permute.xlu1 %971 }
 0x639   : > { %v999_v50 = vrot.slane %v972_v26, %v5150_v1 }
 0x63b   : > { %v1021_v62 = vsel %vm874_vm4, %v999_v50, %v1020_v56 }
 0x63c   : > { %v975_v41 = vpop.permute.xlu1 %974 }
 0x63d   : > { %v1003_v53 = vrot.slane %v975_v41, %v5150_v1 }
 0x63f   : > { %v1022_v63 = vsel %vm876_vm5, %v1003_v53, %v1021_v62  ;;  %v471_v62 = vld [vmem:[#allocation12 + $0x10] sm:$0xff] }
 0x640   : > { %v978_v45 = vpop.permute.xlu1 %977 }
 0x641   : > { %v1007_v54 = vrot.slane %v978_v45, %v5150_v1 }
 0x643   : > { %v1023_v11 = vsel %vm878_vm6, %v1007_v54, %v1022_v63 }
 0x644   : > { %v981_v47 = vpop.permute.xlu1 %980 }
 0x645   : > { %v1011_v61 = vrot.slane %v981_v47, %v5150_v1 }
 0x647   : > { %v1024_v15 = vsel %vm880_vm7, %v1011_v61, %v1023_v11  ;;  %v5241_v11 = vld [vmem:[#allocation6] sm:$0xff] }
 0x648   : > { %v984_v55 = vpop.permute.xlu1 %983 }
 0x649   : > { %v1015_v3 = vrot.slane %v984_v55, %v5150_v1 }
 0x64b   : > { %v1025_v16 = vsel %vm882_vm8, %v1015_v3, %v1024_v15 }
 0x64c   : > { %v987_v13 = vpop.permute.xlu1 %986 }
 0x64d   : > { %v1019_v14 = vrot.slane %v987_v13, %v5150_v1  ;;  %v5243_v13 = vld [vmem:[#allocation6 + $0x10] sm:$0xff] }
 0x64f   : > { %v1026_v6 = vsel %vm884_vm9, %v1019_v14, %v1025_v16 }
 0x650   : > { %v1028_v20 = vsel %vm887_vm10, %v1026_v6, 0.0 }
 0x651   : > { %1029 = vadd.xlane.f32.xlu1 %v1028_v20  ;;  %v5248_v20 = vld [vmem:[#allocation6 + $0x18] sm:$0xff] }
 0x662   : > { %682 = vrot.lane.b32.xlu1 %v3815_v24, %s4691_s23 }
 0x6de   : > { %v1030_v17 = vpop.xlane.xlu1 %1029 }
 0x6df   : > { %4262 = vrcp.f32 %v1030_v17 }
 0x6e2   : > { %v5225_v56 = vpop.permute.xlu1 %682 }
 0x6e9   : > { %v4263_v42 = vpop.eup %4262 }
 0x6ea   : > { %v1036_v31 = vrot.slane %v4263_v42, %v5088_v48  ;;  %v1040_v26 = vrot.slane %v4263_v42, %v5169_v37  ;;  %v1044_v45 = vrot.slane %v4263_v42, %v5172_v38  ;;  %v1048_v47 = vrot.slane %v4263_v42, %v5175_v39 }
 0x6eb   : > { %v1052_v49 = vrot.slane %v4263_v42, %v5181_v51  ;;  %v1056_v53 = vrot.slane %v4263_v42, %v5185_v57  ;;  %v1060_v54 = vrot.slane %v4263_v42, %v5189_v2  ;;  %v1064_v55 = vrot.slane %v4263_v42, %v5193_v12 }
 0x6ec   : > { %v1073_v35 = vmul.f32 %v4249_v19, %v1036_v31  ;;  %v1074_v41 = vmul.f32 %v4247_v18, %v1040_v26  ;;  %v1075_v46 = vmul.f32 %v4251_v28, %v1044_v45  ;;  %v1076_v23 = vmul.f32 %v4253_v30, %v1048_v47 }
 0x6ed   : > { %v1077_v50 = vmul.f32 %v4255_v32, %v1052_v49  ;;  %v1078_v19 = vmul.f32 %v4257_v40, %v1056_v53  ;;  %v1079_v18 = vmul.f32 %v4259_v33, %v1060_v54  ;;  %v1080_v28 = vmul.f32 %v4261_v34, %v1064_v55  ;;  %v469_v32 = vld [vmem:[#allocation12] sm:$0xff]  ;;  %v470_v40 = vld [vmem:[#allocation12 + $0x8] sm:$0xff]  ;;  %v472_v33 = vld [vmem:[#allocation12 + $0x18] sm:$0xff] }
 0x6ee   : > { %1083 = vperm.xlu0 %4223, %v1073_v35   ;;  %v685_v30 = vadd.f32 %v5225_v56, %v5081_v44  ;;  %v5231_v61 = vpack.c.bf16 %v470_v40, %v469_v32  ;;  %v5234_v3 = vpack.c.bf16 %v472_v33, %v471_v62  ;;  %v5239_v34 = vld [vmem:[#allocation6 + $0x8] sm:$0xff] }
 0x6f0   : > { %4054 = vmatpush3.bf16.msra.mxu0 %v5231_v61 }
 0x6f1   : > { %4055 = vmatprep.subr.bf16.mxu0 %v5864_v4 }
 0x6f2   : > { %1088 = vperm.xlu0 %4223, %v1074_v41   ;;  %v5254_v41 = vld [vmem:[#allocation6 + $0x20] sm:$0xff] }
 0x6f3   : > { %5897 = vst [vmem:[#allocation20_spill] sm:$0xff] %v5254_v41 }
 0x6f4   : > { %4057 = vmatpush3.bf16.msra.mxu0 %v5234_v3 }
 0x6f5   : > { %4064 = vmatprep.subr.bf16.mxu0 %v5864_v4 }
 0x6f6   : > { %1093 = vperm.xlu0 %4223, %v1075_v46  }
 0x6fa   : > { %1098 = vperm.xlu0 %4223, %v1076_v23  }
 0x6fe   : > { %1103 = vperm.xlu0 %4223, %v1077_v50  }
 0x702   : > { %1108 = vperm.xlu0 %4223, %v1078_v19   ;;  %v5258_v19 = vld [vmem:[#allocation6 + $0x28] sm:$0xff] }
 0x703   : > { %5898 = vst [vmem:[#allocation21_spill] sm:$0xff] %v5258_v19 }
 0x706   : > { %1113 = vperm.xlu0 %4223, %v1079_v18  }
 0x70a   : > { %1118 = vperm.xlu0 %4223, %v1080_v28  }
 0x70e   : > { %1279 = vrot.lane.b32.xlu0 %v685_v30, %s4690_s1 }
 0x712   : > { %1289 = vrot.lane.b32.xlu0 %v685_v30, %s4691_s23 }
 0x76d   : > { %v1084_v44 = vpop.permute.xlu0 %1083 }
 0x76e   : > { %v1121_v16 = vmul.f32 %v1084_v44, %v5241_v11  ;;  %v5262_v44 = vld [vmem:[#allocation6 + $0x30] sm:$0xff] }
 0x76f   : > { %5899 = vst [vmem:[#allocation22_spill] sm:$0xff] %v5262_v44 }
 0x770   : > { %v1129_v31 = vsel %vm499_vm2, %v1121_v16, 0.0 }
 0x771   : > { %v1089_v63 = vpop.permute.xlu0 %1088  ;;  %v1130_v47 = vrot.slane %v1129_v31, 4 }
 0x772   : > { %v1122_v14 = vmul.f32 %v1089_v63, %v5239_v34 }
 0x773   : > { %v1131_v55 = vadd.f32 %v1130_v47, %v1129_v31 }
 0x774   : > { %v1136_v24 = vsel %vm499_vm2, %v1122_v14, 0.0 }
 0x775   : > { %v1094_v15 = vpop.permute.xlu0 %1093  ;;  %v1137_v26 = vrot.slane %v1136_v24, 4 }
 0x776   : > { %v1123_v6 = vmul.f32 %v1094_v15, %v5243_v13  ;;  %v1132_v15 = vrot.slane %v1131_v55, 2 }
 0x777   : > { %v1138_v53 = vadd.f32 %v1137_v26, %v1136_v24  ;;  %v5266_v26 = vld [vmem:[#allocation6 + $0x38] sm:$0xff] }
 0x778   : > { %v1143_v17 = vsel %vm499_vm2, %v1123_v6, 0.0  ;;  %5900 = vst [vmem:[#allocation23_spill] sm:$0xff] %v5266_v26  ;;  %v1133_v47 = vadd.f32 %v1132_v15, %v1131_v55 }
 0x779   : > { %v1099_v42 = vpop.permute.xlu0 %1098  ;;  %v1144_v45 = vrot.slane %v1143_v17, 4  ;;  %v1139_v62 = vrot.slane %v1138_v53, 2 }
 0x77a   : > { %v1124_v35 = vmul.f32 %v1099_v42, %v5248_v20 }
 0x77b   : > { %v1145_v54 = vadd.f32 %v1144_v45, %v1143_v17  ;;  %v1140_v31 = vadd.f32 %v1139_v62, %v1138_v53  ;;  %v1134_v62 = vrot.slane %v1133_v47, 1 }
 0x77c   : > { %v1150_v46 = vsel %vm499_vm2, %v1124_v35, 0.0 }
 0x77d   : > { %v1151_v23 = vrot.slane %v1150_v46, 4  ;;  %v1104_v49 = vpop.permute.xlu0 %1103  ;;  %v1146_v63 = vrot.slane %v1145_v54, 2 }
 0x77e   : > { %v1125_v50 = vmul.f32 %v1104_v49, %v5254_v41 }
 0x77f   : > { %v1152_v28 = vadd.f32 %v1151_v23, %v1150_v46  ;;  %v1147_v45 = vadd.f32 %v1146_v63, %v1145_v54 }
 0x780   : > { %v1157_v18 = vsel %vm499_vm2, %v1125_v50, 0.0 }
 0x781   : > { %v1158_v30 = vrot.slane %v1157_v18, 4  ;;  %v1109_v32 = vpop.permute.xlu0 %1108  ;;  %v1153_v16 = vrot.slane %v1152_v28, 2 }
 0x782   : > { %v1126_v40 = vmul.f32 %v1109_v32, %v5258_v19  ;;  %v1148_v19 = vrot.slane %v1147_v45, 1 }
 0x783   : > { %v1159_v33 = vadd.f32 %v1158_v30, %v1157_v18  ;;  %v1154_v23 = vadd.f32 %v1153_v16, %v1152_v28 }
 0x784   : > { %v1164_v14 = vsel %vm499_vm2, %v1126_v40, 0.0  ;;  %v1141_v40 = vrot.slane %v1140_v31, 1  ;;  %v1149_v16 = vadd.f32 %v1148_v19, %v1147_v45 }
 0x785   : > { %v1165_v6 = vrot.slane %v1164_v14, 4  ;;  %v1114_v24 = vpop.permute.xlu0 %1113  ;;  %v1160_v17 = vrot.slane %v1159_v33, 2 }
 0x786   : > { %v1127_v42 = vmul.f32 %v1114_v24, %v5262_v44  ;;  %v1142_v24 = vadd.f32 %v1141_v40, %v1140_v31 }
 0x787   : > { %v1166_v35 = vadd.f32 %v1165_v6, %v1164_v14  ;;  %v1161_v30 = vadd.f32 %v1160_v17, %v1159_v33  ;;  %v1155_v14 = vrot.slane %v1154_v23, 1 }
 0x788   : > { %v1171_v46 = vsel %vm499_vm2, %v1127_v42, 0.0  ;;  %v1135_v42 = vadd.f32 %v1134_v62, %v1133_v47 }
 0x789   : > { %v1167_v49 = vrot.slane %v1166_v35, 2  ;;  %v1172_v50 = vrot.slane %v1171_v46, 4  ;;  %v1119_v18 = vpop.permute.xlu0 %1118  ;;  %v1162_v63 = vrot.slane %v1161_v30, 1  ;;  %v1156_v33 = vadd.f32 %v1155_v14, %v1154_v23 }
 0x78a   : > { %v1128_v32 = vmul.f32 %v1119_v18, %v5266_v26  ;;  %v5902_v23 = vmov 0.0|0.0  }
 0x78b   : > { %v1168_v4 = vadd.f32 %v1167_v49, %v1166_v35  ;;  %v1173_v7 = vadd.f32 %v1172_v50, %v1171_v46  ;;  %v1163_v26 = vadd.f32 %v1162_v63, %v1161_v30  ;;  %v1199_v35 = vsel %vm872_vm3, %v1142_v24, %v1135_v42 }
 0x78c   : > { %v1178_v53 = vsel %vm499_vm2, %v1128_v32, 0.0  ;;  %v1200_v50 = vsel %vm874_vm4, %v1149_v16, %v1199_v35 }
 0x78d   : > { %v1174_v6 = vrot.slane %v1173_v7, 2  ;;  %v1179_v54 = vrot.slane %v1178_v53, 4  ;;  %v1169_v55 = vrot.slane %v1168_v4, 1  ;;  %v1201_v44 = vsel %vm876_vm5, %v1156_v33, %v1200_v50  ;;  %v1280_v40 = vpop.permute.xlu0 %1279  ;;  %v3820_v50 = vld [vmem:[%s5006_s17 + $0x8] sm:$0xff] }
 0x78e   : > { %v1202_v31 = vsel %vm878_vm6, %v1163_v26, %v1201_v44 }
 0x78f   : > { %v1175_v28 = vadd.f32 %v1174_v6, %v1173_v7  ;;  %v1180_v15 = vadd.f32 %v1179_v54, %v1178_v53  ;;  %v1170_v46 = vadd.f32 %v1169_v55, %v1168_v4  ;;  %v5901_v4 = vmov 0.0  }
 0x791   : > { %v1176_v17 = vrot.slane %v1175_v28, 1  ;;  %v1181_v18 = vrot.slane %v1180_v15, 2  ;;  %v1203_v19 = vsel %vm880_vm7, %v1170_v46, %v1202_v31  ;;  %v1290_v63 = vpop.permute.xlu0 %1289 }
 0x793   : > { %v1182_v49 = vadd.f32 %v1181_v18, %v1180_v15  ;;  %v1177_v32 = vadd.f32 %v1176_v17, %v1175_v28 }
 0x795   : > { %v1183_v41 = vrot.slane %v1182_v49, 1  ;;  %v1204_v45 = vsel %vm882_vm8, %v1177_v32, %v1203_v19 }
 0x797   : > { %v1184_v7 = vadd.f32 %v1183_v41, %v1182_v49  ;;  %v5288_v41 = vld [vmem:[%s5903_s26] ss:$0 sm:$0xff] }
 0x799   : > { %v1205_v47 = vsel %vm884_vm9, %v1184_v7, %v1204_v45 }
 0x79a   : > { %3939 = vmatmul.mubr.msk.f32.vlgmr.msra.gmra.mrb[2].mxu0 %vm499_vm2, %v1205_v47 }
 0x79b   : > { %4066 = vmatpush3.bf16.msra.mxu0 %v5054_v27  ;;  %3960 = vmatprep.mubr.msk.f32.mxu0 %vm4687_vm1, %v5901_v4 }
 0x79c   : > { %4067 = vmatprep.subr.bf16.mxu0 %v5902_v23 }
 0x79f   : > { %4069 = vmatpush3.bf16.msra.mxu0 %v5057_v29 }
 0x7a0   : > { %4076 = vmatprep.subr.bf16.mxu0 %v5902_v23 }
 0x86d   : > { %v1274_v44 = vpop.f32.mrb[2].mxu0 }
 0x86e   : > { %v1275_v26 = vadd.f32 %v5288_v41, %v1274_v44  ;;  %v3940_v30 = vpop.f32.mrb[3].mxu0 }
 0x870   : > { %v1282_v53 = vadd.f32 %v1280_v40, %v1275_v26 }
 0x872   : > { %v3819_v62 = vmul.f32 -1.442695, %v1282_v53 }
 0x874   : > { %4264 = vpow2.f32 %v3819_v62 }
 0x87e   : > { %v4265_v14 = vpop.eup %4264 }
 0x87f   : > { %v1286_v6 = vadd.f32 1.0, %v4265_v14 }
 0x881   : > { %4266 = vrcp.f32 %v1286_v6 }
 0x88b   : > { %v4267_v54 = vpop.eup %4266 }
 0x88c   : > { %v1292_v24 = vmul.f32 %v4267_v54, %v1290_v63  ;;  %v1299_v16 = vsub.f32 1.0, %v4267_v54  ;;  %v1305_v33 = vmul.f32 %v4267_v54, %v5064_v36 }
 0x88e   : > { %1294 = vrot.lane.b32.xlu0 %v1292_v24, %s4689_s27 }
 0x900   : > { %v1295_v55 = vpop.permute.xlu0 %1294 }
 0x901   : > { %v1297_v28 = vadd.f32 %v1295_v55, %v1275_v26 }
 0x903   : > { %4268 = vtanh.f32 %v1297_v28 }
 0x90d   : > { %v4269_v15 = vpop.eup %4268 }
 0x90e   : > { %1301 = vrot.lane.b32.xlu0 %v4269_v15, %s4690_s1 }
 0x980   : > { %v1302_v42 = vpop.permute.xlu0 %1301 }
 0x981   : > { %v1304_v17 = vmul.f32 %v1302_v42, %v1299_v16 }
 0x983   : > { %v1306_v18 = vadd.f32 %v1305_v33, %v1304_v17 }
 0x985   : > { %1308 = vrot.lane.b32.xlu1 %v1306_v18, %s4690_s1 }
 0x9f7   : > { %v1309_v35 = vpop.permute.xlu1 %1308 }
 0x9f8   : > { %1311 = vst.msk [vmem:[%s5024_s20] sm:$0xff] %vm499_vm2, %v1309_v35  ;;  %3950 = vmatmul.mubr.msk.f32.vlgmr.msra.gmra.mrb[2].mxu1 %vm499_vm2, %v1309_v35 }
 0x9f9   : > { %4072 = vmatpush3.bf16.msra.mxu1 %v5231_v61  ;;  %3971 = vmatprep.mubr.msk.f32.mxu1 %vm4687_vm1, %v5901_v4 }
 0x9fa   : > { %4073 = vmatprep.subr.bf16.mxu1 %v5902_v23 }
 0x9fd   : > { %4075 = vmatpush3.bf16.msra.mxu1 %v5234_v3 }
 0x9fe   : > { %4082 = vmatprep.subr.bf16.mxu1 %v5902_v23 }
 0xacb   : > { %v1382_v36 = vpop.f32.mrb[2].mxu1 }
 0xacc   : > { %v1383_v46 = vadd.f32 %v5048_v10, %v1382_v36  ;;  %v3951_v49 = vpop.f32.mrb[3].mxu1 }
 0xace   : > { %1394 = vrot.lane.b32.xlu0 %v1383_v46, %s4689_s27  ;;  %v1386_v32 = vadd.f32 %v3820_v50, %v1383_v46 }
 0xad0   : > { %v3822_v31 = vmul.f32 -1.442695, %v1386_v32 }
 0xad2   : > { %4270 = vpow2.f32 %v3822_v31 }
 0xadc   : > { %v4271_v7 = vpop.eup %4270 }
 0xadd   : > { %v1390_v19 = vadd.f32 1.0, %v4271_v7 }
 0xadf   : > { %4272 = vrcp.f32 %v1390_v19 }
 0xae9   : > { %v4273_v45 = vpop.eup %4272 }
 0xaea   : > { %v1404_v10 = vsub.f32 1.0, %v4273_v45  ;;  %v1410_v62 = vmul.f32 %v4273_v45, %v1306_v18 }
 0xb40   : > { %v1395_v47 = vpop.permute.xlu0 %1394 }
 0xb41   : > { %v1397_v44 = vmul.f32 %v4273_v45, %v1395_v47 }
 0xb43   : > { %1399 = vrot.lane.b32.xlu1 %v1397_v44, %s4689_s27 }
 0xbb5   : > { %v1400_v26 = vpop.permute.xlu1 %1399 }
 0xbb6   : > { %v1402_v30 = vadd.f32 %v3820_v50, %v1400_v26 }
 0xbb8   : > { %4274 = vtanh.f32 %v1402_v30 }
 0xbc2   : > { %v4275_v40 = vpop.eup %4274 }
 0xbc3   : > { %1406 = vrot.lane.b32.xlu0 %v4275_v40, %s4690_s1 }
 0xc35   : > { %v1407_v53 = vpop.permute.xlu0 %1406 }
 0xc36   : > { %v1409_v14 = vmul.f32 %v1407_v53, %v1404_v10 }
 0xc38   : > { %v5309_v6 = vadd.f32 %v1410_v62, %v1409_v14 }
 0xc3a   : > { %1413 = vrot.lane.b32.xlu1 %v5309_v6, %s4690_s1 }
 0xcac   : > { %v1414_v54 = vpop.permute.xlu1 %1413 }
 0xcad   : > { %3961 = vmatmul.mubr.msk.f32.vlgmr.msra.gmra.mrb[4].mxu0 %vm499_vm2, %v1414_v54 }
 0xcae   : > { %4078 = vmatpush3.bf16.msra.mxu0 %v5029_v5  ;;  %3982 = vmatprep.mubr.msk.f32.mxu0 %vm4687_vm1, %v5901_v4 }
 0xcaf   : > { %4079 = vmatprep.subr.bf16.mxu0 %v5902_v23 }
 0xcb2   : > { %4081 = vmatpush3.bf16.msra.mxu0 %v5037_v8 }
 0xcb3   : > { %4088 = vmatprep.subr.bf16.mxu0 %v5902_v23 }
 0xd80   : > { %v5320_v63 = vpop.f32.mrb[4].mxu0 }
 0xd81   : > { %v1489_v24 = vcombine.high %v5320_v63, %v5320_v63  ;;  %v1496_v55 = vrot.slane %v5320_v63, %v5079_v43  ;;  %v3962_v28 = vpop.f32.mrb[5].mxu0 }
 0xd83   : > { %v1503_v15 = vrot.slane %v1489_v24, %v5079_v43  ;;  %v1504_v16 = vcombine.high %v1496_v55, %v1496_v55  ;;  %v1512_v42 = vrot.slane %v1496_v55, %v5079_v43 }
 0xd85   : > { %v1505_v33 = vcombine.high %v1503_v15, %v1503_v15  ;;  %v1519_v17 = vrot.slane %v1503_v15, %v5079_v43  ;;  %v1526_v18 = vrot.slane %v1504_v16, %v5079_v43  ;;  %v1534_v35 = vcombine.high %v1512_v42, %v1512_v42 }
 0xd86   : > { %v1541_v36 = vrot.slane %v1512_v42, %v5088_v48 }
 0xd87   : > { %v1533_v46 = vrot.slane %v1505_v33, %v5079_v43  ;;  %v1536_v49 = vcombine.high %v1526_v18, %v1526_v18  ;;  %v1545_v50 = vrot.slane %v1526_v18, %v5088_v48  ;;  %v1549_v32 = vrot.slane %v1534_v35, %v5088_v48 }
 0xd88   : > { %v1557_v31 = vrot.slane %v1519_v17, %v5088_v48  ;;  %v1578_v7 = vadd.f32 %v1541_v36, %v5092_v52  ;;  %v1535_v19 = vcombine.high %v1519_v17, %v1519_v17 }
 0xd89   : > { %v1537_v45 = vcombine.high %v1533_v46, %v1533_v46  ;;  %v1553_v47 = vrot.slane %v1536_v49, %v5088_v48  ;;  %v1561_v44 = vrot.slane %v1533_v46, %v5088_v48  ;;  %v1579_v26 = vadd.f32 %v1545_v50, %v5097_v58 }
 0xd8a   : > { %v1580_v30 = vadd.f32 %v1549_v32, %v5099_v59  ;;  %v1582_v40 = vadd.f32 %v1557_v31, %v5101_v60  ;;  %4276 = vtanh.f32 %v1578_v7  ;;  %v1565_v62 = vrot.slane %v1535_v19, %v5088_v48 }
 0xd8b   : > { %v1569_v10 = vrot.slane %v1537_v45, %v5088_v48  ;;  %v1583_v53 = vadd.f32 %v1561_v44, %v5110_v9  ;;  %4278 = vtanh.f32 %v1579_v26  ;;  %v1581_v14 = vadd.f32 %v1553_v47, %v5105_v0 }
 0xd8c   : > { %4280 = vtanh.f32 %v1580_v30  ;;  %v1584_v58 = vadd.f32 %v1565_v62, %v5123_v22 }
 0xd8d   : > { %v1585_v52 = vadd.f32 %v1569_v10, %v5121_v21  ;;  %4282 = vtanh.f32 %v1582_v40 }
 0xd8e   : > { %4284 = vtanh.f32 %v1583_v53 }
 0xd8f   : > { %4286 = vtanh.f32 %v1585_v52 }
 0xd90   : > { %4288 = vtanh.f32 %v1581_v14 }
 0xd91   : > { %4290 = vtanh.f32 %v1584_v58 }
 0xd94   : > { %v4277_v59 = vpop.eup %4276 }
 0xd95   : > { %v1594_v60 = vmul.f32 %v4277_v59, %v5130_v25  ;;  %v4279_v54 = vpop.eup %4278 }
 0xd96   : > { %v4281_v9 = vpop.eup %4280  ;;  %v1595_v21 = vmul.f32 %v4279_v54, %v5130_v25 }
 0xd97   : > { %v1602_v24 = vsel %vm499_vm2, %v1594_v60, 0.0  ;;  %v4283_v55 = vpop.eup %4282  ;;  %v1596_v0 = vmul.f32 %v4281_v9, %v5130_v25 }
 0xd98   : > { %1603 = vadd.xlane.f32.xlu0 %v1602_v24  ;;  %v4285_v28 = vpop.eup %4284  ;;  %v1605_v15 = vsel %vm499_vm2, %v1595_v21, 0.0  ;;  %v1598_v33 = vmul.f32 %v4283_v55, %v5130_v25 }
 0xd99   : > { %v4287_v16 = vpop.eup %4286  ;;  %1606 = vadd.xlane.f32.xlu1 %v1605_v15  ;;  %v1599_v22 = vmul.f32 %v4285_v28, %v5130_v25  ;;  %v1608_v42 = vsel %vm499_vm2, %v1596_v0, 0.0 }
 0xd9a   : > { %v4289_v17 = vpop.eup %4288  ;;  %v1601_v35 = vmul.f32 %v4287_v16, %v5130_v25  ;;  %v1614_v36 = vsel %vm499_vm2, %v1598_v33, 0.0 }
 0xd9b   : > { %v1617_v18 = vsel %vm499_vm2, %v1599_v22, 0.0  ;;  %v1597_v46 = vmul.f32 %v4289_v17, %v5130_v25  ;;  %v4291_v49 = vpop.eup %4290 }
 0xd9c   : > { %1609 = vadd.xlane.f32.xlu0 %v1608_v42  ;;  %v1623_v50 = vsel %vm499_vm2, %v1601_v35, 0.0  ;;  %v1600_v31 = vmul.f32 %v4291_v49, %v5130_v25 }
 0xd9d   : > { %1618 = vadd.xlane.f32.xlu1 %v1617_v18  ;;  %v1611_v32 = vsel %vm499_vm2, %v1597_v46, 0.0 }
 0xd9e   : > { %v1620_v7 = vsel %vm499_vm2, %v1600_v31, 0.0 }
 0xda0   : > { %1615 = vadd.xlane.f32.xlu0 %v1614_v36 }
 0xda1   : > { %1624 = vadd.xlane.f32.xlu1 %v1623_v50 }
 0xda4   : > { %1612 = vadd.xlane.f32.xlu0 %v1611_v32 }
 0xda8   : > { %1621 = vadd.xlane.f32.xlu0 %v1620_v7 }
 0xe25   : > { %v1604_v19 = vpop.xlane.xlu0 %1603 }
 0xe26   : > { %v1607_v45 = vpop.xlane.xlu1 %1606  ;;  %v1637_v30 = vrot.slane %v1604_v19, %v5150_v1 }
 0xe27   : > { %v1641_v44 = vrot.slane %v1607_v45, %v5150_v1 }
 0xe29   : > { %v1610_v47 = vpop.xlane.xlu0 %1609  ;;  %v1666_v53 = vsel %vm872_vm3, %v1641_v44, %v1637_v30 }
 0xe2a   : > { %v1619_v40 = vpop.xlane.xlu1 %1618  ;;  %v1645_v10 = vrot.slane %v1610_v47, %v5150_v1 }
 0xe2b   : > { %v1657_v58 = vrot.slane %v1619_v40, %v5150_v1 }
 0xe2c   : > { %v1667_v62 = vsel %vm874_vm4, %v1645_v10, %v1666_v53 }
 0xe2d   : > { %v1616_v26 = vpop.xlane.xlu0 %1615 }
 0xe2e   : > { %v1653_v14 = vrot.slane %v1616_v26, %v5150_v1  ;;  %v1625_v59 = vpop.xlane.xlu1 %1624 }
 0xe2f   : > { %v1665_v55 = vrot.slane %v1625_v59, %v5150_v1 }
 0xe31   : > { %v1613_v52 = vpop.xlane.xlu0 %1612 }
 0xe32   : > { %v1649_v25 = vrot.slane %v1613_v52, %v5150_v1 }
 0xe34   : > { %v1668_v60 = vsel %vm876_vm5, %v1649_v25, %v1667_v62 }
 0xe35   : > { %v1622_v54 = vpop.xlane.xlu0 %1621  ;;  %v1669_v9 = vsel %vm878_vm6, %v1653_v14, %v1668_v60 }
 0xe36   : > { %v1661_v24 = vrot.slane %v1622_v54, %v5150_v1  ;;  %v1670_v21 = vsel %vm880_vm7, %v1657_v58, %v1669_v9 }
 0xe38   : > { %v1671_v0 = vsel %vm882_vm8, %v1661_v24, %v1670_v21 }
 0xe39   : > { %v1672_v28 = vsel %vm884_vm9, %v1665_v55, %v1671_v0 }
 0xe3a   : > { %v1674_v15 = vsel %vm887_vm10, %v1672_v28, -inf }
 0xe3b   : > { %1675 = vmax.xlane.f32.xlu0 %v1674_v15 }
 0xec8   : > { %v1676_v16 = vpop.xlane.xlu0 %1675 }
 0xec9   : > { %v1681_v22 = vrot.slane %v1676_v16, %v5088_v48  ;;  %v1685_v42 = vrot.slane %v1676_v16, %v5169_v37  ;;  %v1689_v33 = vrot.slane %v1676_v16, %v5172_v38  ;;  %v1701_v17 = vrot.slane %v1676_v16, %v5185_v57 }
 0xeca   : > { %v1709_v18 = vrot.slane %v1676_v16, %v5193_v12  ;;  %v1693_v46 = vrot.slane %v1676_v16, %v5175_v39  ;;  %v1697_v30 = vrot.slane %v1676_v16, %v5181_v51  ;;  %v1705_v62 = vrot.slane %v1676_v16, %v5189_v2 }
 0xecb   : > { %v1719_v35 = vsub.f32 %v1607_v45, %v1685_v42  ;;  %v1718_v36 = vsub.f32 %v1604_v19, %v1681_v22  ;;  %v1723_v49 = vsub.f32 %v1619_v40, %v1701_v17  ;;  %v1720_v50 = vsub.f32 %v1610_v47, %v1689_v33 }
 0xecc   : > { %v1725_v44 = vsub.f32 %v1625_v59, %v1709_v18  ;;  %v1721_v53 = vsub.f32 %v1613_v52, %v1693_v46  ;;  %v1722_v45 = vsub.f32 %v1616_v26, %v1697_v30  ;;  %v1724_v40 = vsub.f32 %v1622_v54, %v1705_v62 }
 0xecd   : > { %v1728_v32 = vmul.f32 1.442695, %v1719_v35  ;;  %v1726_v31 = vmul.f32 1.442695, %v1718_v36  ;;  %v1736_v7 = vmul.f32 1.442695, %v1723_v49  ;;  %v1487_v62 = vadd.f32 %v5320_v63, %v5225_v56 }
 0xece   : > { %v1730_v10 = vmul.f32 1.442695, %v1720_v50  ;;  %v1740_v25 = vmul.f32 1.442695, %v1725_v44  ;;  %v1732_v19 = vmul.f32 1.442695, %v1721_v53 }
 0xecf   : > { %4292 = vpow2.f32 %v1728_v32  ;;  %v1734_v47 = vmul.f32 1.442695, %v1722_v45  ;;  %v1738_v59 = vmul.f32 1.442695, %v1724_v40 }
 0xed0   : > { %4294 = vpow2.f32 %v1726_v31 }
 0xed1   : > { %4296 = vpow2.f32 %v1736_v7 }
 0xed2   : > { %4298 = vpow2.f32 %v1730_v10 }
 0xed3   : > { %4300 = vpow2.f32 %v1740_v25 }
 0xed4   : > { %4302 = vpow2.f32 %v1732_v19 }
 0xed5   : > { %4304 = vpow2.f32 %v1734_v47 }
 0xed6   : > { %4306 = vpow2.f32 %v1738_v59 }
 0xed9   : > { %v4293_v14 = vpop.eup %4292 }
 0xeda   : > { %v4295_v58 = vpop.eup %4294  ;;  %1754 = vperm.xlu0 %4223, %v4293_v14  }
 0xedb   : > { %1751 = vperm.xlu1 %4222, %v4295_v58   ;;  %v4297_v60 = vpop.eup %4296 }
 0xedc   : > { %v4299_v9 = vpop.eup %4298 }
 0xedd   : > { %v4301_v52 = vpop.eup %4300 }
 0xede   : > { %1766 = vperm.xlu0 %4223, %v4297_v60   ;;  %v4303_v24 = vpop.eup %4302 }
 0xedf   : > { %1757 = vperm.xlu1 %4222, %v4299_v9   ;;  %v4305_v26 = vpop.eup %4304 }
 0xee0   : > { %v4307_v21 = vpop.eup %4306 }
 0xee2   : > { %1772 = vperm.xlu0 %4223, %v4301_v52  }
 0xee3   : > { %1760 = vperm.xlu1 %4222, %v4303_v24  }
 0xee7   : > { %1763 = vperm.xlu1 %4222, %v4305_v26  }
 0xeeb   : > { %1769 = vperm.xlu1 %4222, %v4307_v21  }
 0xf59   : > { %v1755_v55 = vpop.permute.xlu0 %1754 }
 0xf5a   : > { %v1752_v54 = vpop.permute.xlu1 %1751  ;;  %v1781_v28 = vrot.slane %v1755_v55, %v5150_v1 }
 0xf5b   : > { %v1777_v15 = vrot.slane %v1752_v54, %v5150_v1 }
 0xf5d   : > { %v1767_v22 = vpop.permute.xlu0 %1766  ;;  %v1806_v17 = vsel %vm872_vm3, %v1781_v28, %v1777_v15 }
 0xf5e   : > { %v1758_v0 = vpop.permute.xlu1 %1757  ;;  %v1797_v32 = vrot.slane %v1767_v22, %v5150_v1 }
 0xf5f   : > { %v1785_v42 = vrot.slane %v1758_v0, %v5150_v1 }
 0xf61   : > { %v1807_v35 = vsel %vm874_vm4, %v1785_v42, %v1806_v17  ;;  %v1773_v49 = vpop.permute.xlu0 %1772 }
 0xf62   : > { %v1761_v16 = vpop.permute.xlu1 %1760  ;;  %v1805_v44 = vrot.slane %v1773_v49, %v5150_v1 }
 0xf63   : > { %v1789_v33 = vrot.slane %v1761_v16, %v5150_v1 }
 0xf65   : > { %v1808_v46 = vsel %vm876_vm5, %v1789_v33, %v1807_v35 }
 0xf66   : > { %v1764_v18 = vpop.permute.xlu1 %1763 }
 0xf67   : > { %v1793_v36 = vrot.slane %v1764_v18, %v5150_v1 }
 0xf69   : > { %v1809_v50 = vsel %vm878_vm6, %v1793_v36, %v1808_v46 }
 0xf6a   : > { %v1770_v31 = vpop.permute.xlu1 %1769  ;;  %v1810_v30 = vsel %vm880_vm7, %v1797_v32, %v1809_v50 }
 0xf6b   : > { %v1801_v7 = vrot.slane %v1770_v31, %v5150_v1 }
 0xf6d   : > { %v1811_v10 = vsel %vm882_vm8, %v1801_v7, %v1810_v30  ;;  %v5904_v30 = vld [vmem:[#allocation20_spill] sm:$0xff] }
 0xf6e   : > { %v1812_v53 = vsel %vm884_vm9, %v1805_v44, %v1811_v10 }
 0xf6f   : > { %v1814_v25 = vsel %vm887_vm10, %v1812_v53, 0.0 }
 0xf70   : > { %1815 = vadd.xlane.f32.xlu1 %v1814_v25 }
 0xf81   : > { %2069 = vrot.lane.b32.xlu1 %v1487_v62, %s4691_s23 }
 0xffd   : > { %v1816_v19 = vpop.xlane.xlu1 %1815 }
 0xffe   : > { %4308 = vrcp.f32 %v1816_v19 }
0x1008   : > { %v4309_v45 = vpop.eup %4308 }
0x1009   : > { %v1822_v47 = vrot.slane %v4309_v45, %v5088_v48  ;;  %v1826_v59 = vrot.slane %v4309_v45, %v5169_v37  ;;  %v1830_v55 = vrot.slane %v4309_v45, %v5172_v38  ;;  %v1834_v28 = vrot.slane %v4309_v45, %v5175_v39 }
0x100a   : > { %v1838_v15 = vrot.slane %v4309_v45, %v5181_v51  ;;  %v1842_v22 = vrot.slane %v4309_v45, %v5185_v57  ;;  %v1846_v42 = vrot.slane %v4309_v45, %v5189_v2  ;;  %v1850_v33 = vrot.slane %v4309_v45, %v5193_v12 }
0x100b   : > { %v1859_v40 = vmul.f32 %v4295_v58, %v1822_v47  ;;  %v1860_v54 = vmul.f32 %v4293_v14, %v1826_v59  ;;  %v1861_v0 = vmul.f32 %v4299_v9, %v1830_v55  ;;  %v1862_v63 = vmul.f32 %v4303_v24, %v1834_v28  ;;  %v5905_v47 = vld [vmem:[#allocation21_spill] sm:$0xff] }
0x100c   : > { %v1863_v16 = vmul.f32 %v4305_v26, %v1838_v15  ;;  %v1864_v58 = vmul.f32 %v4297_v60, %v1842_v22  ;;  %v1865_v14 = vmul.f32 %v4307_v21, %v1846_v42  ;;  %v1866_v9 = vmul.f32 %v4301_v52, %v1850_v33  ;;  %v5906_v22 = vld [vmem:[#allocation22_spill] sm:$0xff] }
0x100d   : > { %1869 = vperm.xlu0 %4223, %v1859_v40  }
0x1011   : > { %1874 = vperm.xlu0 %4223, %v1860_v54  }
0x1015   : > { %1879 = vperm.xlu0 %4223, %v1861_v0  }
0x1019   : > { %1884 = vperm.xlu0 %4223, %v1862_v63  }
0x101d   : > { %1889 = vperm.xlu0 %4223, %v1863_v16  }
0x1021   : > { %1894 = vperm.xlu0 %4223, %v1864_v58  }
0x1025   : > { %1899 = vperm.xlu0 %4223, %v1865_v14  }
0x1029   : > { %1904 = vperm.xlu0 %4223, %v1866_v9  }
0x102d   : > { %2059 = vrot.lane.b32.xlu0 %v1487_v62, %s4690_s1 }
0x108c   : > { %v1870_v24 = vpop.permute.xlu0 %1869 }
0x108d   : > { %v1907_v35 = vmul.f32 %v1870_v24, %v5241_v11 }
0x108f   : > { %v1915_v49 = vsel %vm499_vm2, %v1907_v35, 0.0 }
0x1090   : > { %v1875_v17 = vpop.permute.xlu0 %1874  ;;  %v1916_v7 = vrot.slane %v1915_v49, 4 }
0x1091   : > { %v1908_v18 = vmul.f32 %v1875_v17, %v5239_v34 }
0x1092   : > { %v1917_v25 = vadd.f32 %v1916_v7, %v1915_v49 }
0x1093   : > { %v1922_v36 = vsel %vm499_vm2, %v1908_v18, 0.0 }
0x1094   : > { %v1880_v26 = vpop.permute.xlu0 %1879  ;;  %v1923_v50 = vrot.slane %v1922_v36, 4  ;;  %v1918_v0 = vrot.slane %v1917_v25, 2 }
0x1095   : > { %v1909_v60 = vmul.f32 %v1880_v26, %v5243_v13 }
0x1096   : > { %v1924_v10 = vadd.f32 %v1923_v50, %v1922_v36  ;;  %v1919_v24 = vadd.f32 %v1918_v0, %v1917_v25  ;;  %v5907_v36 = vld [vmem:[#allocation23_spill] sm:$0xff] }
0x1097   : > { %v1929_v21 = vsel %vm499_vm2, %v1909_v60, 0.0 }
0x1098   : > { %v1885_v46 = vpop.permute.xlu0 %1884  ;;  %v1930_v32 = vrot.slane %v1929_v21, 4 }
0x1099   : > { %v1910_v52 = vmul.f32 %v1885_v46, %v5248_v20  ;;  %v1925_v20 = vrot.slane %v1924_v10, 2 }
0x109a   : > { %v1931_v13 = vadd.f32 %v1930_v32, %v1929_v21 }
0x109b   : > { %v1936_v31 = vsel %vm499_vm2, %v1910_v52, 0.0  ;;  %v1926_v42 = vadd.f32 %v1925_v20, %v1924_v10 }
0x109c   : > { %v1937_v34 = vrot.slane %v1936_v31, 4  ;;  %v1890_v44 = vpop.permute.xlu0 %1889  ;;  %v1932_v54 = vrot.slane %v1931_v13, 2 }
0x109d   : > { %v1911_v11 = vmul.f32 %v1890_v44, %v5904_v30  ;;  %v1927_v46 = vrot.slane %v1926_v42, 1 }
0x109e   : > { %v1938_v62 = vadd.f32 %v1937_v34, %v1936_v31  ;;  %v1933_v33 = vadd.f32 %v1932_v54, %v1931_v13  ;;  %v1920_v31 = vrot.slane %v1919_v24, 1 }
0x109f   : > { %v1943_v53 = vsel %vm499_vm2, %v1911_v11, 0.0  ;;  %v1928_v11 = vadd.f32 %v1927_v46, %v1926_v42 }
0x10a0   : > { %v1944_v19 = vrot.slane %v1943_v53, 4  ;;  %v1895_v45 = vpop.permute.xlu0 %1894  ;;  %v1939_v28 = vrot.slane %v1938_v62, 2  ;;  %v1934_v50 = vrot.slane %v1933_v33, 1 }
0x10a1   : > { %v1912_v40 = vmul.f32 %v1895_v45, %v5905_v47 }
0x10a2   : > { %v1945_v59 = vadd.f32 %v1944_v19, %v1943_v53  ;;  %v1940_v17 = vadd.f32 %v1939_v28, %v1938_v62  ;;  %v1935_v25 = vadd.f32 %v1934_v50, %v1933_v33  ;;  %v1921_v62 = vadd.f32 %v1920_v31, %v1919_v24 }
0x10a3   : > { %v1950_v55 = vsel %vm499_vm2, %v1912_v40, 0.0 }
0x10a4   : > { %v1951_v63 = vrot.slane %v1950_v55, 4  ;;  %v1900_v15 = vpop.permute.xlu0 %1899  ;;  %v1946_v16 = vrot.slane %v1945_v59, 2  ;;  %v1941_v7 = vrot.slane %v1940_v17, 1  ;;  %v1979_v20 = vsel %vm872_vm3, %v1928_v11, %v1921_v62 }
0x10a5   : > { %v1913_v58 = vmul.f32 %v1900_v15, %v5906_v22 }
0x10a6   : > { %v1952_v14 = vadd.f32 %v1951_v63, %v1950_v55  ;;  %v1947_v60 = vadd.f32 %v1946_v16, %v1945_v59  ;;  %v1942_v19 = vadd.f32 %v1941_v7, %v1940_v17  ;;  %v1980_v55 = vsel %vm874_vm4, %v1935_v25, %v1979_v20 }
0x10a7   : > { %v1957_v9 = vsel %vm499_vm2, %v1913_v58, 0.0 }
0x10a8   : > { %v1953_v18 = vrot.slane %v1952_v14, 2  ;;  %v1958_v26 = vrot.slane %v1957_v9, 4  ;;  %v1905_v35 = vpop.permute.xlu0 %1904  ;;  %v1948_v30 = vrot.slane %v1947_v60, 1  ;;  %v1981_v28 = vsel %vm876_vm5, %v1942_v19, %v1980_v55 }
0x10a9   : > { %v1914_v21 = vmul.f32 %v1905_v35, %v5907_v36  ;;  %v2070_v36 = vpop.permute.xlu1 %2069 }
0x10aa   : > { %v1954_v49 = vadd.f32 %v1953_v18, %v1952_v14  ;;  %v1959_v52 = vadd.f32 %v1958_v26, %v1957_v9  ;;  %v1949_v40 = vadd.f32 %v1948_v30, %v1947_v60 }
0x10ab   : > { %v1964_v32 = vsel %vm499_vm2, %v1914_v21, 0.0 }
0x10ac   : > { %v1960_v34 = vrot.slane %v1959_v52, 2  ;;  %v1965_v44 = vrot.slane %v1964_v32, 4  ;;  %v1955_v10 = vrot.slane %v1954_v49, 1  ;;  %v1982_v15 = vsel %vm878_vm6, %v1949_v40, %v1981_v28  ;;  %v2060_v24 = vpop.permute.xlu0 %2059 }
0x10ae   : > { %v1961_v13 = vadd.f32 %v1960_v34, %v1959_v52  ;;  %v1966_v53 = vadd.f32 %v1965_v44, %v1964_v32  ;;  %v1956_v59 = vadd.f32 %v1955_v10, %v1954_v49  ;;  %v5462_v44 = vld [vmem:[%s5851_s4] ss:$0 sm:$0xff]  ;;  %v3827_v10 = vld [vmem:[%s5006_s17 + $0x10] sm:$0xff] }
0x10b0   : > { %v1962_v45 = vrot.slane %v1961_v13, 1  ;;  %v1967_v47 = vrot.slane %v1966_v53, 2  ;;  %v1983_v22 = vsel %vm880_vm7, %v1956_v59, %v1982_v15 }
0x10b2   : > { %v1968_v54 = vadd.f32 %v1967_v47, %v1966_v53  ;;  %v1963_v0 = vadd.f32 %v1962_v45, %v1961_v13 }
0x10b4   : > { %v1969_v63 = vrot.slane %v1968_v54, 1  ;;  %v1984_v58 = vsel %vm882_vm8, %v1963_v0, %v1983_v22 }
0x10b6   : > { %v1970_v16 = vadd.f32 %v1969_v63, %v1968_v54 }
0x10b8   : > { %v1985_v42 = vsel %vm884_vm9, %v1970_v16, %v1984_v58 }
0x10b9   : > { %3972 = vmatmul.mubr.msk.f32.vlgmr.msra.gmra.mrb[4].mxu1 %vm499_vm2, %v1985_v42 }
0x10ba   : > { %4084 = vmatpush3.bf16.msra.mxu1 %v5054_v27  ;;  %3993 = vmatprep.mubr.msk.f32.mxu1 %vm4687_vm1, %v5901_v4 }
0x10bb   : > { %4085 = vmatprep.subr.bf16.mxu1 %v5902_v23 }
0x10be   : > { %4087 = vmatpush3.bf16.msra.mxu1 %v5057_v29 }
0x10bf   : > { %4094 = vmatprep.subr.bf16.mxu1 %v5902_v23 }
0x118c   : > { %v2054_v14 = vpop.f32.mrb[4].mxu1 }
0x118d   : > { %v2055_v33 = vadd.f32 %v5288_v41, %v2054_v14  ;;  %v3973_v9 = vpop.f32.mrb[5].mxu1 }
0x118f   : > { %v2062_v17 = vadd.f32 %v2060_v24, %v2055_v33 }
0x1191   : > { %v3825_v18 = vmul.f32 -1.442695, %v2062_v17 }
0x1193   : > { %4310 = vpow2.f32 %v3825_v18 }
0x119d   : > { %v4311_v26 = vpop.eup %4310 }
0x119e   : > { %v2066_v35 = vadd.f32 1.0, %v4311_v26 }
0x11a0   : > { %4312 = vrcp.f32 %v2066_v35 }
0x11aa   : > { %v4313_v60 = vpop.eup %4312 }
0x11ab   : > { %v2072_v21 = vmul.f32 %v4313_v60, %v2070_v36  ;;  %v2079_v41 = vsub.f32 1.0, %v4313_v60  ;;  %v2085_v32 = vmul.f32 %v4313_v60, %v5309_v6 }
0x11ad   : > { %2074 = vrot.lane.b32.xlu0 %v2072_v21, %s4689_s27 }
0x121f   : > { %v2075_v46 = vpop.permute.xlu0 %2074 }
0x1220   : > { %v2077_v49 = vadd.f32 %v2075_v46, %v2055_v33 }
0x1222   : > { %4314 = vtanh.f32 %v2077_v49  ;;  %v5495_v49 = vld [vmem:[#allocation8] sm:$0xff] }
0x122c   : > { %v4315_v52 = vpop.eup %4314 }
0x122d   : > { %2081 = vrot.lane.b32.xlu0 %v4315_v52, %s4690_s1 }
0x129f   : > { %v2082_v50 = vpop.permute.xlu0 %2081 }
0x12a0   : > { %v2084_v31 = vmul.f32 %v2082_v50, %v2079_v41 }
0x12a2   : > { %v2086_v7 = vadd.f32 %v2085_v32, %v2084_v31  ;;  %v5500_v31 = vld [vmem:[#allocation8 + $0x8] sm:$0xff] }
0x12a4   : > { %2088 = vrot.lane.b32.xlu0 %v2086_v7, %s4690_s1 }
0x1316   : > { %v2089_v34 = vpop.permute.xlu0 %2088 }
0x1317   : > { %3826 = vst.msk [vmem:[%s5024_s20 + $0x8] sm:$0xff] %vm499_vm2, %v2089_v34  ;;  %3983 = vmatmul.mubr.msk.f32.vlgmr.msra.gmra.mrb[6].mxu0 %vm499_vm2, %v2089_v34  ;;  %v5503_v34 = vld [vmem:[#allocation8 + $0x10] sm:$0xff] }
0x1318   : > { %4090 = vmatpush3.bf16.msra.mxu0 %v5231_v61  ;;  %4004 = vmatprep.mubr.msk.f32.mxu0 %vm4687_vm1, %v5901_v4 }
0x1319   : > { %4091 = vmatprep.subr.bf16.mxu0 %v5902_v23 }
0x131c   : > { %4093 = vmatpush3.bf16.msra.mxu0 %v5234_v3 }
0x131d   : > { %4100 = vmatprep.subr.bf16.mxu0 %v5902_v23 }
0x13ea   : > { %v2163_v6 = vpop.f32.mrb[6].mxu0 }
0x13eb   : > { %v2164_v30 = vadd.f32 %v5462_v44, %v2163_v6  ;;  %v3984_v11 = vpop.f32.mrb[7].mxu0 }
0x13ec   : > { %v5507_v11 = vld [vmem:[#allocation8 + $0x20] sm:$0xff] }
0x13ed   : > { %2175 = vrot.lane.b32.xlu0 %v2164_v30, %s4689_s27  ;;  %v2167_v13 = vadd.f32 %v3827_v10, %v2164_v30 }
0x13ef   : > { %v3829_v53 = vmul.f32 -1.442695, %v2167_v13 }
0x13f1   : > { %4316 = vpow2.f32 %v3829_v53  ;;  %v5511_v53 = vld [vmem:[#allocation8 + $0x18] sm:$0xff] }
0x13fb   : > { %v4317_v25 = vpop.eup %4316 }
0x13fc   : > { %v2171_v62 = vadd.f32 1.0, %v4317_v25 }
0x13fe   : > { %4318 = vrcp.f32 %v2171_v62  ;;  %v5514_v62 = vld [vmem:[#allocation8 + $0x28] sm:$0xff] }
0x1408   : > { %v4319_v19 = vpop.eup %4318 }
0x1409   : > { %v2185_v54 = vsub.f32 1.0, %v4319_v19  ;;  %v2191_v0 = vmul.f32 %v4319_v19, %v2086_v7 }
0x145f   : > { %v2176_v45 = vpop.permute.xlu0 %2175 }
0x1460   : > { %v2178_v47 = vmul.f32 %v4319_v19, %v2176_v45  ;;  %v5517_v45 = vld [vmem:[#allocation8 + $0x30] sm:$0xff] }
0x1462   : > { %2180 = vrot.lane.b32.xlu0 %v2178_v47, %s4689_s27 }
0x14d4   : > { %v2181_v40 = vpop.permute.xlu0 %2180 }
0x14d5   : > { %v2183_v20 = vadd.f32 %v3827_v10, %v2181_v40  ;;  %v5520_v40 = vld [vmem:[#allocation8 + $0x38] sm:$0xff] }
0x14d7   : > { %4320 = vtanh.f32 %v2183_v20 }
0x14e1   : > { %v4321_v59 = vpop.eup %4320 }
0x14e2   : > { %2187 = vrot.lane.b32.xlu1 %v4321_v59, %s4690_s1 }
0x1554   : > { %v2188_v55 = vpop.permute.xlu1 %2187 }
0x1555   : > { %v2190_v28 = vmul.f32 %v2188_v55, %v2185_v54  ;;  %v5526_v54 = vld [vmem:[%s5856_s9] ss:$0 sm:$0xff] }
0x1557   : > { %v5469_v63 = vadd.f32 %v2191_v0, %v2190_v28 }
0x1559   : > { %2194 = vrot.lane.b32.xlu0 %v5469_v63, %s4690_s1 }
0x15cb   : > { %v2195_v15 = vpop.permute.xlu0 %2194 }
0x15cc   : > { %3994 = vmatmul.mubr.msk.f32.vlgmr.msra.gmra.mrb[6].mxu1 %vm499_vm2, %v2195_v15 }
0x15cd   : > { %4096 = vmatpush3.bf16.msra.mxu1 %v5029_v5  ;;  %4015 = vmatprep.mubr.msk.f32.mxu1 %vm4687_vm1, %v5901_v4 }
0x15ce   : > { %4097 = vmatprep.subr.bf16.mxu1 %v5902_v23 }
0x15d1   : > { %4099 = vmatpush3.bf16.msra.mxu1 %v5037_v8 }
0x15d2   : > { %4106 = vmatprep.subr.bf16.mxu1 %v5902_v23 }
0x169f   : > { %v5480_v16 = vpop.f32.mrb[6].mxu1 }
0x16a0   : > { %v2270_v22 = vcombine.high %v5480_v16, %v5480_v16  ;;  %v2277_v58 = vrot.slane %v5480_v16, %v5079_v43  ;;  %v3995_v42 = vpop.f32.mrb[7].mxu1 }
0x16a2   : > { %v2284_v5 = vrot.slane %v2270_v22, %v5079_v43  ;;  %v2285_v14 = vcombine.high %v2277_v58, %v2277_v58  ;;  %v2293_v33 = vrot.slane %v2277_v58, %v5079_v43 }
0x16a4   : > { %v2286_v9 = vcombine.high %v2284_v5, %v2284_v5  ;;  %v2300_v24 = vrot.slane %v2284_v5, %v5079_v43  ;;  %v2307_v8 = vrot.slane %v2285_v14, %v5079_v43  ;;  %v2315_v17 = vcombine.high %v2293_v33, %v2293_v33 }
0x16a5   : > { %v2322_v18 = vrot.slane %v2293_v33, %v5088_v48 }
0x16a6   : > { %v2314_v26 = vrot.slane %v2286_v9, %v5079_v43  ;;  %v2316_v35 = vcombine.high %v2300_v24, %v2300_v24  ;;  %v2317_v60 = vcombine.high %v2307_v8, %v2307_v8  ;;  %v2326_v36 = vrot.slane %v2307_v8, %v5088_v48 }
0x16a7   : > { %v2330_v21 = vrot.slane %v2315_v17, %v5088_v48  ;;  %v2338_v46 = vrot.slane %v2300_v24, %v5088_v48  ;;  %v2359_v52 = vadd.f32 %v5495_v49, %v2322_v18 }
0x16a8   : > { %v2318_v41 = vcombine.high %v2314_v26, %v2314_v26  ;;  %v2334_v50 = vrot.slane %v2317_v60, %v5088_v48  ;;  %v2342_v32 = vrot.slane %v2314_v26, %v5088_v48  ;;  %v2360_v7 = vadd.f32 %v5500_v31, %v2326_v36 }
0x16a9   : > { %v2361_v6 = vadd.f32 %v5503_v34, %v2330_v21  ;;  %4322 = vtanh.f32 %v2359_v52  ;;  %v2346_v30 = vrot.slane %v2316_v35, %v5088_v48  ;;  %v2363_v10 = vadd.f32 %v5507_v11, %v2338_v46 }
0x16aa   : > { %v2350_v13 = vrot.slane %v2318_v41, %v5088_v48  ;;  %v2362_v25 = vadd.f32 %v5511_v53, %v2334_v50  ;;  %4324 = vtanh.f32 %v2360_v7  ;;  %v2364_v19 = vadd.f32 %v5514_v62, %v2342_v32 }
0x16ab   : > { %4326 = vtanh.f32 %v2361_v6  ;;  %v2365_v47 = vadd.f32 %v5517_v45, %v2346_v30 }
0x16ac   : > { %4328 = vtanh.f32 %v2363_v10  ;;  %v2366_v20 = vadd.f32 %v5520_v40, %v2350_v13 }
0x16ad   : > { %4330 = vtanh.f32 %v2362_v25 }
0x16ae   : > { %4332 = vtanh.f32 %v2364_v19 }
0x16af   : > { %4334 = vtanh.f32 %v2365_v47 }
0x16b0   : > { %4336 = vtanh.f32 %v2366_v20 }
0x16b3   : > { %v4323_v59 = vpop.eup %4322 }
0x16b4   : > { %v2375_v55 = vmul.f32 %v5526_v54, %v4323_v59  ;;  %v4325_v0 = vpop.eup %4324 }
0x16b5   : > { %v4327_v28 = vpop.eup %4326  ;;  %v2376_v22 = vmul.f32 %v5526_v54, %v4325_v0 }
0x16b6   : > { %v2383_v15 = vsel %vm499_vm2, %v2375_v55, 0.0  ;;  %v4329_v58 = vpop.eup %4328  ;;  %v2377_v5 = vmul.f32 %v5526_v54, %v4327_v28 }
0x16b7   : > { %2384 = vadd.xlane.f32.xlu1 %v2383_v15  ;;  %v2386_v42 = vsel %vm499_vm2, %v2376_v22, 0.0  ;;  %v4331_v14 = vpop.eup %4330  ;;  %v2379_v26 = vmul.f32 %v5526_v54, %v4329_v58 }
0x16b8   : > { %2387 = vadd.xlane.f32.xlu0 %v2386_v42  ;;  %v4333_v33 = vpop.eup %4332  ;;  %v2378_v9 = vmul.f32 %v5526_v54, %v4331_v14  ;;  %v2389_v17 = vsel %vm499_vm2, %v2377_v5, 0.0 }
0x16b9   : > { %v4335_v24 = vpop.eup %4334  ;;  %v2380_v18 = vmul.f32 %v5526_v54, %v4333_v33  ;;  %v2395_v36 = vsel %vm499_vm2, %v2379_v26, 0.0 }
0x16ba   : > { %v2392_v8 = vsel %vm499_vm2, %v2378_v9, 0.0  ;;  %v4337_v35 = vpop.eup %4336  ;;  %v2381_v46 = vmul.f32 %v5526_v54, %v4335_v24 }
0x16bb   : > { %2393 = vadd.xlane.f32.xlu1 %v2392_v8  ;;  %v2398_v60 = vsel %vm499_vm2, %v2380_v18, 0.0  ;;  %v2382_v21 = vmul.f32 %v5526_v54, %v4337_v35 }
0x16bc   : > { %2390 = vadd.xlane.f32.xlu0 %v2389_v17  ;;  %v2401_v41 = vsel %vm499_vm2, %v2381_v46, 0.0 }
0x16bd   : > { %v2404_v52 = vsel %vm499_vm2, %v2382_v21, 0.0 }
0x16bf   : > { %2399 = vadd.xlane.f32.xlu1 %v2398_v60 }
0x16c0   : > { %2396 = vadd.xlane.f32.xlu0 %v2395_v36 }
0x16c3   : > { %2405 = vadd.xlane.f32.xlu1 %v2404_v52 }
0x16c4   : > { %2402 = vadd.xlane.f32.xlu0 %v2401_v41 }
0x1744   : > { %v2385_v50 = vpop.xlane.xlu1 %2384 }
0x1745   : > { %v2388_v32 = vpop.xlane.xlu0 %2387  ;;  %v2418_v6 = vrot.slane %v2385_v50, %v5150_v1 }
0x1746   : > { %v2422_v7 = vrot.slane %v2388_v32, %v5150_v1 }
0x1748   : > { %v2394_v30 = vpop.xlane.xlu1 %2393  ;;  %v2447_v25 = vsel %vm872_vm3, %v2422_v7, %v2418_v6 }
0x1749   : > { %v2391_v10 = vpop.xlane.xlu0 %2390  ;;  %v2430_v47 = vrot.slane %v2394_v30, %v5150_v1 }
0x174a   : > { %v2426_v13 = vrot.slane %v2391_v10, %v5150_v1 }
0x174c   : > { %v2448_v19 = vsel %vm874_vm4, %v2426_v13, %v2447_v25  ;;  %v2400_v20 = vpop.xlane.xlu1 %2399 }
0x174d   : > { %v2397_v59 = vpop.xlane.xlu0 %2396  ;;  %v2449_v0 = vsel %vm876_vm5, %v2430_v47, %v2448_v19  ;;  %v2438_v15 = vrot.slane %v2400_v20, %v5150_v1 }
0x174e   : > { %v2434_v55 = vrot.slane %v2397_v59, %v5150_v1 }
0x1750   : > { %v2450_v28 = vsel %vm878_vm6, %v2434_v55, %v2449_v0  ;;  %v2406_v22 = vpop.xlane.xlu1 %2405 }
0x1751   : > { %v2403_v58 = vpop.xlane.xlu0 %2402  ;;  %v2446_v5 = vrot.slane %v2406_v22, %v5150_v1  ;;  %v2451_v14 = vsel %vm880_vm7, %v2438_v15, %v2450_v28 }
0x1752   : > { %v2442_v42 = vrot.slane %v2403_v58, %v5150_v1 }
0x1754   : > { %v2452_v33 = vsel %vm882_vm8, %v2442_v42, %v2451_v14 }
0x1755   : > { %v2453_v9 = vsel %vm884_vm9, %v2446_v5, %v2452_v33 }
0x1756   : > { %v2455_v24 = vsel %vm887_vm10, %v2453_v9, -inf }
0x1757   : > { %2456 = vmax.xlane.f32.xlu0 %v2455_v24 }
0x17e4   : > { %v2457_v8 = vpop.xlane.xlu0 %2456 }
0x17e5   : > { %v2462_v17 = vrot.slane %v2457_v8, %v5088_v48  ;;  %v2466_v18 = vrot.slane %v2457_v8, %v5169_v37  ;;  %v2470_v26 = vrot.slane %v2457_v8, %v5172_v38  ;;  %v2478_v35 = vrot.slane %v2457_v8, %v5181_v51 }
0x17e6   : > { %v2474_v60 = vrot.slane %v2457_v8, %v5175_v39  ;;  %v2486_v52 = vrot.slane %v2457_v8, %v5189_v2  ;;  %v2482_v13 = vrot.slane %v2457_v8, %v5185_v57  ;;  %v2490_v0 = vrot.slane %v2457_v8, %v5193_v12 }
0x17e7   : > { %v2499_v36 = vsub.f32 %v2385_v50, %v2462_v17  ;;  %v2500_v21 = vsub.f32 %v2388_v32, %v2466_v18  ;;  %v2501_v46 = vsub.f32 %v2391_v10, %v2470_v26  ;;  %v2503_v41 = vsub.f32 %v2397_v59, %v2478_v35 }
0x17e8   : > { %v2502_v25 = vsub.f32 %v2394_v30, %v2474_v60  ;;  %v2505_v47 = vsub.f32 %v2403_v58, %v2486_v52  ;;  %v2504_v28 = vsub.f32 %v2400_v20, %v2482_v13  ;;  %v2506_v10 = vsub.f32 %v2406_v22, %v2490_v0 }
0x17e9   : > { %v2507_v7 = vmul.f32 1.442695, %v2499_v36  ;;  %v2509_v6 = vmul.f32 1.442695, %v2500_v21  ;;  %v2511_v19 = vmul.f32 1.442695, %v2501_v46 }
0x17ea   : > { %v2515_v55 = vmul.f32 1.442695, %v2503_v41  ;;  %v2513_v50 = vmul.f32 1.442695, %v2502_v25  ;;  %v2519_v32 = vmul.f32 1.442695, %v2505_v47 }
0x17eb   : > { %4338 = vpow2.f32 %v2507_v7  ;;  %v2517_v59 = vmul.f32 1.442695, %v2504_v28  ;;  %v2521_v30 = vmul.f32 1.442695, %v2506_v10  ;;  %v2268_v10 = vadd.f32 %v5480_v16, %v5225_v56 }
0x17ec   : > { %4340 = vpow2.f32 %v2509_v6 }
0x17ed   : > { %4342 = vpow2.f32 %v2511_v19 }
0x17ee   : > { %4344 = vpow2.f32 %v2515_v55 }
0x17ef   : > { %4346 = vpow2.f32 %v2513_v50 }
0x17f0   : > { %4348 = vpow2.f32 %v2519_v32 }
0x17f1   : > { %4350 = vpow2.f32 %v2517_v59 }
0x17f2   : > { %4352 = vpow2.f32 %v2521_v30 }
0x17f5   : > { %v4339_v15 = vpop.eup %4338 }
0x17f6   : > { %v4341_v42 = vpop.eup %4340  ;;  %2532 = vperm.xlu1 %4222, %v4339_v15  }
0x17f7   : > { %2535 = vperm.xlu0 %4223, %v4341_v42   ;;  %v4343_v58 = vpop.eup %4342 }
0x17f8   : > { %v4345_v5 = vpop.eup %4344 }
0x17f9   : > { %v4347_v20 = vpop.eup %4346 }
0x17fa   : > { %2538 = vperm.xlu1 %4222, %v4343_v58   ;;  %v4349_v14 = vpop.eup %4348 }
0x17fb   : > { %2544 = vperm.xlu0 %4223, %v4345_v5   ;;  %v4351_v33 = vpop.eup %4350 }
0x17fc   : > { %v4353_v22 = vpop.eup %4352 }
0x17fe   : > { %2541 = vperm.xlu1 %4222, %v4347_v20  }
0x17ff   : > { %2550 = vperm.xlu0 %4223, %v4349_v14  }
0x1802   : > { %2547 = vperm.xlu1 %4222, %v4351_v33  }
0x1806   : > { %2553 = vperm.xlu1 %4222, %v4353_v22  }
0x1875   : > { %v2533_v9 = vpop.permute.xlu1 %2532 }
0x1876   : > { %v2536_v24 = vpop.permute.xlu0 %2535  ;;  %v2558_v18 = vrot.slane %v2533_v9, %v5150_v1 }
0x1877   : > { %v2562_v17 = vrot.slane %v2536_v24, %v5150_v1 }
0x1879   : > { %v2539_v8 = vpop.permute.xlu1 %2538  ;;  %v2587_v36 = vsel %vm872_vm3, %v2562_v17, %v2558_v18 }
0x187a   : > { %v2566_v26 = vrot.slane %v2539_v8, %v5150_v1  ;;  %v2545_v35 = vpop.permute.xlu0 %2544 }
0x187b   : > { %v2574_v41 = vrot.slane %v2545_v35, %v5150_v1 }
0x187c   : > { %v2588_v46 = vsel %vm874_vm4, %v2566_v26, %v2587_v36 }
0x187d   : > { %v2542_v60 = vpop.permute.xlu1 %2541 }
0x187e   : > { %v2570_v21 = vrot.slane %v2542_v60, %v5150_v1  ;;  %v2551_v6 = vpop.permute.xlu0 %2550 }
0x187f   : > { %v2582_v47 = vrot.slane %v2551_v6, %v5150_v1 }
0x1880   : > { %v2589_v52 = vsel %vm876_vm5, %v2570_v21, %v2588_v46 }
0x1881   : > { %v2548_v7 = vpop.permute.xlu1 %2547  ;;  %v2590_v25 = vsel %vm878_vm6, %v2574_v41, %v2589_v52 }
0x1882   : > { %v2578_v13 = vrot.slane %v2548_v7, %v5150_v1  ;;  %v5596_v7 = vld [vmem:[#allocation6 + $0x8] sm:$0xff] }
0x1884   : > { %v2591_v19 = vsel %vm880_vm7, %v2578_v13, %v2590_v25  ;;  %v5599_v13 = vld [vmem:[#allocation6] sm:$0xff]  ;;  %v5602_v25 = vld [vmem:[#allocation6 + $0x10] sm:$0xff] }
0x1885   : > { %v2554_v55 = vpop.permute.xlu1 %2553  ;;  %v2592_v28 = vsel %vm882_vm8, %v2582_v47, %v2591_v19 }
0x1886   : > { %v2586_v0 = vrot.slane %v2554_v55, %v5150_v1 }
0x1888   : > { %v2593_v50 = vsel %vm884_vm9, %v2586_v0, %v2592_v28  ;;  %v5608_v0 = vld [vmem:[#allocation6 + $0x18] sm:$0xff] }
0x1889   : > { %v2595_v32 = vsel %vm887_vm10, %v2593_v50, 0.0 }
0x188a   : > { %2596 = vadd.xlane.f32.xlu0 %v2595_v32 }
0x18a0   : > { %2840 = vrot.lane.b32.xlu0 %v2268_v10, %s4690_s1 }
0x1917   : > { %v2597_v59 = vpop.xlane.xlu0 %2596 }
0x1918   : > { %4354 = vrcp.f32 %v2597_v59 }
0x1922   : > { %v4355_v30 = vpop.eup %4354 }
0x1923   : > { %v2603_v9 = vrot.slane %v4355_v30, %v5088_v48  ;;  %v2607_v8 = vrot.slane %v4355_v30, %v5169_v37  ;;  %v2611_v18 = vrot.slane %v4355_v30, %v5172_v38  ;;  %v2615_v35 = vrot.slane %v4355_v30, %v5175_v39 }
0x1924   : > { %v2619_v60 = vrot.slane %v4355_v30, %v5181_v51  ;;  %v2623_v21 = vrot.slane %v4355_v30, %v5185_v57  ;;  %v2627_v46 = vrot.slane %v4355_v30, %v5189_v2  ;;  %v2631_v52 = vrot.slane %v4355_v30, %v5193_v12 }
0x1925   : > { %v2640_v24 = vmul.f32 %v4339_v15, %v2603_v9  ;;  %v2641_v17 = vmul.f32 %v4341_v42, %v2607_v8  ;;  %v2642_v26 = vmul.f32 %v4343_v58, %v2611_v18  ;;  %v2643_v16 = vmul.f32 %v4347_v20, %v2615_v35 }
0x1926   : > { %v2644_v36 = vmul.f32 %v4345_v5, %v2619_v60  ;;  %v2645_v15 = vmul.f32 %v4351_v33, %v2623_v21  ;;  %v2646_v42 = vmul.f32 %v4349_v14, %v2627_v46  ;;  %v2647_v58 = vmul.f32 %v4353_v22, %v2631_v52  ;;  %v5616_v21 = vld [vmem:[#allocation6 + $0x28] sm:$0xff] }
0x1927   : > { %2650 = vperm.xlu1 %4222, %v2640_v24   ;;  %v5612_v24 = vld [vmem:[#allocation6 + $0x20] sm:$0xff]  ;;  %5909 = vst [vmem:[#allocation21_spill] sm:$0xff] %v5616_v21 }
0x1928   : > { %5908 = vst [vmem:[#allocation20_spill] sm:$0xff] %v5612_v24 }
0x192b   : > { %2655 = vperm.xlu1 %4222, %v2641_v17  }
0x192f   : > { %2660 = vperm.xlu1 %4222, %v2642_v26  }
0x1933   : > { %2665 = vperm.xlu1 %4222, %v2643_v16  }
0x1937   : > { %2670 = vperm.xlu1 %4222, %v2644_v36  }
0x193b   : > { %2675 = vperm.xlu1 %4222, %v2645_v15  }
0x193f   : > { %2680 = vperm.xlu1 %4222, %v2646_v42  }
0x1943   : > { %2685 = vperm.xlu1 %4222, %v2647_v58  }
0x1947   : > { %2850 = vrot.lane.b32.xlu1 %v2268_v10, %s4691_s23 }
0x19a6   : > { %v2651_v20 = vpop.permute.xlu1 %2650 }
0x19a7   : > { %v2688_v33 = vmul.f32 %v5599_v13, %v2651_v20 }
0x19a9   : > { %v2696_v55 = vsel %vm499_vm2, %v2688_v33, 0.0 }
0x19aa   : > { %v2656_v41 = vpop.permute.xlu1 %2655  ;;  %v2697_v59 = vrot.slane %v2696_v55, 4 }
0x19ab   : > { %v2689_v5 = vmul.f32 %v5596_v7, %v2656_v41 }
0x19ac   : > { %v2698_v35 = vadd.f32 %v2697_v59, %v2696_v55 }
0x19ad   : > { %v2703_v22 = vsel %vm499_vm2, %v2689_v5, 0.0 }
0x19ae   : > { %v2661_v6 = vpop.permute.xlu1 %2660  ;;  %v2704_v50 = vrot.slane %v2703_v22, 4  ;;  %v2699_v20 = vrot.slane %v2698_v35, 2 }
0x19af   : > { %v2690_v14 = vmul.f32 %v5602_v25, %v2661_v6 }
0x19b0   : > { %v2705_v17 = vadd.f32 %v2704_v50, %v2703_v22  ;;  %v2700_v50 = vadd.f32 %v2699_v20, %v2698_v35 }
0x19b1   : > { %v2710_v19 = vsel %vm499_vm2, %v2690_v14, 0.0  ;;  %v5620_v14 = vld [vmem:[#allocation6 + $0x30] sm:$0xff] }
0x19b2   : > { %v2666_v47 = vpop.permute.xlu1 %2665  ;;  %v2711_v32 = vrot.slane %v2710_v19, 4  ;;  %v2706_v46 = vrot.slane %v2705_v17, 2  ;;  %5910 = vst [vmem:[#allocation22_spill] sm:$0xff] %v5620_v14 }
0x19b3   : > { %v2691_v28 = vmul.f32 %v5608_v0, %v2666_v47 }
0x19b4   : > { %v2712_v18 = vadd.f32 %v2711_v32, %v2710_v19  ;;  %v2707_v19 = vadd.f32 %v2706_v46, %v2705_v17  ;;  %v2701_v46 = vrot.slane %v2700_v50, 1 }
0x19b5   : > { %v2717_v10 = vsel %vm499_vm2, %v2691_v28, 0.0 }
0x19b6   : > { %v2718_v30 = vrot.slane %v2717_v10, 4  ;;  %v2671_v9 = vpop.permute.xlu1 %2670  ;;  %v2713_v52 = vrot.slane %v2712_v18, 2 }
0x19b7   : > { %v2692_v8 = vmul.f32 %v5612_v24, %v2671_v9 }
0x19b8   : > { %v2719_v16 = vadd.f32 %v2718_v30, %v2717_v10  ;;  %v2714_v55 = vadd.f32 %v2713_v52, %v2712_v18 }
0x19b9   : > { %v2724_v26 = vsel %vm499_vm2, %v2692_v8, 0.0  ;;  %v5624_v8 = vld [vmem:[#allocation6 + $0x38] sm:$0xff] }
0x19ba   : > { %v2725_v60 = vrot.slane %v2724_v26, 4  ;;  %v2676_v36 = vpop.permute.xlu1 %2675  ;;  %v2720_v41 = vrot.slane %v2719_v16, 2  ;;  %5911 = vst [vmem:[#allocation23_spill] sm:$0xff] %v5624_v8 }
0x19bb   : > { %v2693_v15 = vmul.f32 %v5616_v21, %v2676_v36  ;;  %v2715_v21 = vrot.slane %v2714_v55, 1 }
0x19bc   : > { %v2726_v42 = vadd.f32 %v2725_v60, %v2724_v26  ;;  %v2721_v32 = vadd.f32 %v2720_v41, %v2719_v16  ;;  %v2708_v60 = vrot.slane %v2707_v19, 1 }
0x19bd   : > { %v2731_v58 = vsel %vm499_vm2, %v2693_v15, 0.0 }
0x19be   : > { %v2732_v5 = vrot.slane %v2731_v58, 4  ;;  %v2681_v6 = vpop.permute.xlu1 %2680  ;;  %v2727_v33 = vrot.slane %v2726_v42, 2  ;;  %v2722_v18 = vrot.slane %v2721_v32, 1  ;;  %v2709_v16 = vadd.f32 %v2708_v60, %v2707_v19 }
0x19bf   : > { %v2694_v22 = vmul.f32 %v5620_v14, %v2681_v6  ;;  %v2702_v6 = vadd.f32 %v2701_v46, %v2700_v50 }
0x19c0   : > { %v2733_v47 = vadd.f32 %v2732_v5, %v2731_v58  ;;  %v2728_v9 = vadd.f32 %v2727_v33, %v2726_v42  ;;  %v2716_v42 = vadd.f32 %v2715_v21, %v2714_v55  ;;  %v2723_v33 = vadd.f32 %v2722_v18, %v2721_v32 }
0x19c1   : > { %v2738_v28 = vsel %vm499_vm2, %v2694_v22, 0.0 }
0x19c2   : > { %v2734_v10 = vrot.slane %v2733_v47, 2  ;;  %v2739_v59 = vrot.slane %v2738_v28, 4  ;;  %v2686_v30 = vpop.permute.xlu1 %2685  ;;  %v2729_v35 = vrot.slane %v2728_v9, 1 }
0x19c3   : > { %v2695_v26 = vmul.f32 %v5624_v8, %v2686_v30 }
0x19c4   : > { %v2735_v36 = vadd.f32 %v2734_v10, %v2733_v47  ;;  %v2740_v15 = vadd.f32 %v2739_v59, %v2738_v28  ;;  %v2730_v8 = vadd.f32 %v2729_v35, %v2728_v9  ;;  %v2760_v47 = vsel %vm872_vm3, %v2709_v16, %v2702_v6 }
0x19c5   : > { %v2745_v17 = vsel %vm499_vm2, %v2695_v26, 0.0  ;;  %v2761_v59 = vsel %vm874_vm4, %v2716_v42, %v2760_v47 }
0x19c6   : > { %v2741_v52 = vrot.slane %v2740_v15, 2  ;;  %v2746_v58 = vrot.slane %v2745_v17, 4  ;;  %v2736_v20 = vrot.slane %v2735_v36, 1  ;;  %v2762_v14 = vsel %vm876_vm5, %v2723_v33, %v2761_v59  ;;  %v2851_v18 = vpop.permute.xlu1 %2850 }
0x19c7   : > { %v2763_v19 = vsel %vm878_vm6, %v2730_v8, %v2762_v14  ;;  %v2841_v8 = vpop.permute.xlu0 %2840 }
0x19c8   : > { %v2742_v41 = vadd.f32 %v2741_v52, %v2740_v15  ;;  %v2747_v5 = vadd.f32 %v2746_v58, %v2745_v17  ;;  %v2737_v28 = vadd.f32 %v2736_v20, %v2735_v36 }
0x19ca   : > { %v2743_v22 = vrot.slane %v2742_v41, 1  ;;  %v2748_v30 = vrot.slane %v2747_v5, 2  ;;  %v2764_v21 = vsel %vm880_vm7, %v2737_v28, %v2763_v19 }
0x19cc   : > { %v2749_v10 = vadd.f32 %v2748_v30, %v2747_v5  ;;  %v2744_v26 = vadd.f32 %v2743_v22, %v2742_v41  ;;  %v3834_v30 = vld [vmem:[%s5006_s17 + $0x18] sm:$0xff]  ;;  %s3847_s17 = sshll.u32 %s4773_s19, 9  ;;  %s4694_s19 = smov [#allocation14]  }
0x19cd   : > { %s5798_s8 = scalar_lea.hbm %s5916_s28, %s3847_s17 }
0x19ce   : > { %v2750_v24 = vrot.slane %v2749_v10, 1  ;;  %v2765_v55 = vsel %vm882_vm8, %v2744_v26, %v2764_v21 }
0x19d0   : > { %v2751_v60 = vadd.f32 %v2750_v24, %v2749_v10  ;;  %v5644_v24 = vld [vmem:[%s5903_s26] ss:$0 sm:$0xff] }
0x19d2   : > { %v2766_v50 = vsel %vm884_vm9, %v2751_v60, %v2765_v55 }
0x19d3   : > { %4005 = vmatmul.mubr.msk.f32.vlgmr.msra.gmra.mrb[8].mxu0 %vm499_vm2, %v2766_v50 }
0x19d4   : > { %4102 = vmatpush3.bf16.msra.mxu0 %v5054_v27  ;;  %4026 = vmatprep.mubr.msk.f32.mxu0 %vm4687_vm1, %v5901_v4 }
0x19d5   : > { %4103 = vmatprep.subr.bf16.mxu0 %v5902_v23 }
0x19d8   : > { %4105 = vmatpush3.bf16.msra.mxu0 %v5057_v29 }
0x1aa6   : > { %v2835_v32 = vpop.f32.mrb[8].mxu0 }
0x1aa7   : > { %v2836_v14 = vadd.f32 %v5644_v24, %v2835_v32  ;;  %v4006_v9 = vpop.f32.mrb[9].mxu0 }
0x1aa9   : > { %v2843_v36 = vadd.f32 %v2841_v8, %v2836_v14 }
0x1aab   : > { %v3832_v15 = vmul.f32 -1.442695, %v2843_v36 }
0x1aad   : > { %4356 = vpow2.f32 %v3832_v15 }
0x1ab7   : > { %v4357_v27 = vpop.eup %4356 }
0x1ab8   : > { %v2847_v17 = vadd.f32 1.0, %v4357_v27 }
0x1aba   : > { %4358 = vrcp.f32 %v2847_v17 }
0x1ac4   : > { %v4359_v46 = vpop.eup %4358 }
0x1ac5   : > { %v2853_v29 = vmul.f32 %v4359_v46, %v2851_v18  ;;  %v2860_v16 = vsub.f32 1.0, %v4359_v46  ;;  %v2866_v41 = vmul.f32 %v4359_v46, %v5469_v63 }
0x1ac7   : > { %2855 = vrot.lane.b32.xlu1 %v2853_v29, %s4689_s27 }
0x1b39   : > { %v2856_v52 = vpop.permute.xlu1 %2855 }
0x1b3a   : > { %v2858_v58 = vadd.f32 %v2856_v52, %v2836_v14 }
0x1b3c   : > { %4360 = vtanh.f32 %v2858_v58 }
0x1b46   : > { %v4361_v35 = vpop.eup %4360 }
0x1b47   : > { %2862 = vrot.lane.b32.xlu1 %v4361_v35, %s4690_s1 }
0x1bb9   : > { %v2863_v20 = vpop.permute.xlu1 %2862 }
0x1bba   : > { %v2865_v5 = vmul.f32 %v2863_v20, %v2860_v16 }
0x1bbc   : > { %v2867_v42 = vadd.f32 %v2866_v41, %v2865_v5 }
0x1bbe   : > { %2869 = vrot.lane.b32.xlu1 %v2867_v42, %s4690_s1 }
0x1c30   : > { %v2870_v6 = vpop.permute.xlu1 %2869 }
0x1c31   : > { %3833 = vst.msk [vmem:[%s5024_s20 + $0x10] sm:$0xff] %vm499_vm2, %v2870_v6  ;;  %4016 = vmatmul.mubr.msk.f32.vlgmr.msra.gmra.mrb[8].mxu1 %vm499_vm2, %v2870_v6 }
0x1c32   : > { %4108 = vmatpush3.bf16.msra.mxu1 %v5231_v61  ;;  %4037 = vmatprep.mubr.msk.f32.mxu1 %vm4687_vm1, %v5901_v4 }
0x1c33   : > { %4109 = vmatprep.subr.bf16.mxu1 %v5902_v23 }
0x1c36   : > { %4111 = vmatpush3.bf16.msra.mxu1 %v5234_v3 }
0x1d04   : > { %v2944_v33 = vpop.f32.mrb[8].mxu1 }
0x1d05   : > { %v2945_v63 = vadd.f32 %v5462_v44, %v2944_v33  ;;  %v4017_v22 = vpop.f32.mrb[9].mxu1 }
0x1d07   : > { %2956 = vrot.lane.b32.xlu1 %v2945_v63, %s4689_s27  ;;  %v2948_v47 = vadd.f32 %v3834_v30, %v2945_v63 }
0x1d09   : > { %v3836_v28 = vmul.f32 -1.442695, %v2948_v47 }
0x1d0b   : > { %4362 = vpow2.f32 %v3836_v28 }
0x1d15   : > { %v4363_v10 = vpop.eup %4362 }
0x1d16   : > { %v2952_v59 = vadd.f32 1.0, %v4363_v10 }
0x1d18   : > { %4364 = vrcp.f32 %v2952_v59 }
0x1d22   : > { %v4365_v61 = vpop.eup %4364 }
0x1d23   : > { %v2966_v44 = vsub.f32 1.0, %v4365_v61  ;;  %v2972_v21 = vmul.f32 %v4365_v61, %v2867_v42 }
0x1d79   : > { %v2957_v26 = vpop.permute.xlu1 %2956 }
0x1d7a   : > { %v2959_v4 = vmul.f32 %v4365_v61, %v2957_v26 }
0x1d7c   : > { %2961 = vrot.lane.b32.xlu1 %v2959_v4, %s4689_s27 }
0x1dee   : > { %v2962_v23 = vpop.permute.xlu1 %2961 }
0x1def   : > { %v2964_v3 = vadd.f32 %v3834_v30, %v2962_v23 }
0x1df1   : > { %4366 = vtanh.f32 %v2964_v3 }
0x1dfb   : > { %v4367_v19 = vpop.eup %4366 }
0x1dfc   : > { %2968 = vrot.lane.b32.xlu0 %v4367_v19, %s4690_s1 }
0x1e6e   : > { %v2969_v60 = vpop.permute.xlu0 %2968 }
0x1e6f   : > { %v2971_v55 = vmul.f32 %v2969_v60, %v2966_v44 }
0x1e71   : > { %v5664_v50 = vadd.f32 %v2972_v21, %v2971_v55 }
0x1e73   : > { %2975 = vrot.lane.b32.xlu1 %v5664_v50, %s4690_s1 }
0x1ee5   : > { %v2976_v32 = vpop.permute.xlu1 %2975 }
0x1ee6   : > { %4027 = vmatmul.mubr.msk.f32.vlgmr.msra.gmra.mrb[10].mxu0 %vm499_vm2, %v2976_v32 }
0x1fb9   : > { %v5669_v14 = vpop.f32.mrb[10].mxu0 }
0x1fba   : > { %v3051_v9 = vcombine.high %v5669_v14, %v5669_v14  ;;  %v3058_v8 = vrot.slane %v5669_v14, %v5079_v43  ;;  %v4028_v36 = vpop.f32.mrb[11].mxu0 }
0x1fbc   : > { %v3065_v15 = vrot.slane %v3051_v9, %v5079_v43  ;;  %v3066_v27 = vcombine.high %v3058_v8, %v3058_v8  ;;  %v3074_v17 = vrot.slane %v3058_v8, %v5079_v43 }
0x1fbe   : > { %v3067_v46 = vcombine.high %v3065_v15, %v3065_v15  ;;  %v3081_v18 = vrot.slane %v3065_v15, %v5079_v43  ;;  %v3088_v29 = vrot.slane %v3066_v27, %v5079_v43  ;;  %v3096_v52 = vcombine.high %v3074_v17, %v3074_v17 }
0x1fbf   : > { %v3103_v58 = vrot.slane %v3074_v17, %v5088_v48 }
0x1fc0   : > { %v3095_v35 = vrot.slane %v3067_v46, %v5079_v43  ;;  %v3098_v16 = vcombine.high %v3088_v29, %v3088_v29  ;;  %v3107_v20 = vrot.slane %v3088_v29, %v5088_v48  ;;  %v3111_v41 = vrot.slane %v3096_v52, %v5088_v48 }
0x1fc1   : > { %v3119_v5 = vrot.slane %v3081_v18, %v5088_v48  ;;  %v3140_v42 = vadd.f32 %v5495_v49, %v3103_v58  ;;  %v3097_v22 = vcombine.high %v3081_v18, %v3081_v18 }
0x1fc2   : > { %v3099_v6 = vcombine.high %v3095_v35, %v3095_v35  ;;  %v3115_v33 = vrot.slane %v3098_v16, %v5088_v48  ;;  %v3123_v63 = vrot.slane %v3095_v35, %v5088_v48  ;;  %v3141_v30 = vadd.f32 %v5500_v31, %v3107_v20 }
0x1fc3   : > { %v3142_v47 = vadd.f32 %v5503_v34, %v3111_v41  ;;  %4368 = vtanh.f32 %v3140_v42  ;;  %v3144_v28 = vadd.f32 %v5507_v11, %v3119_v5  ;;  %v3127_v59 = vrot.slane %v3097_v22, %v5088_v48 }
0x1fc4   : > { %v3131_v43 = vrot.slane %v3099_v6, %v5088_v48  ;;  %v3145_v10 = vadd.f32 %v5514_v62, %v3123_v63  ;;  %4370 = vtanh.f32 %v3141_v30  ;;  %v3143_v49 = vadd.f32 %v5511_v53, %v3115_v33 }
0x1fc5   : > { %4372 = vtanh.f32 %v3142_v47  ;;  %v3146_v31 = vadd.f32 %v5517_v45, %v3127_v59 }
0x1fc6   : > { %v3147_v61 = vadd.f32 %v5520_v40, %v3131_v43  ;;  %4374 = vtanh.f32 %v3144_v28 }
0x1fc7   : > { %4376 = vtanh.f32 %v3145_v10 }
0x1fc8   : > { %4378 = vtanh.f32 %v3143_v49 }
0x1fc9   : > { %4380 = vtanh.f32 %v3147_v61 }
0x1fca   : > { %4382 = vtanh.f32 %v3146_v31 }
0x1fcd   : > { %v4369_v34 = vpop.eup %4368 }
0x1fce   : > { %v3156_v26 = vmul.f32 %v5526_v54, %v4369_v34  ;;  %v4371_v11 = vpop.eup %4370 }
0x1fcf   : > { %v4373_v62 = vpop.eup %4372  ;;  %v3157_v53 = vmul.f32 %v5526_v54, %v4371_v11 }
0x1fd0   : > { %v3164_v4 = vsel %vm499_vm2, %v3156_v26, 0.0  ;;  %v3158_v23 = vmul.f32 %v5526_v54, %v4373_v62  ;;  %v4375_v40 = vpop.eup %4374 }
0x1fd1   : > { %3165 = vadd.xlane.f32.xlu0 %v3164_v4  ;;  %v3167_v3 = vsel %vm499_vm2, %v3157_v53, 0.0  ;;  %v4377_v19 = vpop.eup %4376  ;;  %v3160_v21 = vmul.f32 %v5526_v54, %v4375_v40 }
0x1fd2   : > { %3168 = vadd.xlane.f32.xlu1 %v3167_v3  ;;  %v4379_v45 = vpop.eup %4378  ;;  %v3170_v44 = vsel %vm499_vm2, %v3158_v23, 0.0  ;;  %v3161_v60 = vmul.f32 %v5526_v54, %v4377_v19 }
0x1fd3   : > { %v4381_v55 = vpop.eup %4380  ;;  %v3176_v8 = vsel %vm499_vm2, %v3160_v21, 0.0  ;;  %v3159_v36 = vmul.f32 %v5526_v54, %v4379_v45 }
0x1fd4   : > { %v3179_v32 = vsel %vm499_vm2, %v3161_v60, 0.0  ;;  %v3163_v9 = vmul.f32 %v5526_v54, %v4381_v55  ;;  %v4383_v15 = vpop.eup %4382 }
0x1fd5   : > { %3171 = vadd.xlane.f32.xlu0 %v3170_v44  ;;  %v3173_v17 = vsel %vm499_vm2, %v3159_v36, 0.0  ;;  %v3162_v46 = vmul.f32 %v5526_v54, %v4383_v15 }
0x1fd6   : > { %3180 = vadd.xlane.f32.xlu1 %v3179_v32  ;;  %v3185_v27 = vsel %vm499_vm2, %v3163_v9, 0.0 }
0x1fd7   : > { %v3182_v18 = vsel %vm499_vm2, %v3162_v46, 0.0 }
0x1fd9   : > { %3177 = vadd.xlane.f32.xlu0 %v3176_v8 }
0x1fda   : > { %3186 = vadd.xlane.f32.xlu1 %v3185_v27 }
0x1fdd   : > { %3174 = vadd.xlane.f32.xlu0 %v3173_v17 }
0x1fe1   : > { %3183 = vadd.xlane.f32.xlu0 %v3182_v18 }
0x205e   : > { %v3166_v29 = vpop.xlane.xlu0 %3165 }
0x205f   : > { %v3169_v52 = vpop.xlane.xlu1 %3168  ;;  %v3199_v20 = vrot.slane %v3166_v29, %v5150_v1 }
0x2060   : > { %v3203_v35 = vrot.slane %v3169_v52, %v5150_v1 }
0x2062   : > { %v3172_v58 = vpop.xlane.xlu0 %3171  ;;  %v3228_v42 = vsel %vm872_vm3, %v3203_v35, %v3199_v20 }
0x2063   : > { %v3181_v41 = vpop.xlane.xlu1 %3180  ;;  %v3207_v5 = vrot.slane %v3172_v58, %v5150_v1 }
0x2064   : > { %v3219_v22 = vrot.slane %v3181_v41, %v5150_v1 }
0x2065   : > { %v3229_v33 = vsel %vm874_vm4, %v3207_v5, %v3228_v42 }
0x2066   : > { %v3178_v16 = vpop.xlane.xlu0 %3177 }
0x2067   : > { %v3215_v63 = vrot.slane %v3178_v16, %v5150_v1  ;;  %v3187_v30 = vpop.xlane.xlu1 %3186 }
0x2068   : > { %v3227_v59 = vrot.slane %v3187_v30, %v5150_v1 }
0x206a   : > { %v3175_v6 = vpop.xlane.xlu0 %3174 }
0x206b   : > { %v3211_v54 = vrot.slane %v3175_v6, %v5150_v1 }
0x206d   : > { %v3230_v47 = vsel %vm876_vm5, %v3211_v54, %v3229_v33 }
0x206e   : > { %v3231_v43 = vsel %vm878_vm6, %v3215_v63, %v3230_v47  ;;  %v3184_v28 = vpop.xlane.xlu0 %3183 }
0x206f   : > { %v3223_v10 = vrot.slane %v3184_v28, %v5150_v1  ;;  %v3232_v49 = vsel %vm880_vm7, %v3219_v22, %v3231_v43 }
0x2071   : > { %v3233_v61 = vsel %vm882_vm8, %v3223_v10, %v3232_v49 }
0x2072   : > { %v3234_v31 = vsel %vm884_vm9, %v3227_v59, %v3233_v61 }
0x2073   : > { %v3236_v34 = vsel %vm887_vm10, %v3234_v31, -inf }
0x2074   : > { %3237 = vmax.xlane.f32.xlu0 %v3236_v34 }
0x2101   : > { %v3238_v26 = vpop.xlane.xlu0 %3237 }
0x2102   : > { %v3243_v11 = vrot.slane %v3238_v26, %v5088_v48  ;;  %v3247_v62 = vrot.slane %v3238_v26, %v5169_v37  ;;  %v3251_v4 = vrot.slane %v3238_v26, %v5172_v38  ;;  %v3263_v53 = vrot.slane %v3238_v26, %v5185_v57 }
0x2103   : > { %v3255_v23 = vrot.slane %v3238_v26, %v5175_v39  ;;  %v3271_v45 = vrot.slane %v3238_v26, %v5193_v12  ;;  %v3259_v55 = vrot.slane %v3238_v26, %v5181_v51  ;;  %v3267_v15 = vrot.slane %v3238_v26, %v5189_v2 }
0x2104   : > { %v3280_v40 = vsub.f32 %v3166_v29, %v3243_v11  ;;  %v3281_v3 = vsub.f32 %v3169_v52, %v3247_v62  ;;  %v3282_v19 = vsub.f32 %v3172_v58, %v3251_v4  ;;  %v3285_v44 = vsub.f32 %v3181_v41, %v3263_v53 }
0x2105   : > { %v3283_v32 = vsub.f32 %v3175_v6, %v3255_v23  ;;  %v3287_v8 = vsub.f32 %v3187_v30, %v3271_v45  ;;  %v3284_v27 = vsub.f32 %v3178_v16, %v3259_v55  ;;  %v3286_v18 = vsub.f32 %v3184_v28, %v3267_v15 }
0x2106   : > { %v3288_v60 = vmul.f32 1.442695, %v3280_v40  ;;  %v3290_v21 = vmul.f32 1.442695, %v3281_v3  ;;  %v3292_v9 = vmul.f32 1.442695, %v3282_v19 }
0x2107   : > { %v3298_v36 = vmul.f32 1.442695, %v3285_v44  ;;  %v3294_v17 = vmul.f32 1.442695, %v3283_v32  ;;  %v3302_v46 = vmul.f32 1.442695, %v3287_v8  ;;  %v3049_v44 = vadd.f32 %v5669_v14, %v5225_v56 }
0x2108   : > { %4384 = vpow2.f32 %v3288_v60  ;;  %v3296_v29 = vmul.f32 1.442695, %v3284_v27  ;;  %v3300_v35 = vmul.f32 1.442695, %v3286_v18 }
0x2109   : > { %4386 = vpow2.f32 %v3290_v21 }
0x210a   : > { %4388 = vpow2.f32 %v3292_v9 }
0x210b   : > { %4390 = vpow2.f32 %v3298_v36 }
0x210c   : > { %4392 = vpow2.f32 %v3294_v17 }
0x210d   : > { %4394 = vpow2.f32 %v3302_v46 }
0x210e   : > { %4396 = vpow2.f32 %v3296_v29 }
0x210f   : > { %4398 = vpow2.f32 %v3300_v35 }
0x2112   : > { %v4385_v52 = vpop.eup %4384 }
0x2113   : > { %v4387_v58 = vpop.eup %4386  ;;  %3313 = vperm.xlu1 %4222, %v4385_v52  }
0x2114   : > { %3316 = vperm.xlu0 %4223, %v4387_v58   ;;  %v4389_v20 = vpop.eup %4388 }
0x2115   : > { %v4391_v41 = vpop.eup %4390 }
0x2116   : > { %v4393_v16 = vpop.eup %4392 }
0x2117   : > { %3319 = vperm.xlu1 %4222, %v4389_v20   ;;  %v4395_v5 = vpop.eup %4394 }
0x2118   : > { %3328 = vperm.xlu0 %4223, %v4391_v41   ;;  %v4397_v42 = vpop.eup %4396 }
0x2119   : > { %v4399_v6 = vpop.eup %4398 }
0x211b   : > { %3322 = vperm.xlu1 %4222, %v4393_v16  }
0x211c   : > { %3334 = vperm.xlu0 %4223, %v4395_v5  }
0x211f   : > { %3325 = vperm.xlu1 %4222, %v4397_v42  }
0x2123   : > { %3331 = vperm.xlu1 %4222, %v4399_v6  }
0x2192   : > { %v3314_v54 = vpop.permute.xlu1 %3313 }
0x2193   : > { %v3317_v33 = vpop.permute.xlu0 %3316  ;;  %v3339_v30 = vrot.slane %v3314_v54, %v5150_v1 }
0x2194   : > { %v3343_v22 = vrot.slane %v3317_v33, %v5150_v1  ;;  %v5912_v33 = vld [vmem:[#allocation20_spill] sm:$0xff] }
0x2196   : > { %v3320_v63 = vpop.permute.xlu1 %3319  ;;  %v3368_v49 = vsel %vm872_vm3, %v3343_v22, %v3339_v30 }
0x2197   : > { %v3329_v43 = vpop.permute.xlu0 %3328  ;;  %v3347_v28 = vrot.slane %v3320_v63, %v5150_v1 }
0x2198   : > { %v3359_v62 = vrot.slane %v3329_v43, %v5150_v1 }
0x2199   : > { %v3369_v61 = vsel %vm874_vm4, %v3347_v28, %v3368_v49 }
0x219a   : > { %v3323_v47 = vpop.permute.xlu1 %3322 }
0x219b   : > { %v3351_v10 = vrot.slane %v3323_v47, %v5150_v1  ;;  %v3335_v26 = vpop.permute.xlu0 %3334 }
0x219c   : > { %v3367_v23 = vrot.slane %v3335_v26, %v5150_v1 }
0x219d   : > { %v3370_v34 = vsel %vm876_vm5, %v3351_v10, %v3369_v61  ;;  %v5913_v10 = vld [vmem:[#allocation21_spill] sm:$0xff] }
0x219e   : > { %v3326_v59 = vpop.permute.xlu1 %3325 }
0x219f   : > { %v3355_v31 = vrot.slane %v3326_v59, %v5150_v1 }
0x21a1   : > { %v3371_v11 = vsel %vm878_vm6, %v3355_v31, %v3370_v34 }
0x21a2   : > { %v3332_v4 = vpop.permute.xlu1 %3331  ;;  %v3372_v40 = vsel %vm880_vm7, %v3359_v62, %v3371_v11 }
0x21a3   : > { %v3363_v53 = vrot.slane %v3332_v4, %v5150_v1 }
0x21a5   : > { %v3373_v3 = vsel %vm882_vm8, %v3363_v53, %v3372_v40  ;;  %v5914_v53 = vld [vmem:[#allocation22_spill] sm:$0xff] }
0x21a6   : > { %v3374_v19 = vsel %vm884_vm9, %v3367_v23, %v3373_v3 }
0x21a7   : > { %v3376_v45 = vsel %vm887_vm10, %v3374_v19, 0.0 }
0x21a8   : > { %3377 = vadd.xlane.f32.xlu1 %v3376_v45 }
0x21b9   : > { %3631 = vrot.lane.b32.xlu1 %v3049_v44, %s4691_s23  ;;  %s3670_s23 = sshll.u32 %s5024_s20, 4  ;;  %s5800_s23 = int_to_ptr.vmem [resolvable:$true] %s3670_s23 }
0x21ba   : > { %s4597_s18 = scalar_lea.vmem %s5800_s23, 512 }
0x21bb   : > { %p4598_p3 = scmp.ne.s32.totalorder %s5800_s23, %s4597_s18 }
0x21bd   : > { %p4599_p1 = pnand %p4598_p3, %p5917_p12 }
0x21bf   : > { %p4600_p13 = pneg %p4599_p1 }
0x2235   : > { %v3378_v60 = vpop.xlane.xlu1 %3377 }
0x2236   : > { %4400 = vrcp.f32 %v3378_v60 }
0x2240   : > { %v4401_v21 = vpop.eup %4400 }
0x2241   : > { %v3384_v55 = vrot.slane %v4401_v21, %v5088_v48  ;;  %v3388_v32 = vrot.slane %v4401_v21, %v5169_v37  ;;  %v3392_v8 = vrot.slane %v4401_v21, %v5172_v38  ;;  %v3396_v15 = vrot.slane %v4401_v21, %v5175_v39 }
0x2242   : > { %v3400_v14 = vrot.slane %v4401_v21, %v5181_v51  ;;  %v3404_v17 = vrot.slane %v4401_v21, %v5185_v57  ;;  %v3408_v37 = vrot.slane %v4401_v21, %v5189_v2  ;;  %v3412_v38 = vrot.slane %v4401_v21, %v5193_v12 }
0x2243   : > { %v3421_v1 = vmul.f32 %v4385_v52, %v3384_v55  ;;  %v3422_v9 = vmul.f32 %v4387_v58, %v3388_v32  ;;  %v3423_v36 = vmul.f32 %v4389_v20, %v3392_v8  ;;  %v3424_v56 = vmul.f32 %v4393_v16, %v3396_v15 }
0x2244   : > { %v3425_v27 = vmul.f32 %v4397_v42, %v3400_v14  ;;  %v3426_v48 = vmul.f32 %v4391_v41, %v3404_v17  ;;  %v3427_v46 = vmul.f32 %v4399_v6, %v3408_v37  ;;  %v3428_v18 = vmul.f32 %v4395_v5, %v3412_v38 }
0x2245   : > { %3431 = vperm.xlu0 %4223, %v3421_v1  }
0x2249   : > { %3436 = vperm.xlu0 %4223, %v3422_v9   ;;  %v5915_v9 = vld [vmem:[#allocation23_spill] sm:$0xff] }
0x224d   : > { %3441 = vperm.xlu0 %4223, %v3423_v36  }
0x2251   : > { %3446 = vperm.xlu0 %4223, %v3424_v56  }
0x2255   : > { %3451 = vperm.xlu0 %4223, %v3425_v27  }
0x2259   : > { %3456 = vperm.xlu0 %4223, %v3426_v48  }
0x225d   : > { %3461 = vperm.xlu0 %4223, %v3427_v46  }
0x2261   : > { %3466 = vperm.xlu0 %4223, %v3428_v18  }
0x2265   : > { %3621 = vrot.lane.b32.xlu0 %v3049_v44, %s4690_s1 }
0x22c4   : > { %v3432_v39 = vpop.permute.xlu0 %3431 }
0x22c5   : > { %v3469_v57 = vmul.f32 %v5599_v13, %v3432_v39 }
0x22c7   : > { %v3477_v12 = vsel %vm499_vm2, %v3469_v57, 0.0 }
0x22c8   : > { %v3437_v29 = vpop.permute.xlu0 %3436  ;;  %v3478_v6 = vrot.slane %v3477_v12, 4 }
0x22c9   : > { %v3470_v51 = vmul.f32 %v5596_v7, %v3437_v29 }
0x22ca   : > { %v3479_v30 = vadd.f32 %v3478_v6, %v3477_v12 }
0x22cb   : > { %v3484_v2 = vsel %vm499_vm2, %v3470_v51, 0.0 }
0x22cc   : > { %v3442_v52 = vpop.permute.xlu0 %3441  ;;  %v3485_v16 = vrot.slane %v3484_v2, 4  ;;  %v3480_v34 = vrot.slane %v3479_v30, 2 }
0x22cd   : > { %v3471_v58 = vmul.f32 %v5602_v25, %v3442_v52 }
0x22ce   : > { %v3486_v63 = vadd.f32 %v3485_v16, %v3484_v2  ;;  %v3481_v44 = vadd.f32 %v3480_v34, %v3479_v30 }
0x22cf   : > { %v3491_v35 = vsel %vm499_vm2, %v3471_v58, 0.0 }
0x22d0   : > { %v3447_v20 = vpop.permute.xlu0 %3446  ;;  %v3492_v5 = vrot.slane %v3491_v35, 4  ;;  %v3482_v17 = vrot.slane %v3481_v44, 1 }
0x22d1   : > { %v3472_v41 = vmul.f32 %v5608_v0, %v3447_v20  ;;  %v3487_v0 = vrot.slane %v3486_v63, 2 }
0x22d2   : > { %v3493_v25 = vadd.f32 %v3492_v5, %v3491_v35  ;;  %v3483_v57 = vadd.f32 %v3482_v17, %v3481_v44 }
0x22d3   : > { %v3498_v42 = vsel %vm499_vm2, %v3472_v41, 0.0  ;;  %v3488_v40 = vadd.f32 %v3487_v0, %v3486_v63 }
0x22d4   : > { %v3499_v7 = vrot.slane %v3498_v42, 4  ;;  %v3452_v54 = vpop.permute.xlu0 %3451  ;;  %v3494_v61 = vrot.slane %v3493_v25, 2 }
0x22d5   : > { %v3473_v13 = vmul.f32 %v5912_v33, %v3452_v54  ;;  %v3489_v36 = vrot.slane %v3488_v40, 1 }
0x22d6   : > { %v3500_v47 = vadd.f32 %v3499_v7, %v3498_v42  ;;  %v3495_v19 = vadd.f32 %v3494_v61, %v3493_v25  ;;  %v3632_v61 = vpop.permute.xlu1 %3631 }
0x22d7   : > { %v3505_v22 = vsel %vm499_vm2, %v3473_v13, 0.0  ;;  %v3490_v18 = vadd.f32 %v3489_v36, %v3488_v40 }
0x22d8   : > { %v3506_v43 = vrot.slane %v3505_v22, 4  ;;  %v3457_v28 = vpop.permute.xlu0 %3456  ;;  %v3501_v26 = vrot.slane %v3500_v47, 2  ;;  %v3496_v14 = vrot.slane %v3495_v19, 1 }
0x22d9   : > { %v3474_v49 = vmul.f32 %v5913_v10, %v3457_v28  ;;  %v3541_v12 = vsel %vm872_vm3, %v3490_v18, %v3483_v57 }
0x22da   : > { %v3507_v59 = vadd.f32 %v3506_v43, %v3505_v22  ;;  %v3502_v60 = vadd.f32 %v3501_v26, %v3500_v47  ;;  %v3497_v52 = vadd.f32 %v3496_v14, %v3495_v19 }
0x22db   : > { %v3512_v31 = vsel %vm499_vm2, %v3474_v49, 0.0 }
0x22dc   : > { %v3513_v11 = vrot.slane %v3512_v31, 4  ;;  %v3462_v62 = vpop.permute.xlu0 %3461  ;;  %v3508_v4 = vrot.slane %v3507_v59, 2  ;;  %v3503_v48 = vrot.slane %v3502_v60, 1  ;;  %v3542_v5 = vsel %vm874_vm4, %v3497_v52, %v3541_v12 }
0x22dd   : > { %v3475_v23 = vmul.f32 %v5914_v53, %v3462_v62 }
0x22de   : > { %v3514_v3 = vadd.f32 %v3513_v11, %v3512_v31  ;;  %v3509_v32 = vadd.f32 %v3508_v4, %v3507_v59  ;;  %v3504_v58 = vadd.f32 %v3503_v48, %v3502_v60 }
0x22df   : > { %v3519_v45 = vsel %vm499_vm2, %v3475_v23, 0.0 }
0x22e0   : > { %v3515_v21 = vrot.slane %v3514_v3, 2  ;;  %v3520_v55 = vrot.slane %v3519_v45, 4  ;;  %v3467_v1 = vpop.permute.xlu0 %3466  ;;  %v3510_v38 = vrot.slane %v3509_v32, 1  ;;  %v3543_v6 = vsel %vm876_vm5, %v3504_v58, %v3542_v5 }
0x22e1   : > { %v3476_v8 = vmul.f32 %v5915_v9, %v3467_v1 }
0x22e2   : > { %v3516_v15 = vadd.f32 %v3515_v21, %v3514_v3  ;;  %v3521_v56 = vadd.f32 %v3520_v55, %v3519_v45  ;;  %v3511_v20 = vadd.f32 %v3510_v38, %v3509_v32 }
0x22e3   : > { %v3526_v27 = vsel %vm499_vm2, %v3476_v8, 0.0 }
0x22e4   : > { %v3522_v37 = vrot.slane %v3521_v56, 2  ;;  %v3527_v46 = vrot.slane %v3526_v27, 4  ;;  %v3517_v39 = vrot.slane %v3516_v15, 1  ;;  %v3544_v54 = vsel %vm878_vm6, %v3511_v20, %v3543_v6  ;;  %v3622_v43 = vpop.permute.xlu0 %3621 }
0x22e6   : > { %v3523_v29 = vadd.f32 %v3522_v37, %v3521_v56  ;;  %v3528_v51 = vadd.f32 %v3527_v46, %v3526_v27  ;;  %v3518_v41 = vadd.f32 %v3517_v39, %v3516_v15 }
0x22e8   : > { %v3524_v2 = vrot.slane %v3523_v29, 1  ;;  %v3529_v35 = vrot.slane %v3528_v51, 2  ;;  %v3545_v13 = vsel %vm880_vm7, %v3518_v41, %v3544_v54 }
0x22ea   : > { %v3530_v16 = vadd.f32 %v3529_v35, %v3528_v51  ;;  %v3525_v42 = vadd.f32 %v3524_v2, %v3523_v29 }
0x22ec   : > { %v3531_v7 = vrot.slane %v3530_v16, 1  ;;  %v3546_v63 = vsel %vm882_vm8, %v3525_v42, %v3545_v13 }
0x22ee   : > { %v3532_v33 = vadd.f32 %v3531_v7, %v3530_v16 }
0x22f0   : > { %v3547_v25 = vsel %vm884_vm9, %v3532_v33, %v3546_v63 }
0x22f1   : > { %4038 = vmatmul.mubr.msk.f32.vlgmr.msra.gmra.mrb[10].mxu1 %vm499_vm2, %v3547_v25 }
0x23c4   : > { %v3616_v22 = vpop.f32.mrb[10].mxu1 }
0x23c5   : > { %v3617_v30 = vadd.f32 %v5644_v24, %v3616_v22  ;;  %v4039_v47 = vpop.f32.mrb[11].mxu1 }
0x23c7   : > { %v3624_v28 = vadd.f32 %v3622_v43, %v3617_v30 }
0x23c9   : > { %v3839_v10 = vmul.f32 -1.442695, %v3624_v28 }
0x23cb   : > { %4402 = vpow2.f32 %v3839_v10 }
0x23d5   : > { %v4403_v49 = vpop.eup %4402 }
0x23d6   : > { %v3628_v0 = vadd.f32 1.0, %v4403_v49 }
0x23d8   : > { %4404 = vrcp.f32 %v3628_v0 }
0x23e2   : > { %v4405_v59 = vpop.eup %4404 }
0x23e3   : > { %v3634_v31 = vmul.f32 %v4405_v59, %v3632_v61  ;;  %v3641_v11 = vsub.f32 1.0, %v4405_v59  ;;  %v3647_v4 = vmul.f32 %v4405_v59, %v5664_v50 }
0x23e5   : > { %3636 = vrot.lane.b32.xlu0 %v3634_v31, %s4689_s27 }
0x2457   : > { %v3637_v34 = vpop.permute.xlu0 %3636 }
0x2458   : > { %v3639_v26 = vadd.f32 %v3637_v34, %v3617_v30 }
0x245a   : > { %4406 = vtanh.f32 %v3639_v26 }
0x2464   : > { %v4407_v24 = vpop.eup %4406 }
0x2465   : > { %3643 = vrot.lane.b32.xlu0 %v4407_v24, %s4690_s1 }
0x24d7   : > { %v3644_v62 = vpop.permute.xlu0 %3643 }
0x24d8   : > { %v3646_v53 = vmul.f32 %v3644_v62, %v3641_v11 }
0x24da   : > { %v3648_v23 = vadd.f32 %v3647_v4, %v3646_v53 }
0x24dc   : > { %3650 = vrot.lane.b32.xlu0 %v3648_v23, %s4690_s1  ;;  %s4601_s1 = sshll.u32 %s4694_s19, 4  ;;  %s4602_s1 = int_to_ptr.vmem [resolvable:$false] %s4601_s1 }
0x24dd   : > { %s4603_s24 = scalar_lea.vmem %s4602_s1, 1024  ;;  %p4604_p0 = scmp.lt.s32.totalorder %s5800_s23, %s4602_s1 }
0x24de   : > { %p4605_p2 = scmp.lt.s32.totalorder %s4603_s24, %s4597_s18 }
0x24e0   : > { %p4606_p9 = por %p4605_p2, %p4604_p0 }
0x24e2   : > { %p4607_p7 = pnand %p4606_p9, %p4600_p13 }
0x254e   : > { %v3651_v40 = vpop.permute.xlu0 %3650 }
0x254f   : > { %3840 = vst.msk [vmem:[%s5024_s20 + $0x18] sm:$0xff] %vm499_vm2, %v3651_v40  ;;  %3655 = vst.msk [vmem:[#allocation2] sm:$0xff] %vm499_vm2, %v3651_v40 }
0x2550   : > { %4610 = shalt.err (!%p4607_p7)
}
0x2551   : > { %s4611_s20 = scalar_lea.hbm %s5798_s8, 512  ;;  %s4615_s27 = scalar_lea.hbm %s5916_s28, 1024 }
0x2552   : > { %p4612_p5 = scmp.ne.s32.totalorder %s5798_s8, %s4611_s20  ;;  %p4616_p6 = scmp.lt.u32.totalorder %s5798_s8, %s5916_s28 }
0x2553   : > { %p4617_p10 = scmp.lt.u32.totalorder %s4615_s27, %s4611_s20  ;;  %p4619_p3 = scmp.lt.u32.totalorder %s4611_s20, %s5798_s8 }
0x2554   : > { %p4613_p11 = pnand %p4612_p5, %p5917_p12 }
0x2555   : > { %p4618_p8 = por %p4617_p10, %p4616_p6 }
0x2556   : > { %p4614_p4 = pneg %p4613_p11 }
0x2557   : > { %p4620_p1 = por %p4619_p3, %p4618_p8 }
0x2559   : > { %p4621_p13 = pnand %p4620_p1, %p4614_p4 }
0x255b   : > { %4624 = shalt.err (!%p4621_p13)
}
0x255c   : > { %s4695_s18 = smov 128   ;;  %s4696_s1 = smov 8  }
0x255d   : > { %4134 = dma.vmem_to_hbm [thread:$0]  (%p5917_p12), %s5800_s23, 512, %s5798_s8, %s3657_s21, %s4695_s18, %s4695_s18, %s4696_s1  }
0x255e PF: > { %s3685_s24 = sand.u32 1, %s4663_s13   ;;  %p5918_p0 = scmp.ne.s32.totalorder %s5886_s12, 0 }
0x255f   : > { %p5919_p2 = scmp.ge.s32.totalorder %s4675_s16, 2  ;;  %s3686_s20 = scalar_lea.sflag [#allocation5], %s3685_s24 }
0x2561   : > { %p4157_p9 = pnand %p5919_p2, %p5918_p0 }
0x2563   : > { %4658 = dma.done.wait (!%p4157_p9), %s3686_s20, 512  }
0x2564   : > { %4660 = vsyncadd (!%p4157_p9), %s3686_s20, 4294966784  ;;  %p26_p7 = scmp.ge.s32.totalorder %s4926_s11, 4   ;;  %s5920_s13 = smov %s4667_s14 }
0x2565   : > { %s5921_s14 = smov %s4671_s15  ;;  %s5922_s15 = smov %s4938_s10 }
0x2566   : > { %s5923_s16 = smov %s4926_s11  ;;  %28 = sbr.rel (!%p26_p7) target bundleno = 12 (0xc), region = 135 }
0x256d   :  { %3691 = vsyncpa [#allocation4], 1 }
0x256e   :  { %3693 = vsyncpa [#allocation4 + $0x1], 1 }
0x256f   :  { %3694 = vsyncpa [#allocation7], 1 }
0x2570   :  { %3695 = vsyncpa [#allocation10], 1 }
0x2571   :  { %3696 = vsyncpa [#allocation13], 1 }
0x2572   :  { %3697 = vsyncpa [#allocation5], 1 }
0x2573   :  { %3699 = vsyncpa [#allocation5 + $0x1], 1 }

</bundles_post_ra>
